<compile_context>
chip_gen: v5e
topology: v5e:2x2
jax: 0.10.0
libtpu: 0.0.40
codegen_flags: <defaults>
</compile_context>

<pallas_src>
import functools

import jax
import jax.numpy as jnp
from jax.experimental import pallas as pl
from jax.experimental.pallas import tpu as pltpu

# ----------------------------- small synthetic config -----------------------------
HIDDEN = 32
INTERMEDIATE = 128
NUM_HEADS = 4
HEAD_DIM = HIDDEN // NUM_HEADS
CONV_KERNEL = 7
CONV_GROUP_SIZE = 4            # channels per conv group -> groups = HIDDEN // CONV_GROUP_SIZE
FFN_GROUPS = 4                 # GroupBERT grouped FFN down-projection (+ output shuffle)
LN_EPS = 1e-12
BATCH = 2
SEQ = 8

VEC_WIDTH = max(128, INTERMEDIATE, 3 * HIDDEN, 2 * HIDDEN)   # packed-parameter slab width

_PARALLEL = pltpu.CompilerParams(dimension_semantics=("parallel",))


# ----------------------------- in-kernel helpers (f32 math) -----------------------------
def _bf16(x):
    return x.astype(jnp.bfloat16)


def _gelu(x):
    # tanh-approx GELU (exp/tanh -> EUP slot, effectively free inside the fused kernel).
    return jax.nn.gelu(x, approximate=True)


def _layernorm(y, gamma, beta, eps):
    mu = jnp.mean(y, axis=-1, keepdims=True)
    var = jnp.mean(jnp.square(y - mu), axis=-1, keepdims=True)
    return (y - mu) * jax.lax.rsqrt(var + eps) * gamma + beta


# ----------------------------- fused Pallas kernels -----------------------------
def _conv_ffn_kernel(x_ref, wglu_ref, wconv_ref, wcout_ref, wup_ref, wdown_ref,
                     vec_ref, o_ref, padg_ref,
                     *, hidden, inter, ksize, seq, groups, gsize, eps):
    # One batch element per grid step:
    #   GroupBertConvolution: GLU(Linear(x)) -> grouped seq-conv ('same' pad) -> GELU
    #                         -> Linear -> LN(x + res)
    #   followed by FFN#1:    dense-up + GELU + grouped-down (shuffle folded into the
    #                         weight at init) + residual + LN
    H, I, K, S, G, gs = hidden, inter, ksize, seq, groups, gsize
    pad_l = (K - 1) // 2
    pad_r = K - 1 - pad_l

    x = x_ref[0].astype(jnp.float32)                                     # (S, H)
    xb = _bf16(x)

    # --- GLU projection (single fused [Wa|Wb] matmul, split in-register) ---
    proj = jnp.dot(xb, wglu_ref[...],
                   preferred_element_type=jnp.float32) + vec_ref[0:1, :2 * H]   # (S, 2H)
    glu = proj[:, :H] * jax.nn.sigmoid(proj[:, H:])                      # (S, H)

    # --- grouped seq-conv: padded + per-group staged VMEM scratch, then K per-tap
    #     batched MXU dots using only the true grouped weights (no densification) ---
    padg_ref[:, :pad_l, :] = jnp.zeros((G, pad_l, gs), jnp.float32)      # left zero pad
    padg_ref[:, pad_l + S:, :] = jnp.zeros((G, pad_r, gs), jnp.float32)  # right zero pad
    for g in range(G):
        padg_ref[g, pad_l:pad_l + S, :] = glu[:, g * gs:(g + 1) * gs]
    xg = _bf16(padg_ref[...])                                            # (G, S+K-1, gs)

    conv_g = jnp.zeros((G, S, gs), jnp.float32)
    for k in range(K):                                                   # per-tap MAC (static unroll)
        conv_g = conv_g + jax.lax.dot_general(
            xg[:, k:k + S, :], wconv_ref[k],
            (((2,), (1,)), ((0,), (0,))),                                # batched NN over groups
            preferred_element_type=jnp.float32)                          # (G, S, gs)
    conv = jnp.concatenate([conv_g[g] for g in range(G)], axis=1)        # (S, H)
    conv = conv + vec_ref[1:2, :H]

    # --- GELU -> output projection -> residual + LayerNorm ---
    act = _gelu(conv)
    cout = jnp.dot(_bf16(act), wcout_ref[...],
                   preferred_element_type=jnp.float32) + vec_ref[2:3, :H]
    y1 = _layernorm(cout + x, vec_ref[3:4, :H], vec_ref[4:5, :H], eps)

    # --- FFN #1 (GroupBertIntermediate + GroupBertOutput, shuffle folded at init) ---
    up = _gelu(jnp.dot(_bf16(y1), wup_ref[...],
                       preferred_element_type=jnp.float32) + vec_ref[5:6, :I])
    down = jnp.dot(_bf16(up), wdown_ref[...],
                   preferred_element_type=jnp.float32) + vec_ref[6:7, :H]
    y2 = _layernorm(down + y1, vec_ref[7:8, :H], vec_ref[8:9, :H], eps)

    o_ref[0] = y2.astype(o_ref.dtype)                                    # bf16 handoff


def _attn_ffn_kernel(x_ref, wqkv_ref, wo_ref, wup_ref, wdown_ref, vec_ref,
                     o_ref, head_scr,
                     *, hidden, inter, num_heads, head_dim, seq, eps):
    # Standard BERT MHA (mask/head_mask = None) fused with the self-output block and
    # FFN#2.  Heads are staged into a (3, nH, S, hd) scratch once and contracted with
    # batched dot_generals (heads = batch dim) instead of per-head tiny matmuls.
    H, I, nH, hd, S = hidden, inter, num_heads, head_dim, seq

    xb = _bf16(x_ref[0])                                                 # (S, H) bf16
    x = xb.astype(jnp.float32)

    qkv = jnp.dot(xb, wqkv_ref[...],
                  preferred_element_type=jnp.float32) + vec_ref[0:1, :3 * H]     # (S, 3H)

    for h in range(nH):                                                  # stage per-head slabs once
        head_scr[0, h] = qkv[:, h * hd:(h + 1) * hd]
        head_scr[1, h] = qkv[:, H + h * hd:H + (h + 1) * hd]
        head_scr[2, h] = qkv[:, 2 * H + h * hd:2 * H + (h + 1) * hd]
    q_h = _bf16(head_scr[0])                                             # (nH, S, hd)
    k_h = _bf16(head_scr[1])
    v_h = _bf16(head_scr[2])

    scale = 1.0 / (float(hd) ** 0.5)
    s = jax.lax.dot_general(q_h, k_h, (((2,), (2,)), ((0,), (0,))),      # 'hqd,hkd->hqk'
                            preferred_element_type=jnp.float32) * scale  # (nH, S, S)
    s = s - jnp.max(s, axis=-1, keepdims=True)
    p = jnp.exp(s)
    p = p * pl.reciprocal(jnp.sum(p, axis=-1, keepdims=True), approx=True)

    ctx = jax.lax.dot_general(_bf16(p), v_h, (((2,), (1,)), ((0,), (0,))),
                              preferred_element_type=jnp.float32)        # (nH, S, hd)
    ctx_row = jnp.concatenate([ctx[h] for h in range(nH)], axis=1)       # (S, H)

    attn = jnp.dot(_bf16(ctx_row), wo_ref[...],
                   preferred_element_type=jnp.float32) + vec_ref[1:2, :H]
    y1 = _layernorm(attn + x, vec_ref[2:3, :H], vec_ref[3:4, :H], eps)

    # --- FFN #2 ---
    up = _gelu(jnp.dot(_bf16(y1), wup_ref[...],
                       preferred_element_type=jnp.float32) + vec_ref[4:5, :I])
    down = jnp.dot(_bf16(up), wdown_ref[...],
                   preferred_element_type=jnp.float32) + vec_ref[5:6, :H]
    y2 = _layernorm(down + y1, vec_ref[6:7, :H], vec_ref[7:8, :H], eps)

    o_ref[0] = y2.astype(o_ref.dtype)                                    # f32 module output


# ----------------------------- pallas_call wrappers -----------------------------
def conv_ffn_block(x, p):
    B, S, H = x.shape
    I = p["w_up"].shape[1]
    K, G, gs = p["w_conv"].shape[0], p["w_conv"].shape[1], p["w_conv"].shape[2]
    kernel = functools.partial(_conv_ffn_kernel, hidden=H, inter=I, ksize=K,
                               seq=S, groups=G, gsize=gs, eps=LN_EPS)
    return pl.pallas_call(
        kernel,
        out_shape=jax.ShapeDtypeStruct((B, S, H), jnp.bfloat16),       # bf16 inter-module handoff
        grid=(B,),
        in_specs=[
            pl.BlockSpec((1, S, H), lambda b: (b, 0, 0)),              # activations
            pl.BlockSpec((H, 2 * H), lambda b: (0, 0)),                # GLU weight [Wa|Wb] (bf16)
            pl.BlockSpec((K, G, gs, gs), lambda b: (0, 0, 0, 0)),      # true grouped conv weight (bf16)
            pl.BlockSpec((H, H), lambda b: (0, 0)),                    # conv out-proj weight (bf16)
            pl.BlockSpec((H, I), lambda b: (0, 0)),                    # FFN up-proj weight (bf16)
            pl.BlockSpec((I, H), lambda b: (0, 0)),                    # FFN shuffled down-proj (bf16)
            pl.BlockSpec((9, VEC_WIDTH), lambda b: (0, 0)),            # packed bias/LN slab (f32)
        ],
        out_specs=pl.BlockSpec((1, S, H), lambda b: (b, 0, 0)),
        scratch_shapes=[pltpu.VMEM((G, S + K - 1, gs), jnp.float32)],  # padded grouped conv staging
        compiler_params=_PARALLEL,
    )(x, p["w_glu"], p["w_conv"], p["w_cout"], p["w_up"], p["w_down"], p["vec"])


def attn_ffn_block(x, p):
    B, S, H = x.shape
    I = p["w_up"].shape[1]
    kernel = functools.partial(_attn_ffn_kernel, hidden=H, inter=I,
                               num_heads=NUM_HEADS, head_dim=HEAD_DIM, seq=S, eps=LN_EPS)
    return pl.pallas_call(
        kernel,
        out_shape=jax.ShapeDtypeStruct((B, S, H), jnp.float32),        # final layer output (f32)
        grid=(B,),
        in_specs=[
            pl.BlockSpec((1, S, H), lambda b: (b, 0, 0)),              # activations (bf16)
            pl.BlockSpec((H, 3 * H), lambda b: (0, 0)),                # fused QKV weight (bf16)
            pl.BlockSpec((H, H), lambda b: (0, 0)),                    # attention out-proj (bf16)
            pl.BlockSpec((H, I), lambda b: (0, 0)),                    # FFN up-proj weight (bf16)
            pl.BlockSpec((I, H), lambda b: (0, 0)),                    # FFN shuffled down-proj (bf16)
            pl.BlockSpec((8, VEC_WIDTH), lambda b: (0, 0)),            # packed bias/LN slab (f32)
        ],
        out_specs=pl.BlockSpec((1, S, H), lambda b: (b, 0, 0)),
        scratch_shapes=[pltpu.VMEM((3, NUM_HEADS, S, HEAD_DIM), jnp.float32)],  # q/k/v head staging
        compiler_params=_PARALLEL,
    )(x, p["w_qkv"], p["w_o"], p["w_up"], p["w_down"], p["vec"])


def groupbert_layer_forward(params, hidden_states):
    # convolution module + FFN#1 -> self-attention + FFN#2  (two fused launches)
    y = conv_ffn_block(hidden_states, params["conv_ffn"])   # f32 in, bf16 out
    y = attn_ffn_block(y, params["attn_ffn"])               # bf16 in, f32 out
    return y


# ----------------------------- deterministic params -----------------------------
def _per_tap_conv_weight(w_conv, gsize):
    # PyTorch grouped Conv1d weight (H_out, gs_in, K) -> (K, G, gs_in, gs_out) so each
    # tap is a batched-over-groups (gs_in, gs_out) matmul.  Only the true parameters
    # are stored (no block-diagonal densification).
    H, gs, K = w_conv.shape
    G = H // gsize
    wr = w_conv.reshape(G, gsize, gs, K)            # [g, d(out), c(in), k]
    return jnp.transpose(wr, (3, 0, 2, 1))          # [k, g, c(in), d(out)]


def _expand_group_linear(w_g):
    # (G, I/G, H/G) grouped linear -> block-diagonal dense (I, H)   (FFN down-proj;
    # waste factor is only FFN_GROUPS and it keeps the FFN a single dense MXU dot).
    G, Ig, Hg = w_g.shape
    wd = jnp.zeros((G * Ig, G * Hg), jnp.float32)
    for g in range(G):
        wd = wd.at[g * Ig:(g + 1) * Ig, g * Hg:(g + 1) * Hg].set(w_g[g])
    return wd


def _fold_ffn_shuffle(w_dense, b, groups):
    # Runtime shuffle: y.reshape(M,G,H/G).transpose(0,2,1).reshape(M,H)
    #   == y[:, perm] with perm[j] = (j % G) * (H/G) + j // G.
    # Fold it into the down-projection weight columns / bias (zero runtime cost).
    H = w_dense.shape[1]
    Hg = H // groups
    perm = jnp.array([(j % groups) * Hg + (j // groups) for j in range(H)], jnp.int32)
    return w_dense[:, perm], b[perm]


def _pack_rows(vectors, width):
    # Pack small f32 vectors (biases, LN gamma/beta) into one (rows, width) slab.
    slab = jnp.zeros((len(vectors), width), jnp.float32)
    for i, v in enumerate(vectors):
        slab = slab.at[i, :v.shape[0]].set(v.astype(jnp.float32))
    return slab


def init_params(key):
    H, I, K, gs, Gffn = HIDDEN, INTERMEDIATE, CONV_KERNEL, CONV_GROUP_SIZE, FFN_GROUPS
    Gc = H // gs
    assert H % NUM_HEADS == 0 and H % gs == 0 and H % Gffn == 0 and I % Gffn == 0
    keys = iter(jax.random.split(key, 48))

    def rnd(shape, scale=0.05):
        return scale * jax.random.normal(next(keys), shape, jnp.float32)

    def make_ffn():
        w_down_dense = _expand_group_linear(rnd((Gffn, I // Gffn, H // Gffn)))
        b_down = rnd((H,))
        w_down, b_down = _fold_ffn_shuffle(w_down_dense, b_down, Gffn)
        return (rnd((H, I)).astype(jnp.bfloat16), rnd((I,)),
                w_down.astype(jnp.bfloat16), b_down,
                1.0 + rnd((H,)), rnd((H,)))

    # --- convolution module + FFN#1 ---
    w_glu, b_glu = rnd((H, 2 * H)), rnd((2 * H,))
    w_conv_torch, b_conv = rnd((H, gs, K)), rnd((H,))         # PyTorch grouped Conv1d layout
    w_cout, b_cout = rnd((H, H)), rnd((H,))
    ln1_g, ln1_b = 1.0 + rnd((H,)), rnd((H,))
    w_up1, b_up1, w_down1, b_down1, ln2_g, ln2_b = make_ffn()
    conv_ffn = {
        "w_glu": w_glu.astype(jnp.bfloat16),
        "w_conv": _per_tap_conv_weight(w_conv_torch, gs).astype(jnp.bfloat16),   # (K, Gc, gs, gs)
        "w_cout": w_cout.astype(jnp.bfloat16),
        "w_up": w_up1, "w_down": w_down1,
        "vec": _pack_rows([b_glu, b_conv, b_cout, ln1_g, ln1_b,
                           b_up1, b_down1, ln2_g, ln2_b], VEC_WIDTH),
    }

    # --- self-attention + FFN#2 ---
    wq, bq = rnd((H, H)), rnd((H,))
    wk, bk = rnd((H, H)), rnd((H,))
    wv, bv = rnd((H, H)), rnd((H,))
    w_o, b_o = rnd((H, H)), rnd((H,))
    ln3_g, ln3_b = 1.0 + rnd((H,)), rnd((H,))
    w_up2, b_up2, w_down2, b_down2, ln4_g, ln4_b = make_ffn()
    attn_ffn = {
        "w_qkv": jnp.concatenate([wq, wk, wv], axis=1).astype(jnp.bfloat16),
        "w_o": w_o.astype(jnp.bfloat16),
        "w_up": w_up2, "w_down": w_down2,
        "vec": _pack_rows([jnp.concatenate([bq, bk, bv], axis=0), b_o, ln3_g, ln3_b,
                           b_up2, b_down2, ln4_g, ln4_b], VEC_WIDTH),
    }

    return {"conv_ffn": conv_ffn, "attn_ffn": attn_ffn}


if __name__ == "__main__":
    key = jax.random.PRNGKey(0)
    pkey, xkey = jax.random.split(key)
    params = init_params(pkey)
    hidden_states = jax.random.normal(xkey, (BATCH, SEQ, HIDDEN), jnp.float32)

    out = jax.jit(groupbert_layer_forward)(params, hidden_states)
    out = jax.block_until_ready(out)

    assert out.shape == (BATCH, SEQ, HIDDEN)
    assert out.dtype == jnp.float32
    assert bool(jnp.all(jnp.isfinite(out)))
    print("KERNEL_OK")
</pallas_src>

<mosaic_0001>
module attributes {stable_mosaic.version = 11 : i64} {
  func.func @_conv_ffn_kernel(%arg0: i32, %arg1: memref<1x8x32xf32, #tpu.memory_space<vmem>>, %arg2: memref<32x64xbf16, #tpu.memory_space<vmem>>, %arg3: memref<7x8x4x4xbf16, #tpu.memory_space<vmem>>, %arg4: memref<32x32xbf16, #tpu.memory_space<vmem>>, %arg5: memref<32x128xbf16, #tpu.memory_space<vmem>>, %arg6: memref<128x32xbf16, #tpu.memory_space<vmem>>, %arg7: memref<9x128xf32, #tpu.memory_space<vmem>>, %arg8: memref<1x8x32xbf16, #tpu.memory_space<vmem>>, %arg9: memref<8x14x4xf32, #tpu.memory_space<vmem>>) attributes {dimension_semantics = [#tpu.dimension_semantics<parallel>], iteration_bounds = array<i64: 2>, scalar_prefetch = 0 : i64, scratch_operands = 1 : i64, tpu.core_type = #tpu.core_type<tc>, window_params = [{transform_indices = @transform_0, window_bounds = array<i64: 1, 8, 32>}, {pipeline_mode = #tpu.pipeline_mode<synchronous>, transform_indices = @transform_1, window_bounds = array<i64: 32, 64>}, {pipeline_mode = #tpu.pipeline_mode<synchronous>, transform_indices = @transform_2, window_bounds = array<i64: 7, 8, 4, 4>}, {pipeline_mode = #tpu.pipeline_mode<synchronous>, transform_indices = @transform_3, window_bounds = array<i64: 32, 32>}, {pipeline_mode = #tpu.pipeline_mode<synchronous>, transform_indices = @transform_4, window_bounds = array<i64: 32, 128>}, {pipeline_mode = #tpu.pipeline_mode<synchronous>, transform_indices = @transform_5, window_bounds = array<i64: 128, 32>}, {pipeline_mode = #tpu.pipeline_mode<synchronous>, transform_indices = @transform_6, window_bounds = array<i64: 9, 128>}, {transform_indices = @transform_7, window_bounds = array<i64: 1, 8, 32>}]} {
    %c0 = arith.constant 0 : index
    %c0_0 = arith.constant 0 : index
    %c0_1 = arith.constant 0 : index
    %0 = vector.load %arg1[%c0, %c0_0, %c0_1] : memref<1x8x32xf32, #tpu.memory_space<vmem>>, vector<1x8x32xf32>
    %1 = vector.shape_cast %0 : vector<1x8x32xf32> to vector<8x32xf32>
    %2 = arith.truncf %1 : vector<8x32xf32> to vector<8x32xbf16>
    %c0_2 = arith.constant 0 : index
    %c0_3 = arith.constant 0 : index
    %3 = vector.load %arg2[%c0_2, %c0_3] : memref<32x64xbf16, #tpu.memory_space<vmem>>, vector<32x64xbf16>
    %cst = arith.constant dense<0.000000e+00> : vector<8x64xf32>
    %4 = tpu.matmul %2, %3, %cst {dimension_numbers = #tpu.dot_dimension_numbers<[1], [0], [0], [1], [0, 0, 1, 1], [], []>} : vector<8x32xbf16>, vector<32x64xbf16>, vector<8x64xf32> -> vector<8x64xf32>
    %c0_4 = arith.constant 0 : index
    %c0_5 = arith.constant 0 : index
    %5 = vector.load %arg7[%c0_4, %c0_5] : memref<9x128xf32, #tpu.memory_space<vmem>>, vector<1x64xf32>
    %6 = vector.broadcast %5 : vector<1x64xf32> to vector<8x64xf32>
    %7 = arith.addf %4, %6 : vector<8x64xf32>
    %8 = vector.extract_strided_slice %7 {offsets = [0, 0], sizes = [8, 32], strides = [1, 1]} : vector<8x64xf32> to vector<8x32xf32>
    %9 = vector.extract_strided_slice %7 {offsets = [0, 32], sizes = [8, 32], strides = [1, 1]} : vector<8x64xf32> to vector<8x32xf32>
    %10 = arith.negf %9 : vector<8x32xf32>
    %11 = math.exp %10 : vector<8x32xf32>
    %cst_6 = arith.constant 1.000000e+00 : f32
    %12 = vector.broadcast %cst_6 : f32 to vector<8x32xf32>
    %13 = arith.addf %12, %11 : vector<8x32xf32>
    %14 = arith.divf %12, %13 : vector<8x32xf32>
    %15 = arith.mulf %8, %14 : vector<8x32xf32>
    %cst_7 = arith.constant 0.000000e+00 : f32
    %16 = vector.broadcast %cst_7 : f32 to vector<8x3x4xf32>
    %c0_8 = arith.constant 0 : index
    %c0_9 = arith.constant 0 : index
    %c0_10 = arith.constant 0 : index
    %17 = vector.load %arg9[%c0_8, %c0_9, %c0_10] : memref<8x14x4xf32, #tpu.memory_space<vmem>>, vector<8x3x4xf32>
    tpu.vector_store %arg9[%c0_8, %c0_9, %c0_10], %16 {strides = array<i32>} : memref<8x14x4xf32, #tpu.memory_space<vmem>>, vector<8x3x4xf32>,
    %cst_11 = arith.constant 0.000000e+00 : f32
    %18 = vector.broadcast %cst_11 : f32 to vector<8x3x4xf32>
    %c0_12 = arith.constant 0 : index
    %c11 = arith.constant 11 : index
    %c0_13 = arith.constant 0 : index
    %19 = vector.load %arg9[%c0_12, %c11, %c0_13] : memref<8x14x4xf32, #tpu.memory_space<vmem>>, vector<8x3x4xf32>
    tpu.vector_store %arg9[%c0_12, %c11, %c0_13], %18 {strides = array<i32>} : memref<8x14x4xf32, #tpu.memory_space<vmem>>, vector<8x3x4xf32>,
    %20 = vector.extract_strided_slice %15 {offsets = [0, 0], sizes = [8, 4], strides = [1, 1]} : vector<8x32xf32> to vector<8x4xf32>
    %c0_14 = arith.constant 0 : index
    %c3 = arith.constant 3 : index
    %c0_15 = arith.constant 0 : index
    %21 = vector.load %arg9[%c0_14, %c3, %c0_15] : memref<8x14x4xf32, #tpu.memory_space<vmem>>, vector<1x8x4xf32>
    %22 = vector.shape_cast %21 : vector<1x8x4xf32> to vector<8x4xf32>
    %23 = vector.shape_cast %20 : vector<8x4xf32> to vector<1x8x4xf32>
    tpu.vector_store %arg9[%c0_14, %c3, %c0_15], %23 {strides = array<i32>} : memref<8x14x4xf32, #tpu.memory_space<vmem>>, vector<1x8x4xf32>,
    %24 = vector.extract_strided_slice %15 {offsets = [0, 4], sizes = [8, 4], strides = [1, 1]} : vector<8x32xf32> to vector<8x4xf32>
    %c1 = arith.constant 1 : index
    %c3_16 = arith.constant 3 : index
    %c0_17 = arith.constant 0 : index
    %25 = vector.load %arg9[%c1, %c3_16, %c0_17] : memref<8x14x4xf32, #tpu.memory_space<vmem>>, vector<1x8x4xf32>
    %26 = vector.shape_cast %25 : vector<1x8x4xf32> to vector<8x4xf32>
    %27 = vector.shape_cast %24 : vector<8x4xf32> to vector<1x8x4xf32>
    tpu.vector_store %arg9[%c1, %c3_16, %c0_17], %27 {strides = array<i32>} : memref<8x14x4xf32, #tpu.memory_space<vmem>>, vector<1x8x4xf32>,
    %28 = vector.extract_strided_slice %15 {offsets = [0, 8], sizes = [8, 4], strides = [1, 1]} : vector<8x32xf32> to vector<8x4xf32>
    %c2 = arith.constant 2 : index
    %c3_18 = arith.constant 3 : index
    %c0_19 = arith.constant 0 : index
    %29 = vector.load %arg9[%c2, %c3_18, %c0_19] : memref<8x14x4xf32, #tpu.memory_space<vmem>>, vector<1x8x4xf32>
    %30 = vector.shape_cast %29 : vector<1x8x4xf32> to vector<8x4xf32>
    %31 = vector.shape_cast %28 : vector<8x4xf32> to vector<1x8x4xf32>
    tpu.vector_store %arg9[%c2, %c3_18, %c0_19], %31 {strides = array<i32>} : memref<8x14x4xf32, #tpu.memory_space<vmem>>, vector<1x8x4xf32>,
    %32 = vector.extract_strided_slice %15 {offsets = [0, 12], sizes = [8, 4], strides = [1, 1]} : vector<8x32xf32> to vector<8x4xf32>
    %c3_20 = arith.constant 3 : index
    %c3_21 = arith.constant 3 : index
    %c0_22 = arith.constant 0 : index
    %33 = vector.load %arg9[%c3_20, %c3_21, %c0_22] : memref<8x14x4xf32, #tpu.memory_space<vmem>>, vector<1x8x4xf32>
    %34 = vector.shape_cast %33 : vector<1x8x4xf32> to vector<8x4xf32>
    %35 = vector.shape_cast %32 : vector<8x4xf32> to vector<1x8x4xf32>
    tpu.vector_store %arg9[%c3_20, %c3_21, %c0_22], %35 {strides = array<i32>} : memref<8x14x4xf32, #tpu.memory_space<vmem>>, vector<1x8x4xf32>,
    %36 = vector.extract_strided_slice %15 {offsets = [0, 16], sizes = [8, 4], strides = [1, 1]} : vector<8x32xf32> to vector<8x4xf32>
    %c4 = arith.constant 4 : index
    %c3_23 = arith.constant 3 : index
    %c0_24 = arith.constant 0 : index
    %37 = vector.load %arg9[%c4, %c3_23, %c0_24] : memref<8x14x4xf32, #tpu.memory_space<vmem>>, vector<1x8x4xf32>
    %38 = vector.shape_cast %37 : vector<1x8x4xf32> to vector<8x4xf32>
    %39 = vector.shape_cast %36 : vector<8x4xf32> to vector<1x8x4xf32>
    tpu.vector_store %arg9[%c4, %c3_23, %c0_24], %39 {strides = array<i32>} : memref<8x14x4xf32, #tpu.memory_space<vmem>>, vector<1x8x4xf32>,
    %40 = vector.extract_strided_slice %15 {offsets = [0, 20], sizes = [8, 4], strides = [1, 1]} : vector<8x32xf32> to vector<8x4xf32>
    %c5 = arith.constant 5 : index
    %c3_25 = arith.constant 3 : index
    %c0_26 = arith.constant 0 : index
    %41 = vector.load %arg9[%c5, %c3_25, %c0_26] : memref<8x14x4xf32, #tpu.memory_space<vmem>>, vector<1x8x4xf32>
    %42 = vector.shape_cast %41 : vector<1x8x4xf32> to vector<8x4xf32>
    %43 = vector.shape_cast %40 : vector<8x4xf32> to vector<1x8x4xf32>
    tpu.vector_store %arg9[%c5, %c3_25, %c0_26], %43 {strides = array<i32>} : memref<8x14x4xf32, #tpu.memory_space<vmem>>, vector<1x8x4xf32>,
    %44 = vector.extract_strided_slice %15 {offsets = [0, 24], sizes = [8, 4], strides = [1, 1]} : vector<8x32xf32> to vector<8x4xf32>
    %c6 = arith.constant 6 : index
    %c3_27 = arith.constant 3 : index
    %c0_28 = arith.constant 0 : index
    %45 = vector.load %arg9[%c6, %c3_27, %c0_28] : memref<8x14x4xf32, #tpu.memory_space<vmem>>, vector<1x8x4xf32>
    %46 = vector.shape_cast %45 : vector<1x8x4xf32> to vector<8x4xf32>
    %47 = vector.shape_cast %44 : vector<8x4xf32> to vector<1x8x4xf32>
    tpu.vector_store %arg9[%c6, %c3_27, %c0_28], %47 {strides = array<i32>} : memref<8x14x4xf32, #tpu.memory_space<vmem>>, vector<1x8x4xf32>,
    %48 = vector.extract_strided_slice %15 {offsets = [0, 28], sizes = [8, 4], strides = [1, 1]} : vector<8x32xf32> to vector<8x4xf32>
    %c7 = arith.constant 7 : index
    %c3_29 = arith.constant 3 : index
    %c0_30 = arith.constant 0 : index
    %49 = vector.load %arg9[%c7, %c3_29, %c0_30] : memref<8x14x4xf32, #tpu.memory_space<vmem>>, vector<1x8x4xf32>
    %50 = vector.shape_cast %49 : vector<1x8x4xf32> to vector<8x4xf32>
    %51 = vector.shape_cast %48 : vector<8x4xf32> to vector<1x8x4xf32>
    tpu.vector_store %arg9[%c7, %c3_29, %c0_30], %51 {strides = array<i32>} : memref<8x14x4xf32, #tpu.memory_space<vmem>>, vector<1x8x4xf32>,
    %c0_31 = arith.constant 0 : index
    %c0_32 = arith.constant 0 : index
    %c0_33 = arith.constant 0 : index
    %52 = vector.load %arg9[%c0_31, %c0_32, %c0_33] : memref<8x14x4xf32, #tpu.memory_space<vmem>>, vector<8x14x4xf32>
    %53 = arith.truncf %52 : vector<8x14x4xf32> to vector<8x14x4xbf16>
    %cst_34 = arith.constant 0.000000e+00 : f32
    %54 = vector.broadcast %cst_34 : f32 to vector<8x8x4xf32>
    %55 = vector.extract_strided_slice %53 {offsets = [0, 0, 0], sizes = [8, 8, 4], strides = [1, 1, 1]} : vector<8x14x4xbf16> to vector<8x8x4xbf16>
    %c0_35 = arith.constant 0 : index
    %c0_36 = arith.constant 0 : index
    %c0_37 = arith.constant 0 : index
    %c0_38 = arith.constant 0 : index
    %56 = vector.load %arg3[%c0_35, %c0_36, %c0_37, %c0_38] : memref<7x8x4x4xbf16, #tpu.memory_space<vmem>>, vector<1x8x4x4xbf16>
    %57 = vector.shape_cast %56 : vector<1x8x4x4xbf16> to vector<8x4x4xbf16>
    %cst_39 = arith.constant dense<0.000000e+00> : vector<8x8x4xf32>
    %58 = tpu.matmul %55, %57, %cst_39 {dimension_numbers = #tpu.dot_dimension_numbers<[2], [1], [1], [2], [0, 0, 0, 1, 1, 2], [0], [0]>} : vector<8x8x4xbf16>, vector<8x4x4xbf16>, vector<8x8x4xf32> -> vector<8x8x4xf32>
    %59 = arith.addf %54, %58 : vector<8x8x4xf32>
    %60 = vector.extract_strided_slice %53 {offsets = [0, 1, 0], sizes = [8, 8, 4], strides = [1, 1, 1]} : vector<8x14x4xbf16> to vector<8x8x4xbf16>
    %c1_40 = arith.constant 1 : index
    %c0_41 = arith.constant 0 : index
    %c0_42 = arith.constant 0 : index
    %c0_43 = arith.constant 0 : index
    %61 = vector.load %arg3[%c1_40, %c0_41, %c0_42, %c0_43] : memref<7x8x4x4xbf16, #tpu.memory_space<vmem>>, vector<1x8x4x4xbf16>
    %62 = vector.shape_cast %61 : vector<1x8x4x4xbf16> to vector<8x4x4xbf16>
    %cst_44 = arith.constant dense<0.000000e+00> : vector<8x8x4xf32>
    %63 = tpu.matmul %60, %62, %cst_44 {dimension_numbers = #tpu.dot_dimension_numbers<[2], [1], [1], [2], [0, 0, 0, 1, 1, 2], [0], [0]>} : vector<8x8x4xbf16>, vector<8x4x4xbf16>, vector<8x8x4xf32> -> vector<8x8x4xf32>
    %64 = arith.addf %59, %63 : vector<8x8x4xf32>
    %65 = vector.extract_strided_slice %53 {offsets = [0, 2, 0], sizes = [8, 8, 4], strides = [1, 1, 1]} : vector<8x14x4xbf16> to vector<8x8x4xbf16>
    %c2_45 = arith.constant 2 : index
    %c0_46 = arith.constant 0 : index
    %c0_47 = arith.constant 0 : index
    %c0_48 = arith.constant 0 : index
    %66 = vector.load %arg3[%c2_45, %c0_46, %c0_47, %c0_48] : memref<7x8x4x4xbf16, #tpu.memory_space<vmem>>, vector<1x8x4x4xbf16>
    %67 = vector.shape_cast %66 : vector<1x8x4x4xbf16> to vector<8x4x4xbf16>
    %cst_49 = arith.constant dense<0.000000e+00> : vector<8x8x4xf32>
    %68 = tpu.matmul %65, %67, %cst_49 {dimension_numbers = #tpu.dot_dimension_numbers<[2], [1], [1], [2], [0, 0, 0, 1, 1, 2], [0], [0]>} : vector<8x8x4xbf16>, vector<8x4x4xbf16>, vector<8x8x4xf32> -> vector<8x8x4xf32>
    %69 = arith.addf %64, %68 : vector<8x8x4xf32>
    %70 = vector.extract_strided_slice %53 {offsets = [0, 3, 0], sizes = [8, 8, 4], strides = [1, 1, 1]} : vector<8x14x4xbf16> to vector<8x8x4xbf16>
    %c3_50 = arith.constant 3 : index
    %c0_51 = arith.constant 0 : index
    %c0_52 = arith.constant 0 : index
    %c0_53 = arith.constant 0 : index
    %71 = vector.load %arg3[%c3_50, %c0_51, %c0_52, %c0_53] : memref<7x8x4x4xbf16, #tpu.memory_space<vmem>>, vector<1x8x4x4xbf16>
    %72 = vector.shape_cast %71 : vector<1x8x4x4xbf16> to vector<8x4x4xbf16>
    %cst_54 = arith.constant dense<0.000000e+00> : vector<8x8x4xf32>
    %73 = tpu.matmul %70, %72, %cst_54 {dimension_numbers = #tpu.dot_dimension_numbers<[2], [1], [1], [2], [0, 0, 0, 1, 1, 2], [0], [0]>} : vector<8x8x4xbf16>, vector<8x4x4xbf16>, vector<8x8x4xf32> -> vector<8x8x4xf32>
    %74 = arith.addf %69, %73 : vector<8x8x4xf32>
    %75 = vector.extract_strided_slice %53 {offsets = [0, 4, 0], sizes = [8, 8, 4], strides = [1, 1, 1]} : vector<8x14x4xbf16> to vector<8x8x4xbf16>
    %c4_55 = arith.constant 4 : index
    %c0_56 = arith.constant 0 : index
    %c0_57 = arith.constant 0 : index
    %c0_58 = arith.constant 0 : index
    %76 = vector.load %arg3[%c4_55, %c0_56, %c0_57, %c0_58] : memref<7x8x4x4xbf16, #tpu.memory_space<vmem>>, vector<1x8x4x4xbf16>
    %77 = vector.shape_cast %76 : vector<1x8x4x4xbf16> to vector<8x4x4xbf16>
    %cst_59 = arith.constant dense<0.000000e+00> : vector<8x8x4xf32>
    %78 = tpu.matmul %75, %77, %cst_59 {dimension_numbers = #tpu.dot_dimension_numbers<[2], [1], [1], [2], [0, 0, 0, 1, 1, 2], [0], [0]>} : vector<8x8x4xbf16>, vector<8x4x4xbf16>, vector<8x8x4xf32> -> vector<8x8x4xf32>
    %79 = arith.addf %74, %78 : vector<8x8x4xf32>
    %80 = vector.extract_strided_slice %53 {offsets = [0, 5, 0], sizes = [8, 8, 4], strides = [1, 1, 1]} : vector<8x14x4xbf16> to vector<8x8x4xbf16>
    %c5_60 = arith.constant 5 : index
    %c0_61 = arith.constant 0 : index
    %c0_62 = arith.constant 0 : index
    %c0_63 = arith.constant 0 : index
    %81 = vector.load %arg3[%c5_60, %c0_61, %c0_62, %c0_63] : memref<7x8x4x4xbf16, #tpu.memory_space<vmem>>, vector<1x8x4x4xbf16>
    %82 = vector.shape_cast %81 : vector<1x8x4x4xbf16> to vector<8x4x4xbf16>
    %cst_64 = arith.constant dense<0.000000e+00> : vector<8x8x4xf32>
    %83 = tpu.matmul %80, %82, %cst_64 {dimension_numbers = #tpu.dot_dimension_numbers<[2], [1], [1], [2], [0, 0, 0, 1, 1, 2], [0], [0]>} : vector<8x8x4xbf16>, vector<8x4x4xbf16>, vector<8x8x4xf32> -> vector<8x8x4xf32>
    %84 = arith.addf %79, %83 : vector<8x8x4xf32>
    %85 = vector.extract_strided_slice %53 {offsets = [0, 6, 0], sizes = [8, 8, 4], strides = [1, 1, 1]} : vector<8x14x4xbf16> to vector<8x8x4xbf16>
    %c6_65 = arith.constant 6 : index
    %c0_66 = arith.constant 0 : index
    %c0_67 = arith.constant 0 : index
    %c0_68 = arith.constant 0 : index
    %86 = vector.load %arg3[%c6_65, %c0_66, %c0_67, %c0_68] : memref<7x8x4x4xbf16, #tpu.memory_space<vmem>>, vector<1x8x4x4xbf16>
    %87 = vector.shape_cast %86 : vector<1x8x4x4xbf16> to vector<8x4x4xbf16>
    %cst_69 = arith.constant dense<0.000000e+00> : vector<8x8x4xf32>
    %88 = tpu.matmul %85, %87, %cst_69 {dimension_numbers = #tpu.dot_dimension_numbers<[2], [1], [1], [2], [0, 0, 0, 1, 1, 2], [0], [0]>} : vector<8x8x4xbf16>, vector<8x4x4xbf16>, vector<8x8x4xf32> -> vector<8x8x4xf32>
    %89 = arith.addf %84, %88 : vector<8x8x4xf32>
    %90 = vector.extract_strided_slice %89 {offsets = [0, 0, 0], sizes = [1, 8, 4], strides = [1, 1, 1]} : vector<8x8x4xf32> to vector<1x8x4xf32>
    %91 = vector.shape_cast %90 : vector<1x8x4xf32> to vector<8x4xf32>
    %92 = vector.extract_strided_slice %89 {offsets = [1, 0, 0], sizes = [1, 8, 4], strides = [1, 1, 1]} : vector<8x8x4xf32> to vector<1x8x4xf32>
    %93 = vector.shape_cast %92 : vector<1x8x4xf32> to vector<8x4xf32>
    %94 = vector.extract_strided_slice %89 {offsets = [2, 0, 0], sizes = [1, 8, 4], strides = [1, 1, 1]} : vector<8x8x4xf32> to vector<1x8x4xf32>
    %95 = vector.shape_cast %94 : vector<1x8x4xf32> to vector<8x4xf32>
    %96 = vector.extract_strided_slice %89 {offsets = [3, 0, 0], sizes = [1, 8, 4], strides = [1, 1, 1]} : vector<8x8x4xf32> to vector<1x8x4xf32>
    %97 = vector.shape_cast %96 : vector<1x8x4xf32> to vector<8x4xf32>
    %98 = vector.extract_strided_slice %89 {offsets = [4, 0, 0], sizes = [1, 8, 4], strides = [1, 1, 1]} : vector<8x8x4xf32> to vector<1x8x4xf32>
    %99 = vector.shape_cast %98 : vector<1x8x4xf32> to vector<8x4xf32>
    %100 = vector.extract_strided_slice %89 {offsets = [5, 0, 0], sizes = [1, 8, 4], strides = [1, 1, 1]} : vector<8x8x4xf32> to vector<1x8x4xf32>
    %101 = vector.shape_cast %100 : vector<1x8x4xf32> to vector<8x4xf32>
    %102 = vector.extract_strided_slice %89 {offsets = [6, 0, 0], sizes = [1, 8, 4], strides = [1, 1, 1]} : vector<8x8x4xf32> to vector<1x8x4xf32>
    %103 = vector.shape_cast %102 : vector<1x8x4xf32> to vector<8x4xf32>
    %104 = vector.extract_strided_slice %89 {offsets = [7, 0, 0], sizes = [1, 8, 4], strides = [1, 1, 1]} : vector<8x8x4xf32> to vector<1x8x4xf32>
    %105 = vector.shape_cast %104 : vector<1x8x4xf32> to vector<8x4xf32>
    %106 = tpu.concatenate %91, %93, %95, %97, %99, %101, %103, %105 in 1 : vector<8x4xf32>, vector<8x4xf32>, vector<8x4xf32>, vector<8x4xf32>, vector<8x4xf32>, vector<8x4xf32>, vector<8x4xf32>, vector<8x4xf32> -> vector<8x32xf32>
    %c1_70 = arith.constant 1 : index
    %c0_71 = arith.constant 0 : index
    %107 = vector.load %arg7[%c1_70, %c0_71] : memref<9x128xf32, #tpu.memory_space<vmem>>, vector<1x32xf32>
    %108 = vector.broadcast %107 : vector<1x32xf32> to vector<8x32xf32>
    %109 = arith.addf %106, %108 : vector<8x32xf32>
    %110 = arith.mulf %109, %109 : vector<8x32xf32>
    %111 = arith.mulf %109, %110 : vector<8x32xf32>
    %cst_72 = arith.constant 4.471500e-02 : f32
    %112 = vector.broadcast %cst_72 : f32 to vector<8x32xf32>
    %113 = arith.mulf %112, %111 : vector<8x32xf32>
    %114 = arith.addf %109, %113 : vector<8x32xf32>
    %cst_73 = arith.constant 0.797884583 : f32
    %115 = vector.broadcast %cst_73 : f32 to vector<8x32xf32>
    %116 = arith.mulf %115, %114 : vector<8x32xf32>
    %117 = math.tanh %116 : vector<8x32xf32>
    %cst_74 = arith.constant 1.000000e+00 : f32
    %118 = vector.broadcast %cst_74 : f32 to vector<8x32xf32>
    %119 = arith.addf %118, %117 : vector<8x32xf32>
    %cst_75 = arith.constant 5.000000e-01 : f32
    %120 = vector.broadcast %cst_75 : f32 to vector<8x32xf32>
    %121 = arith.mulf %120, %119 : vector<8x32xf32>
    %122 = arith.mulf %109, %121 : vector<8x32xf32>
    %123 = arith.truncf %122 : vector<8x32xf32> to vector<8x32xbf16>
    %c0_76 = arith.constant 0 : index
    %c0_77 = arith.constant 0 : index
    %124 = vector.load %arg4[%c0_76, %c0_77] : memref<32x32xbf16, #tpu.memory_space<vmem>>, vector<32x32xbf16>
    %cst_78 = arith.constant dense<0.000000e+00> : vector<8x32xf32>
    %125 = tpu.matmul %123, %124, %cst_78 {dimension_numbers = #tpu.dot_dimension_numbers<[1], [0], [0], [1], [0, 0, 1, 1], [], []>} : vector<8x32xbf16>, vector<32x32xbf16>, vector<8x32xf32> -> vector<8x32xf32>
    %c2_79 = arith.constant 2 : index
    %c0_80 = arith.constant 0 : index
    %126 = vector.load %arg7[%c2_79, %c0_80] : memref<9x128xf32, #tpu.memory_space<vmem>>, vector<1x32xf32>
    %127 = vector.broadcast %126 : vector<1x32xf32> to vector<8x32xf32>
    %128 = arith.addf %125, %127 : vector<8x32xf32>
    %129 = arith.addf %128, %1 : vector<8x32xf32>
    %c3_81 = arith.constant 3 : index
    %c0_82 = arith.constant 0 : index
    %130 = vector.load %arg7[%c3_81, %c0_82] : memref<9x128xf32, #tpu.memory_space<vmem>>, vector<1x32xf32>
    %c4_83 = arith.constant 4 : index
    %c0_84 = arith.constant 0 : index
    %131 = vector.load %arg7[%c4_83, %c0_84] : memref<9x128xf32, #tpu.memory_space<vmem>>, vector<1x32xf32>
    %cst_85 = arith.constant dense<0.000000e+00> : vector<8xf32>
    %132 = vector.multi_reduction <add>, %129, %cst_85 [1] : vector<8x32xf32> to vector<8xf32>
    %133 = vector.shape_cast %132 : vector<8xf32> to vector<8x1xf32>
    %cst_86 = arith.constant 3.200000e+01 : f32
    %134 = vector.broadcast %cst_86 : f32 to vector<8x1xf32>
    %135 = arith.divf %133, %134 : vector<8x1xf32>
    %136 = vector.broadcast %135 : vector<8x1xf32> to vector<8x32xf32>
    %137 = arith.subf %129, %136 : vector<8x32xf32>
    %138 = arith.mulf %137, %137 : vector<8x32xf32>
    %cst_87 = arith.constant dense<0.000000e+00> : vector<8xf32>
    %139 = vector.multi_reduction <add>, %138, %cst_87 [1] : vector<8x32xf32> to vector<8xf32>
    %140 = vector.shape_cast %139 : vector<8xf32> to vector<8x1xf32>
    %cst_88 = arith.constant 3.200000e+01 : f32
    %141 = vector.broadcast %cst_88 : f32 to vector<8x1xf32>
    %142 = arith.divf %140, %141 : vector<8x1xf32>
    %143 = vector.broadcast %135 : vector<8x1xf32> to vector<8x32xf32>
    %144 = arith.subf %129, %143 : vector<8x32xf32>
    %cst_89 = arith.constant 9.99999996E-13 : f32
    %145 = vector.broadcast %cst_89 : f32 to vector<8x1xf32>
    %146 = arith.addf %142, %145 : vector<8x1xf32>
    %147 = math.rsqrt %146 : vector<8x1xf32>
    %148 = vector.broadcast %147 : vector<8x1xf32> to vector<8x32xf32>
    %149 = arith.mulf %144, %148 : vector<8x32xf32>
    %150 = vector.broadcast %130 : vector<1x32xf32> to vector<8x32xf32>
    %151 = arith.mulf %149, %150 : vector<8x32xf32>
    %152 = vector.broadcast %131 : vector<1x32xf32> to vector<8x32xf32>
    %153 = arith.addf %151, %152 : vector<8x32xf32>
    %154 = arith.truncf %153 : vector<8x32xf32> to vector<8x32xbf16>
    %c0_90 = arith.constant 0 : index
    %c0_91 = arith.constant 0 : index
    %155 = vector.load %arg5[%c0_90, %c0_91] : memref<32x128xbf16, #tpu.memory_space<vmem>>, vector<32x128xbf16>
    %cst_92 = arith.constant dense<0.000000e+00> : vector<8x128xf32>
    %156 = tpu.matmul %154, %155, %cst_92 {dimension_numbers = #tpu.dot_dimension_numbers<[1], [0], [0], [1], [0, 0, 1, 1], [], []>} : vector<8x32xbf16>, vector<32x128xbf16>, vector<8x128xf32> -> vector<8x128xf32>
    %c5_93 = arith.constant 5 : index
    %c0_94 = arith.constant 0 : index
    %157 = vector.load %arg7[%c5_93, %c0_94] : memref<9x128xf32, #tpu.memory_space<vmem>>, vector<1x128xf32>
    %158 = vector.broadcast %157 : vector<1x128xf32> to vector<8x128xf32>
    %159 = arith.addf %156, %158 : vector<8x128xf32>
    %160 = arith.mulf %159, %159 : vector<8x128xf32>
    %161 = arith.mulf %159, %160 : vector<8x128xf32>
    %cst_95 = arith.constant 4.471500e-02 : f32
    %162 = vector.broadcast %cst_95 : f32 to vector<8x128xf32>
    %163 = arith.mulf %162, %161 : vector<8x128xf32>
    %164 = arith.addf %159, %163 : vector<8x128xf32>
    %cst_96 = arith.constant 0.797884583 : f32
    %165 = vector.broadcast %cst_96 : f32 to vector<8x128xf32>
    %166 = arith.mulf %165, %164 : vector<8x128xf32>
    %167 = math.tanh %166 : vector<8x128xf32>
    %cst_97 = arith.constant 1.000000e+00 : f32
    %168 = vector.broadcast %cst_97 : f32 to vector<8x128xf32>
    %169 = arith.addf %168, %167 : vector<8x128xf32>
    %cst_98 = arith.constant 5.000000e-01 : f32
    %170 = vector.broadcast %cst_98 : f32 to vector<8x128xf32>
    %171 = arith.mulf %170, %169 : vector<8x128xf32>
    %172 = arith.mulf %159, %171 : vector<8x128xf32>
    %173 = arith.truncf %172 : vector<8x128xf32> to vector<8x128xbf16>
    %c0_99 = arith.constant 0 : index
    %c0_100 = arith.constant 0 : index
    %174 = vector.load %arg6[%c0_99, %c0_100] : memref<128x32xbf16, #tpu.memory_space<vmem>>, vector<128x32xbf16>
    %cst_101 = arith.constant dense<0.000000e+00> : vector<8x32xf32>
    %175 = tpu.matmul %173, %174, %cst_101 {dimension_numbers = #tpu.dot_dimension_numbers<[1], [0], [0], [1], [0, 0, 1, 1], [], []>} : vector<8x128xbf16>, vector<128x32xbf16>, vector<8x32xf32> -> vector<8x32xf32>
    %c6_102 = arith.constant 6 : index
    %c0_103 = arith.constant 0 : index
    %176 = vector.load %arg7[%c6_102, %c0_103] : memref<9x128xf32, #tpu.memory_space<vmem>>, vector<1x32xf32>
    %177 = vector.broadcast %176 : vector<1x32xf32> to vector<8x32xf32>
    %178 = arith.addf %175, %177 : vector<8x32xf32>
    %179 = arith.addf %178, %153 : vector<8x32xf32>
    %c7_104 = arith.constant 7 : index
    %c0_105 = arith.constant 0 : index
    %180 = vector.load %arg7[%c7_104, %c0_105] : memref<9x128xf32, #tpu.memory_space<vmem>>, vector<1x32xf32>
    %c8 = arith.constant 8 : index
    %c0_106 = arith.constant 0 : index
    %181 = vector.load %arg7[%c8, %c0_106] : memref<9x128xf32, #tpu.memory_space<vmem>>, vector<1x32xf32>
    %cst_107 = arith.constant dense<0.000000e+00> : vector<8xf32>
    %182 = vector.multi_reduction <add>, %179, %cst_107 [1] : vector<8x32xf32> to vector<8xf32>
    %183 = vector.shape_cast %182 : vector<8xf32> to vector<8x1xf32>
    %cst_108 = arith.constant 3.200000e+01 : f32
    %184 = vector.broadcast %cst_108 : f32 to vector<8x1xf32>
    %185 = arith.divf %183, %184 : vector<8x1xf32>
    %186 = vector.broadcast %185 : vector<8x1xf32> to vector<8x32xf32>
    %187 = arith.subf %179, %186 : vector<8x32xf32>
    %188 = arith.mulf %187, %187 : vector<8x32xf32>
    %cst_109 = arith.constant dense<0.000000e+00> : vector<8xf32>
    %189 = vector.multi_reduction <add>, %188, %cst_109 [1] : vector<8x32xf32> to vector<8xf32>
    %190 = vector.shape_cast %189 : vector<8xf32> to vector<8x1xf32>
    %cst_110 = arith.constant 3.200000e+01 : f32
    %191 = vector.broadcast %cst_110 : f32 to vector<8x1xf32>
    %192 = arith.divf %190, %191 : vector<8x1xf32>
    %193 = vector.broadcast %185 : vector<8x1xf32> to vector<8x32xf32>
    %194 = arith.subf %179, %193 : vector<8x32xf32>
    %cst_111 = arith.constant 9.99999996E-13 : f32
    %195 = vector.broadcast %cst_111 : f32 to vector<8x1xf32>
    %196 = arith.addf %192, %195 : vector<8x1xf32>
    %197 = math.rsqrt %196 : vector<8x1xf32>
    %198 = vector.broadcast %197 : vector<8x1xf32> to vector<8x32xf32>
    %199 = arith.mulf %194, %198 : vector<8x32xf32>
    %200 = vector.broadcast %180 : vector<1x32xf32> to vector<8x32xf32>
    %201 = arith.mulf %199, %200 : vector<8x32xf32>
    %202 = vector.broadcast %181 : vector<1x32xf32> to vector<8x32xf32>
    %203 = arith.addf %201, %202 : vector<8x32xf32>
    %204 = arith.truncf %203 : vector<8x32xf32> to vector<8x32xbf16>
    %c0_112 = arith.constant 0 : index
    %c0_113 = arith.constant 0 : index
    %c0_114 = arith.constant 0 : index
    %205 = vector.load %arg8[%c0_112, %c0_113, %c0_114] : memref<1x8x32xbf16, #tpu.memory_space<vmem>>, vector<1x8x32xbf16>
    %206 = vector.shape_cast %205 : vector<1x8x32xbf16> to vector<8x32xbf16>
    %207 = vector.shape_cast %204 : vector<8x32xbf16> to vector<1x8x32xbf16>
    tpu.vector_store %arg8[%c0_112, %c0_113, %c0_114], %207 {strides = array<i32>} : memref<1x8x32xbf16, #tpu.memory_space<vmem>>, vector<1x8x32xbf16>,
    return
  }
  func.func @transform_0(%arg0: i32) -> (i32, i32, i32) {
    %c0_i32 = arith.constant 0 : i32
    %c0_i32_0 = arith.constant 0 : i32
    %c0_i32_1 = arith.constant 0 : i32
    return %arg0, %c0_i32, %c0_i32_0 : i32, i32, i32
  }
  func.func @transform_1(%arg0: i32) -> (i32, i32) {
    %c0_i32 = arith.constant 0 : i32
    %c0_i32_0 = arith.constant 0 : i32
    %c0_i32_1 = arith.constant 0 : i32
    return %c0_i32, %c0_i32_0 : i32, i32
  }
  func.func @transform_2(%arg0: i32) -> (i32, i32, i32, i32) {
    %c0_i32 = arith.constant 0 : i32
    %c0_i32_0 = arith.constant 0 : i32
    %c0_i32_1 = arith.constant 0 : i32
    %c0_i32_2 = arith.constant 0 : i32
    %c0_i32_3 = arith.constant 0 : i32
    return %c0_i32, %c0_i32_0, %c0_i32_1, %c0_i32_2 : i32, i32, i32, i32
  }
  func.func @transform_3(%arg0: i32) -> (i32, i32) {
    %c0_i32 = arith.constant 0 : i32
    %c0_i32_0 = arith.constant 0 : i32
    %c0_i32_1 = arith.constant 0 : i32
    return %c0_i32, %c0_i32_0 : i32, i32
  }
  func.func @transform_4(%arg0: i32) -> (i32, i32) {
    %c0_i32 = arith.constant 0 : i32
    %c0_i32_0 = arith.constant 0 : i32
    %c0_i32_1 = arith.constant 0 : i32
    return %c0_i32, %c0_i32_0 : i32, i32
  }
  func.func @transform_5(%arg0: i32) -> (i32, i32) {
    %c0_i32 = arith.constant 0 : i32
    %c0_i32_0 = arith.constant 0 : i32
    %c0_i32_1 = arith.constant 0 : i32
    return %c0_i32, %c0_i32_0 : i32, i32
  }
  func.func @transform_6(%arg0: i32) -> (i32, i32) {
    %c0_i32 = arith.constant 0 : i32
    %c0_i32_0 = arith.constant 0 : i32
    %c0_i32_1 = arith.constant 0 : i32
    return %c0_i32, %c0_i32_0 : i32, i32
  }
  func.func @transform_7(%arg0: i32) -> (i32, i32, i32) {
    %c0_i32 = arith.constant 0 : i32
    %c0_i32_0 = arith.constant 0 : i32
    %c0_i32_1 = arith.constant 0 : i32
    return %arg0, %c0_i32, %c0_i32_0 : i32, i32, i32
  }
}

module attributes {stable_mosaic.version = 11 : i64} {
  func.func @_attn_ffn_kernel(%arg0: i32, %arg1: memref<1x8x32xbf16, #tpu.memory_space<vmem>>, %arg2: memref<32x96xbf16, #tpu.memory_space<vmem>>, %arg3: memref<32x32xbf16, #tpu.memory_space<vmem>>, %arg4: memref<32x128xbf16, #tpu.memory_space<vmem>>, %arg5: memref<128x32xbf16, #tpu.memory_space<vmem>>, %arg6: memref<8x128xf32, #tpu.memory_space<vmem>>, %arg7: memref<1x8x32xf32, #tpu.memory_space<vmem>>, %arg8: memref<3x4x8x8xf32, #tpu.memory_space<vmem>>) attributes {dimension_semantics = [#tpu.dimension_semantics<parallel>], iteration_bounds = array<i64: 2>, scalar_prefetch = 0 : i64, scratch_operands = 1 : i64, tpu.core_type = #tpu.core_type<tc>, window_params = [{transform_indices = @transform_0, window_bounds = array<i64: 1, 8, 32>}, {pipeline_mode = #tpu.pipeline_mode<synchronous>, transform_indices = @transform_1, window_bounds = array<i64: 32, 96>}, {pipeline_mode = #tpu.pipeline_mode<synchronous>, transform_indices = @transform_2, window_bounds = array<i64: 32, 32>}, {pipeline_mode = #tpu.pipeline_mode<synchronous>, transform_indices = @transform_3, window_bounds = array<i64: 32, 128>}, {pipeline_mode = #tpu.pipeline_mode<synchronous>, transform_indices = @transform_4, window_bounds = array<i64: 128, 32>}, {pipeline_mode = #tpu.pipeline_mode<synchronous>, transform_indices = @transform_5, window_bounds = array<i64: 8, 128>}, {transform_indices = @transform_6, window_bounds = array<i64: 1, 8, 32>}]} {
    %c0 = arith.constant 0 : index
    %c0_0 = arith.constant 0 : index
    %c0_1 = arith.constant 0 : index
    %0 = vector.load %arg1[%c0, %c0_0, %c0_1] : memref<1x8x32xbf16, #tpu.memory_space<vmem>>, vector<1x8x32xbf16>
    %1 = vector.shape_cast %0 : vector<1x8x32xbf16> to vector<8x32xbf16>
    %2 = arith.extf %1 : vector<8x32xbf16> to vector<8x32xf32>
    %c0_2 = arith.constant 0 : index
    %c0_3 = arith.constant 0 : index
    %3 = vector.load %arg2[%c0_2, %c0_3] : memref<32x96xbf16, #tpu.memory_space<vmem>>, vector<32x96xbf16>
    %cst = arith.constant dense<0.000000e+00> : vector<8x96xf32>
    %4 = tpu.matmul %1, %3, %cst {dimension_numbers = #tpu.dot_dimension_numbers<[1], [0], [0], [1], [0, 0, 1, 1], [], []>} : vector<8x32xbf16>, vector<32x96xbf16>, vector<8x96xf32> -> vector<8x96xf32>
    %c0_4 = arith.constant 0 : index
    %c0_5 = arith.constant 0 : index
    %5 = vector.load %arg6[%c0_4, %c0_5] : memref<8x128xf32, #tpu.memory_space<vmem>>, vector<1x96xf32>
    %6 = vector.broadcast %5 : vector<1x96xf32> to vector<8x96xf32>
    %7 = arith.addf %4, %6 : vector<8x96xf32>
    %8 = vector.extract_strided_slice %7 {offsets = [0, 0], sizes = [8, 8], strides = [1, 1]} : vector<8x96xf32> to vector<8x8xf32>
    %c0_6 = arith.constant 0 : index
    %c0_7 = arith.constant 0 : index
    %c0_8 = arith.constant 0 : index
    %c0_9 = arith.constant 0 : index
    %9 = vector.load %arg8[%c0_6, %c0_7, %c0_8, %c0_9] : memref<3x4x8x8xf32, #tpu.memory_space<vmem>>, vector<1x1x8x8xf32>
    %10 = vector.shape_cast %9 : vector<1x1x8x8xf32> to vector<8x8xf32>
    %11 = vector.shape_cast %8 : vector<8x8xf32> to vector<1x1x8x8xf32>
    tpu.vector_store %arg8[%c0_6, %c0_7, %c0_8, %c0_9], %11 {strides = array<i32>} : memref<3x4x8x8xf32, #tpu.memory_space<vmem>>, vector<1x1x8x8xf32>,
    %12 = vector.extract_strided_slice %7 {offsets = [0, 32], sizes = [8, 8], strides = [1, 1]} : vector<8x96xf32> to vector<8x8xf32>
    %c1 = arith.constant 1 : index
    %c0_10 = arith.constant 0 : index
    %c0_11 = arith.constant 0 : index
    %c0_12 = arith.constant 0 : index
    %13 = vector.load %arg8[%c1, %c0_10, %c0_11, %c0_12] : memref<3x4x8x8xf32, #tpu.memory_space<vmem>>, vector<1x1x8x8xf32>
    %14 = vector.shape_cast %13 : vector<1x1x8x8xf32> to vector<8x8xf32>
    %15 = vector.shape_cast %12 : vector<8x8xf32> to vector<1x1x8x8xf32>
    tpu.vector_store %arg8[%c1, %c0_10, %c0_11, %c0_12], %15 {strides = array<i32>} : memref<3x4x8x8xf32, #tpu.memory_space<vmem>>, vector<1x1x8x8xf32>,
    %16 = vector.extract_strided_slice %7 {offsets = [0, 64], sizes = [8, 8], strides = [1, 1]} : vector<8x96xf32> to vector<8x8xf32>
    %c2 = arith.constant 2 : index
    %c0_13 = arith.constant 0 : index
    %c0_14 = arith.constant 0 : index
    %c0_15 = arith.constant 0 : index
    %17 = vector.load %arg8[%c2, %c0_13, %c0_14, %c0_15] : memref<3x4x8x8xf32, #tpu.memory_space<vmem>>, vector<1x1x8x8xf32>
    %18 = vector.shape_cast %17 : vector<1x1x8x8xf32> to vector<8x8xf32>
    %19 = vector.shape_cast %16 : vector<8x8xf32> to vector<1x1x8x8xf32>
    tpu.vector_store %arg8[%c2, %c0_13, %c0_14, %c0_15], %19 {strides = array<i32>} : memref<3x4x8x8xf32, #tpu.memory_space<vmem>>, vector<1x1x8x8xf32>,
    %20 = vector.extract_strided_slice %7 {offsets = [0, 8], sizes = [8, 8], strides = [1, 1]} : vector<8x96xf32> to vector<8x8xf32>
    %c0_16 = arith.constant 0 : index
    %c1_17 = arith.constant 1 : index
    %c0_18 = arith.constant 0 : index
    %c0_19 = arith.constant 0 : index
    %21 = vector.load %arg8[%c0_16, %c1_17, %c0_18, %c0_19] : memref<3x4x8x8xf32, #tpu.memory_space<vmem>>, vector<1x1x8x8xf32>
    %22 = vector.shape_cast %21 : vector<1x1x8x8xf32> to vector<8x8xf32>
    %23 = vector.shape_cast %20 : vector<8x8xf32> to vector<1x1x8x8xf32>
    tpu.vector_store %arg8[%c0_16, %c1_17, %c0_18, %c0_19], %23 {strides = array<i32>} : memref<3x4x8x8xf32, #tpu.memory_space<vmem>>, vector<1x1x8x8xf32>,
    %24 = vector.extract_strided_slice %7 {offsets = [0, 40], sizes = [8, 8], strides = [1, 1]} : vector<8x96xf32> to vector<8x8xf32>
    %c1_20 = arith.constant 1 : index
    %c1_21 = arith.constant 1 : index
    %c0_22 = arith.constant 0 : index
    %c0_23 = arith.constant 0 : index
    %25 = vector.load %arg8[%c1_20, %c1_21, %c0_22, %c0_23] : memref<3x4x8x8xf32, #tpu.memory_space<vmem>>, vector<1x1x8x8xf32>
    %26 = vector.shape_cast %25 : vector<1x1x8x8xf32> to vector<8x8xf32>
    %27 = vector.shape_cast %24 : vector<8x8xf32> to vector<1x1x8x8xf32>
    tpu.vector_store %arg8[%c1_20, %c1_21, %c0_22, %c0_23], %27 {strides = array<i32>} : memref<3x4x8x8xf32, #tpu.memory_space<vmem>>, vector<1x1x8x8xf32>,
    %28 = vector.extract_strided_slice %7 {offsets = [0, 72], sizes = [8, 8], strides = [1, 1]} : vector<8x96xf32> to vector<8x8xf32>
    %c2_24 = arith.constant 2 : index
    %c1_25 = arith.constant 1 : index
    %c0_26 = arith.constant 0 : index
    %c0_27 = arith.constant 0 : index
    %29 = vector.load %arg8[%c2_24, %c1_25, %c0_26, %c0_27] : memref<3x4x8x8xf32, #tpu.memory_space<vmem>>, vector<1x1x8x8xf32>
    %30 = vector.shape_cast %29 : vector<1x1x8x8xf32> to vector<8x8xf32>
    %31 = vector.shape_cast %28 : vector<8x8xf32> to vector<1x1x8x8xf32>
    tpu.vector_store %arg8[%c2_24, %c1_25, %c0_26, %c0_27], %31 {strides = array<i32>} : memref<3x4x8x8xf32, #tpu.memory_space<vmem>>, vector<1x1x8x8xf32>,
    %32 = vector.extract_strided_slice %7 {offsets = [0, 16], sizes = [8, 8], strides = [1, 1]} : vector<8x96xf32> to vector<8x8xf32>
    %c0_28 = arith.constant 0 : index
    %c2_29 = arith.constant 2 : index
    %c0_30 = arith.constant 0 : index
    %c0_31 = arith.constant 0 : index
    %33 = vector.load %arg8[%c0_28, %c2_29, %c0_30, %c0_31] : memref<3x4x8x8xf32, #tpu.memory_space<vmem>>, vector<1x1x8x8xf32>
    %34 = vector.shape_cast %33 : vector<1x1x8x8xf32> to vector<8x8xf32>
    %35 = vector.shape_cast %32 : vector<8x8xf32> to vector<1x1x8x8xf32>
    tpu.vector_store %arg8[%c0_28, %c2_29, %c0_30, %c0_31], %35 {strides = array<i32>} : memref<3x4x8x8xf32, #tpu.memory_space<vmem>>, vector<1x1x8x8xf32>,
    %36 = vector.extract_strided_slice %7 {offsets = [0, 48], sizes = [8, 8], strides = [1, 1]} : vector<8x96xf32> to vector<8x8xf32>
    %c1_32 = arith.constant 1 : index
    %c2_33 = arith.constant 2 : index
    %c0_34 = arith.constant 0 : index
    %c0_35 = arith.constant 0 : index
    %37 = vector.load %arg8[%c1_32, %c2_33, %c0_34, %c0_35] : memref<3x4x8x8xf32, #tpu.memory_space<vmem>>, vector<1x1x8x8xf32>
    %38 = vector.shape_cast %37 : vector<1x1x8x8xf32> to vector<8x8xf32>
    %39 = vector.shape_cast %36 : vector<8x8xf32> to vector<1x1x8x8xf32>
    tpu.vector_store %arg8[%c1_32, %c2_33, %c0_34, %c0_35], %39 {strides = array<i32>} : memref<3x4x8x8xf32, #tpu.memory_space<vmem>>, vector<1x1x8x8xf32>,
    %40 = vector.extract_strided_slice %7 {offsets = [0, 80], sizes = [8, 8], strides = [1, 1]} : vector<8x96xf32> to vector<8x8xf32>
    %c2_36 = arith.constant 2 : index
    %c2_37 = arith.constant 2 : index
    %c0_38 = arith.constant 0 : index
    %c0_39 = arith.constant 0 : index
    %41 = vector.load %arg8[%c2_36, %c2_37, %c0_38, %c0_39] : memref<3x4x8x8xf32, #tpu.memory_space<vmem>>, vector<1x1x8x8xf32>
    %42 = vector.shape_cast %41 : vector<1x1x8x8xf32> to vector<8x8xf32>
    %43 = vector.shape_cast %40 : vector<8x8xf32> to vector<1x1x8x8xf32>
    tpu.vector_store %arg8[%c2_36, %c2_37, %c0_38, %c0_39], %43 {strides = array<i32>} : memref<3x4x8x8xf32, #tpu.memory_space<vmem>>, vector<1x1x8x8xf32>,
    %44 = vector.extract_strided_slice %7 {offsets = [0, 24], sizes = [8, 8], strides = [1, 1]} : vector<8x96xf32> to vector<8x8xf32>
    %c0_40 = arith.constant 0 : index
    %c3 = arith.constant 3 : index
    %c0_41 = arith.constant 0 : index
    %c0_42 = arith.constant 0 : index
    %45 = vector.load %arg8[%c0_40, %c3, %c0_41, %c0_42] : memref<3x4x8x8xf32, #tpu.memory_space<vmem>>, vector<1x1x8x8xf32>
    %46 = vector.shape_cast %45 : vector<1x1x8x8xf32> to vector<8x8xf32>
    %47 = vector.shape_cast %44 : vector<8x8xf32> to vector<1x1x8x8xf32>
    tpu.vector_store %arg8[%c0_40, %c3, %c0_41, %c0_42], %47 {strides = array<i32>} : memref<3x4x8x8xf32, #tpu.memory_space<vmem>>, vector<1x1x8x8xf32>,
    %48 = vector.extract_strided_slice %7 {offsets = [0, 56], sizes = [8, 8], strides = [1, 1]} : vector<8x96xf32> to vector<8x8xf32>
    %c1_43 = arith.constant 1 : index
    %c3_44 = arith.constant 3 : index
    %c0_45 = arith.constant 0 : index
    %c0_46 = arith.constant 0 : index
    %49 = vector.load %arg8[%c1_43, %c3_44, %c0_45, %c0_46] : memref<3x4x8x8xf32, #tpu.memory_space<vmem>>, vector<1x1x8x8xf32>
    %50 = vector.shape_cast %49 : vector<1x1x8x8xf32> to vector<8x8xf32>
    %51 = vector.shape_cast %48 : vector<8x8xf32> to vector<1x1x8x8xf32>
    tpu.vector_store %arg8[%c1_43, %c3_44, %c0_45, %c0_46], %51 {strides = array<i32>} : memref<3x4x8x8xf32, #tpu.memory_space<vmem>>, vector<1x1x8x8xf32>,
    %52 = vector.extract_strided_slice %7 {offsets = [0, 88], sizes = [8, 8], strides = [1, 1]} : vector<8x96xf32> to vector<8x8xf32>
    %c2_47 = arith.constant 2 : index
    %c3_48 = arith.constant 3 : index
    %c0_49 = arith.constant 0 : index
    %c0_50 = arith.constant 0 : index
    %53 = vector.load %arg8[%c2_47, %c3_48, %c0_49, %c0_50] : memref<3x4x8x8xf32, #tpu.memory_space<vmem>>, vector<1x1x8x8xf32>
    %54 = vector.shape_cast %53 : vector<1x1x8x8xf32> to vector<8x8xf32>
    %55 = vector.shape_cast %52 : vector<8x8xf32> to vector<1x1x8x8xf32>
    tpu.vector_store %arg8[%c2_47, %c3_48, %c0_49, %c0_50], %55 {strides = array<i32>} : memref<3x4x8x8xf32, #tpu.memory_space<vmem>>, vector<1x1x8x8xf32>,
    %c0_51 = arith.constant 0 : index
    %c0_52 = arith.constant 0 : index
    %c0_53 = arith.constant 0 : index
    %c0_54 = arith.constant 0 : index
    %56 = vector.load %arg8[%c0_51, %c0_52, %c0_53, %c0_54] : memref<3x4x8x8xf32, #tpu.memory_space<vmem>>, vector<1x4x8x8xf32>
    %57 = vector.shape_cast %56 : vector<1x4x8x8xf32> to vector<4x8x8xf32>
    %58 = arith.truncf %57 : vector<4x8x8xf32> to vector<4x8x8xbf16>
    %c1_55 = arith.constant 1 : index
    %c0_56 = arith.constant 0 : index
    %c0_57 = arith.constant 0 : index
    %c0_58 = arith.constant 0 : index
    %59 = vector.load %arg8[%c1_55, %c0_56, %c0_57, %c0_58] : memref<3x4x8x8xf32, #tpu.memory_space<vmem>>, vector<1x4x8x8xf32>
    %60 = vector.shape_cast %59 : vector<1x4x8x8xf32> to vector<4x8x8xf32>
    %61 = arith.truncf %60 : vector<4x8x8xf32> to vector<4x8x8xbf16>
    %c2_59 = arith.constant 2 : index
    %c0_60 = arith.constant 0 : index
    %c0_61 = arith.constant 0 : index
    %c0_62 = arith.constant 0 : index
    %62 = vector.load %arg8[%c2_59, %c0_60, %c0_61, %c0_62] : memref<3x4x8x8xf32, #tpu.memory_space<vmem>>, vector<1x4x8x8xf32>
    %63 = vector.shape_cast %62 : vector<1x4x8x8xf32> to vector<4x8x8xf32>
    %64 = arith.truncf %63 : vector<4x8x8xf32> to vector<4x8x8xbf16>
    %cst_63 = arith.constant dense<0.000000e+00> : vector<4x8x8xf32>
    %65 = tpu.matmul %58, %61, %cst_63 {dimension_numbers = #tpu.dot_dimension_numbers<[2], [2], [1], [1], [0, 0, 0, 1, 1, 1], [0], [0]>} : vector<4x8x8xbf16>, vector<4x8x8xbf16>, vector<4x8x8xf32> -> vector<4x8x8xf32>
    %cst_64 = arith.constant 0.353553385 : f32
    %66 = vector.broadcast %cst_64 : f32 to vector<4x8x8xf32>
    %67 = arith.mulf %65, %66 : vector<4x8x8xf32>
    %cst_65 = arith.constant dense<0xFF800000> : vector<4x8xf32>
    %68 = vector.multi_reduction <maximumf>, %67, %cst_65 [2] : vector<4x8x8xf32> to vector<4x8xf32>
    %69 = vector.shape_cast %68 : vector<4x8xf32> to vector<4x8x1xf32>
    %70 = vector.broadcast %69 : vector<4x8x1xf32> to vector<4x8x8xf32>
    %71 = arith.subf %67, %70 : vector<4x8x8xf32>
    %72 = math.exp %71 : vector<4x8x8xf32>
    %cst_66 = arith.constant dense<0.000000e+00> : vector<4x8xf32>
    %73 = vector.multi_reduction <add>, %72, %cst_66 [2] : vector<4x8x8xf32> to vector<4x8xf32>
    %74 = vector.shape_cast %73 : vector<4x8xf32> to vector<4x8x1xf32>
    %75 = tpu.reciprocal %74 {approx = true} : vector<4x8x1xf32> -> vector<4x8x1xf32>
    %76 = vector.broadcast %75 : vector<4x8x1xf32> to vector<4x8x8xf32>
    %77 = arith.mulf %72, %76 : vector<4x8x8xf32>
    %78 = arith.truncf %77 : vector<4x8x8xf32> to vector<4x8x8xbf16>
    %cst_67 = arith.constant dense<0.000000e+00> : vector<4x8x8xf32>
    %79 = tpu.matmul %78, %64, %cst_67 {dimension_numbers = #tpu.dot_dimension_numbers<[2], [1], [1], [2], [0, 0, 0, 1, 1, 2], [0], [0]>} : vector<4x8x8xbf16>, vector<4x8x8xbf16>, vector<4x8x8xf32> -> vector<4x8x8xf32>
    %80 = vector.extract_strided_slice %79 {offsets = [0, 0, 0], sizes = [1, 8, 8], strides = [1, 1, 1]} : vector<4x8x8xf32> to vector<1x8x8xf32>
    %81 = vector.shape_cast %80 : vector<1x8x8xf32> to vector<8x8xf32>
    %82 = vector.extract_strided_slice %79 {offsets = [1, 0, 0], sizes = [1, 8, 8], strides = [1, 1, 1]} : vector<4x8x8xf32> to vector<1x8x8xf32>
    %83 = vector.shape_cast %82 : vector<1x8x8xf32> to vector<8x8xf32>
    %84 = vector.extract_strided_slice %79 {offsets = [2, 0, 0], sizes = [1, 8, 8], strides = [1, 1, 1]} : vector<4x8x8xf32> to vector<1x8x8xf32>
    %85 = vector.shape_cast %84 : vector<1x8x8xf32> to vector<8x8xf32>
    %86 = vector.extract_strided_slice %79 {offsets = [3, 0, 0], sizes = [1, 8, 8], strides = [1, 1, 1]} : vector<4x8x8xf32> to vector<1x8x8xf32>
    %87 = vector.shape_cast %86 : vector<1x8x8xf32> to vector<8x8xf32>
    %88 = tpu.concatenate %81, %83, %85, %87 in 1 : vector<8x8xf32>, vector<8x8xf32>, vector<8x8xf32>, vector<8x8xf32> -> vector<8x32xf32>
    %89 = arith.truncf %88 : vector<8x32xf32> to vector<8x32xbf16>
    %c0_68 = arith.constant 0 : index
    %c0_69 = arith.constant 0 : index
    %90 = vector.load %arg3[%c0_68, %c0_69] : memref<32x32xbf16, #tpu.memory_space<vmem>>, vector<32x32xbf16>
    %cst_70 = arith.constant dense<0.000000e+00> : vector<8x32xf32>
    %91 = tpu.matmul %89, %90, %cst_70 {dimension_numbers = #tpu.dot_dimension_numbers<[1], [0], [0], [1], [0, 0, 1, 1], [], []>} : vector<8x32xbf16>, vector<32x32xbf16>, vector<8x32xf32> -> vector<8x32xf32>
    %c1_71 = arith.constant 1 : index
    %c0_72 = arith.constant 0 : index
    %92 = vector.load %arg6[%c1_71, %c0_72] : memref<8x128xf32, #tpu.memory_space<vmem>>, vector<1x32xf32>
    %93 = vector.broadcast %92 : vector<1x32xf32> to vector<8x32xf32>
    %94 = arith.addf %91, %93 : vector<8x32xf32>
    %95 = arith.addf %94, %2 : vector<8x32xf32>
    %c2_73 = arith.constant 2 : index
    %c0_74 = arith.constant 0 : index
    %96 = vector.load %arg6[%c2_73, %c0_74] : memref<8x128xf32, #tpu.memory_space<vmem>>, vector<1x32xf32>
    %c3_75 = arith.constant 3 : index
    %c0_76 = arith.constant 0 : index
    %97 = vector.load %arg6[%c3_75, %c0_76] : memref<8x128xf32, #tpu.memory_space<vmem>>, vector<1x32xf32>
    %cst_77 = arith.constant dense<0.000000e+00> : vector<8xf32>
    %98 = vector.multi_reduction <add>, %95, %cst_77 [1] : vector<8x32xf32> to vector<8xf32>
    %99 = vector.shape_cast %98 : vector<8xf32> to vector<8x1xf32>
    %cst_78 = arith.constant 3.200000e+01 : f32
    %100 = vector.broadcast %cst_78 : f32 to vector<8x1xf32>
    %101 = arith.divf %99, %100 : vector<8x1xf32>
    %102 = vector.broadcast %101 : vector<8x1xf32> to vector<8x32xf32>
    %103 = arith.subf %95, %102 : vector<8x32xf32>
    %104 = arith.mulf %103, %103 : vector<8x32xf32>
    %cst_79 = arith.constant dense<0.000000e+00> : vector<8xf32>
    %105 = vector.multi_reduction <add>, %104, %cst_79 [1] : vector<8x32xf32> to vector<8xf32>
    %106 = vector.shape_cast %105 : vector<8xf32> to vector<8x1xf32>
    %cst_80 = arith.constant 3.200000e+01 : f32
    %107 = vector.broadcast %cst_80 : f32 to vector<8x1xf32>
    %108 = arith.divf %106, %107 : vector<8x1xf32>
    %109 = vector.broadcast %101 : vector<8x1xf32> to vector<8x32xf32>
    %110 = arith.subf %95, %109 : vector<8x32xf32>
    %cst_81 = arith.constant 9.99999996E-13 : f32
    %111 = vector.broadcast %cst_81 : f32 to vector<8x1xf32>
    %112 = arith.addf %108, %111 : vector<8x1xf32>
    %113 = math.rsqrt %112 : vector<8x1xf32>
    %114 = vector.broadcast %113 : vector<8x1xf32> to vector<8x32xf32>
    %115 = arith.mulf %110, %114 : vector<8x32xf32>
    %116 = vector.broadcast %96 : vector<1x32xf32> to vector<8x32xf32>
    %117 = arith.mulf %115, %116 : vector<8x32xf32>
    %118 = vector.broadcast %97 : vector<1x32xf32> to vector<8x32xf32>
    %119 = arith.addf %117, %118 : vector<8x32xf32>
    %120 = arith.truncf %119 : vector<8x32xf32> to vector<8x32xbf16>
    %c0_82 = arith.constant 0 : index
    %c0_83 = arith.constant 0 : index
    %121 = vector.load %arg4[%c0_82, %c0_83] : memref<32x128xbf16, #tpu.memory_space<vmem>>, vector<32x128xbf16>
    %cst_84 = arith.constant dense<0.000000e+00> : vector<8x128xf32>
    %122 = tpu.matmul %120, %121, %cst_84 {dimension_numbers = #tpu.dot_dimension_numbers<[1], [0], [0], [1], [0, 0, 1, 1], [], []>} : vector<8x32xbf16>, vector<32x128xbf16>, vector<8x128xf32> -> vector<8x128xf32>
    %c4 = arith.constant 4 : index
    %c0_85 = arith.constant 0 : index
    %123 = vector.load %arg6[%c4, %c0_85] : memref<8x128xf32, #tpu.memory_space<vmem>>, vector<1x128xf32>
    %124 = vector.broadcast %123 : vector<1x128xf32> to vector<8x128xf32>
    %125 = arith.addf %122, %124 : vector<8x128xf32>
    %126 = arith.mulf %125, %125 : vector<8x128xf32>
    %127 = arith.mulf %125, %126 : vector<8x128xf32>
    %cst_86 = arith.constant 4.471500e-02 : f32
    %128 = vector.broadcast %cst_86 : f32 to vector<8x128xf32>
    %129 = arith.mulf %128, %127 : vector<8x128xf32>
    %130 = arith.addf %125, %129 : vector<8x128xf32>
    %cst_87 = arith.constant 0.797884583 : f32
    %131 = vector.broadcast %cst_87 : f32 to vector<8x128xf32>
    %132 = arith.mulf %131, %130 : vector<8x128xf32>
    %133 = math.tanh %132 : vector<8x128xf32>
    %cst_88 = arith.constant 1.000000e+00 : f32
    %134 = vector.broadcast %cst_88 : f32 to vector<8x128xf32>
    %135 = arith.addf %134, %133 : vector<8x128xf32>
    %cst_89 = arith.constant 5.000000e-01 : f32
    %136 = vector.broadcast %cst_89 : f32 to vector<8x128xf32>
    %137 = arith.mulf %136, %135 : vector<8x128xf32>
    %138 = arith.mulf %125, %137 : vector<8x128xf32>
    %139 = arith.truncf %138 : vector<8x128xf32> to vector<8x128xbf16>
    %c0_90 = arith.constant 0 : index
    %c0_91 = arith.constant 0 : index
    %140 = vector.load %arg5[%c0_90, %c0_91] : memref<128x32xbf16, #tpu.memory_space<vmem>>, vector<128x32xbf16>
    %cst_92 = arith.constant dense<0.000000e+00> : vector<8x32xf32>
    %141 = tpu.matmul %139, %140, %cst_92 {dimension_numbers = #tpu.dot_dimension_numbers<[1], [0], [0], [1], [0, 0, 1, 1], [], []>} : vector<8x128xbf16>, vector<128x32xbf16>, vector<8x32xf32> -> vector<8x32xf32>
    %c5 = arith.constant 5 : index
    %c0_93 = arith.constant 0 : index
    %142 = vector.load %arg6[%c5, %c0_93] : memref<8x128xf32, #tpu.memory_space<vmem>>, vector<1x32xf32>
    %143 = vector.broadcast %142 : vector<1x32xf32> to vector<8x32xf32>
    %144 = arith.addf %141, %143 : vector<8x32xf32>
    %145 = arith.addf %144, %119 : vector<8x32xf32>
    %c6 = arith.constant 6 : index
    %c0_94 = arith.constant 0 : index
    %146 = vector.load %arg6[%c6, %c0_94] : memref<8x128xf32, #tpu.memory_space<vmem>>, vector<1x32xf32>
    %c7 = arith.constant 7 : index
    %c0_95 = arith.constant 0 : index
    %147 = vector.load %arg6[%c7, %c0_95] : memref<8x128xf32, #tpu.memory_space<vmem>>, vector<1x32xf32>
    %cst_96 = arith.constant dense<0.000000e+00> : vector<8xf32>
    %148 = vector.multi_reduction <add>, %145, %cst_96 [1] : vector<8x32xf32> to vector<8xf32>
    %149 = vector.shape_cast %148 : vector<8xf32> to vector<8x1xf32>
    %cst_97 = arith.constant 3.200000e+01 : f32
    %150 = vector.broadcast %cst_97 : f32 to vector<8x1xf32>
    %151 = arith.divf %149, %150 : vector<8x1xf32>
    %152 = vector.broadcast %151 : vector<8x1xf32> to vector<8x32xf32>
    %153 = arith.subf %145, %152 : vector<8x32xf32>
    %154 = arith.mulf %153, %153 : vector<8x32xf32>
    %cst_98 = arith.constant dense<0.000000e+00> : vector<8xf32>
    %155 = vector.multi_reduction <add>, %154, %cst_98 [1] : vector<8x32xf32> to vector<8xf32>
    %156 = vector.shape_cast %155 : vector<8xf32> to vector<8x1xf32>
    %cst_99 = arith.constant 3.200000e+01 : f32
    %157 = vector.broadcast %cst_99 : f32 to vector<8x1xf32>
    %158 = arith.divf %156, %157 : vector<8x1xf32>
    %159 = vector.broadcast %151 : vector<8x1xf32> to vector<8x32xf32>
    %160 = arith.subf %145, %159 : vector<8x32xf32>
    %cst_100 = arith.constant 9.99999996E-13 : f32
    %161 = vector.broadcast %cst_100 : f32 to vector<8x1xf32>
    %162 = arith.addf %158, %161 : vector<8x1xf32>
    %163 = math.rsqrt %162 : vector<8x1xf32>
    %164 = vector.broadcast %163 : vector<8x1xf32> to vector<8x32xf32>
    %165 = arith.mulf %160, %164 : vector<8x32xf32>
    %166 = vector.broadcast %146 : vector<1x32xf32> to vector<8x32xf32>
    %167 = arith.mulf %165, %166 : vector<8x32xf32>
    %168 = vector.broadcast %147 : vector<1x32xf32> to vector<8x32xf32>
    %169 = arith.addf %167, %168 : vector<8x32xf32>
    %c0_101 = arith.constant 0 : index
    %c0_102 = arith.constant 0 : index
    %c0_103 = arith.constant 0 : index
    %170 = vector.load %arg7[%c0_101, %c0_102, %c0_103] : memref<1x8x32xf32, #tpu.memory_space<vmem>>, vector<1x8x32xf32>
    %171 = vector.shape_cast %170 : vector<1x8x32xf32> to vector<8x32xf32>
    %172 = vector.shape_cast %169 : vector<8x32xf32> to vector<1x8x32xf32>
    tpu.vector_store %arg7[%c0_101, %c0_102, %c0_103], %172 {strides = array<i32>} : memref<1x8x32xf32, #tpu.memory_space<vmem>>, vector<1x8x32xf32>,
    return
  }
  func.func @transform_0(%arg0: i32) -> (i32, i32, i32) {
    %c0_i32 = arith.constant 0 : i32
    %c0_i32_0 = arith.constant 0 : i32
    %c0_i32_1 = arith.constant 0 : i32
    return %arg0, %c0_i32, %c0_i32_0 : i32, i32, i32
  }
  func.func @transform_1(%arg0: i32) -> (i32, i32) {
    %c0_i32 = arith.constant 0 : i32
    %c0_i32_0 = arith.constant 0 : i32
    %c0_i32_1 = arith.constant 0 : i32
    return %c0_i32, %c0_i32_0 : i32, i32
  }
  func.func @transform_2(%arg0: i32) -> (i32, i32) {
    %c0_i32 = arith.constant 0 : i32
    %c0_i32_0 = arith.constant 0 : i32
    %c0_i32_1 = arith.constant 0 : i32
    return %c0_i32, %c0_i32_0 : i32, i32
  }
  func.func @transform_3(%arg0: i32) -> (i32, i32) {
    %c0_i32 = arith.constant 0 : i32
    %c0_i32_0 = arith.constant 0 : i32
    %c0_i32_1 = arith.constant 0 : i32
    return %c0_i32, %c0_i32_0 : i32, i32
  }
  func.func @transform_4(%arg0: i32) -> (i32, i32) {
    %c0_i32 = arith.constant 0 : i32
    %c0_i32_0 = arith.constant 0 : i32
    %c0_i32_1 = arith.constant 0 : i32
    return %c0_i32, %c0_i32_0 : i32, i32
  }
  func.func @transform_5(%arg0: i32) -> (i32, i32) {
    %c0_i32 = arith.constant 0 : i32
    %c0_i32_0 = arith.constant 0 : i32
    %c0_i32_1 = arith.constant 0 : i32
    return %c0_i32, %c0_i32_0 : i32, i32
  }
  func.func @transform_6(%arg0: i32) -> (i32, i32, i32) {
    %c0_i32 = arith.constant 0 : i32
    %c0_i32_0 = arith.constant 0 : i32
    %c0_i32_1 = arith.constant 0 : i32
    return %arg0, %c0_i32, %c0_i32_0 : i32, i32, i32
  }
}

</mosaic_0001>

<bundles_post_ra>
// kernel: groupbert_layer_forward.3
= control target key start
LH: loop header
LB: loop body
LE: loop exit
PB: predicated region body
PF: predicated region fallthrough
CT: control target
= control target key end

     0   :  { %11 = vsyncpa [#allocation4], 0  ;;  %s1404_s0 = inlined_call_operand.vmem [shape: bf16[2,8,32], index: 0, kind: input, shape index: {}]   ;;  %s1405_s1 = inlined_call_operand.vmem [shape: bf16[32,96], index: 1, kind: input, shape index: {}]   ;;  %s1406_s2 = inlined_call_operand.vmem [shape: bf16[32,32], index: 2, kind: input, shape index: {}]   ;;  %s1407_s3 = inlined_call_operand.vmem [shape: bf16[32,128], index: 3, kind: input, shape index: {}]   ;;  %s1408_s4 = inlined_call_operand.vmem [shape: bf16[128,32], index: 4, kind: input, shape index: {}]   ;;  %s1409_s5 = inlined_call_operand.vmem [shape: f32[8,128], index: 5, kind: input, shape index: {}]   ;;  %s1410_s6 = inlined_call_operand.hbm [shape: f32[2,8,32], index: 6, kind: output, shape index: {}]  }
   0x1   :  { %13 = vsyncpa [#allocation4 + $0x1], 0  ;;  %s1180_s21 = smov 0   ;;  %s1182_s22 = smov 0  }
   0x2   :  { %s1184_s23 = smov 0   ;;  %s1186_s24 = smov 0  }
   0x3 LB: > { %s1201_s25 = sadd.s32 4294967295, %s1128_s24   ;;  %s889_s26 = sadd.s32 4294967294, %s1128_s24   ;;  %s1128_s24 = sphi %s1186_s24, %s1416_s24   ;;  %s1124_s23 = sphi %s1184_s23, %s1415_s23   ;;  %s1120_s22 = sphi %s1182_s22, %s1414_s22   ;;  %s1116_s21 = sphi %s1180_s21, %s1413_s21  }
   0x4   : > { %s1205_s27 = sadd.s32 1, %s1128_s24   ;;  %s157_s28 = sadd.s32 1, %s1124_s23 }
   0x5   : > { %s154_s29 = ssub.s32 %s1128_s24, %s1205_s27  ;;  %p167_p0 = scmp.ne.s32.totalorder %s1124_s23, %s1120_s22 }
   0x6   : > { %p155_p1 = scmp.eq.s32.totalorder %s154_s29, 0  ;;  %p168_p2 = scmp.eq.s32.totalorder %s1201_s25, 1 }
   0x7   : > { %p173_p3 = scmp.ne.s32.totalorder %s1120_s22, %s1116_s21  ;;  %p174_p4 = scmp.eq.s32.totalorder %s889_s26, 1 }
   0x8   : > { %s1216_s30 = scalar_select %p155_p1, %s1124_s23, %s157_s28  }
   0x9   : > { %p1218_p5 = por %p168_p2, %p167_p0  ;;  %p1222_p6 = por %p174_p4, %p173_p3 }
   0xa   : > { %p892_p7 = scmp.ge.s32.totalorder %s1128_s24, 1  ;;  %p214_p8 = scmp.lt.s32.totalorder %s1128_s24, 3 }
   0xc   : > { %p215_p9 = pnand %p892_p7, %p214_p8 }
   0xd   : > { %p243_p10 = scmp.lt.s32.totalorder (!%p215_p9), %s1201_s25, 1  ;;  %s1130_s20 = smov (!%p215_p9), 72  }
   0xe   : > { %218 = sbr.rel (%p215_p9) target bundleno = 1919 (0x77f), region = 44  ;;  %s1131_s26 = smov (!%p215_p9), 120  }
   0xf   : > { %s1132_s28 = smov (!%p215_p9), 88   ;;  %s1133_s29 = smov (!%p215_p9), 104  }
  0x10   : > { %s1134_s9 = smov (!%p215_p9), 112   ;;  %s1135_s10 = smov (!%p215_p9), 80  }
  0x11   : > { %s1136_s11 = smov (!%p215_p9), 96   ;;  %s1137_s12 = smov (!%p215_p9), 56  }
  0x12   : > { %s1140_s15 = smov (!%p215_p9), 40   ;;  %s1141_s16 = smov (!%p215_p9), 8  }
  0x13   : > { %v967_v0 = vld [vmem:[%s1405_s1 + $0x8] sm:$0xff]  ;;  %v966_v1 = vld [vmem:[%s1405_s1] sm:$0xff]  ;;  %s244_s13 = scalar_select %p243_p10, %s1201_s25, 1  ;;  %vm268_vm0 = vcmask 261120   ;;  %vm285_vm1 = vcmask 64512   ;;  %vm498_vm2 = vcmask 1043456  }
  0x14   : > { %278 = vmatpush.bf16.msra.mxu0 %v967_v0  ;;  %v1034_v3 = vld [vmem:[%s1409_s5] ss:$0 sm:$0xff]  ;;  %s1143_s18 = smov 24   ;;  %vm585_vm3 = vcmask 130048   ;;  %vm587_vm4 = vcmask 195584  }
  0x15   : > { %s894_s14 = sshll.u32 %s244_s13, 2  ;;  %s1138_s13 = smov 48  }
  0x16   : > { %s246_s17 = scalar_lea.vmem %s1404_s0, %s894_s14  ;;  %s1139_s14 = smov 64  }
  0x17   : > { %v1239_v2 = vld [vmem:[%s246_s17] sm:$0xf]  ;;  %s1142_s17 = smov 16  }
  0x18   : > { %279 = vmatpush.bf16.msra.mxu0 %v966_v1 }
  0x1b   : > { %903 = vmatmul.msk.bf16.vlgmr.msra.gmra.mxu0 %vm268_vm0, %v1239_v2 }
  0x98   : > { %v281_v4 = vpop.f32.mrf.mxu0 }
  0x99   : > { %v1246_v5 = vadd.f32 %v1034_v3, %v281_v4 }
  0x9b   : > { %333 = vrot.lane.b32.xlu2 %v1246_v5, %s1130_s20  ;;  %298 = vrot.lane.b32.xlu1 %v1246_v5, %s1131_s26  ;;  %286 = vst.msk [vmem:[#allocation2] sm:$0xff] %vm285_vm1, %v1246_v5 }
  0x9c   : > { %303 = vrot.lane.b32.xlu0 %v1246_v5, %s1132_s28 }
  0xa0   : > { %v283_v6 = vpop.f32.mrf.mxu0 }
  0xa2   : > { %v343_v32 = vld [vmem:[#allocation2] sm:$0xff] }
  0xa3   : > { %328 = vrot.lane.b32.xlu2 %v1246_v5, %s1133_s29  ;;  %313 = vrot.lane.b32.xlu1 %v1246_v5, %s1134_s9  ;;  %v347_v33 = vpack.c.bf16 %v343_v32, %v343_v32  ;;  %s240_s29 = sand.u32 1, %s1120_s22  }
  0xa4   : > { %318 = vrot.lane.b32.xlu0 %v1246_v5, %s1135_s10  ;;  %s893_s9 = sshll.u32 %s240_s29, 3  ;;  %s963_s10 = sshll.u32 %s1201_s25, 3 }
  0xa5   : > { %s815_s20 = scalar_lea.sflag [#allocation4], %s240_s29 }
  0xac   : > { %288 = vrot.lane.b32.xlu0 %v1246_v5, %s1136_s11 }
  0xf5   : > { %v334_v7 = vpop.permute.xlu2 %333 }
  0xf6   : > { %337 = vst.msk [vmem:[#allocation2 + $0x38] sm:$0xff] %vm285_vm1, %v334_v7 }
  0xfd   : > { %v329_v8 = vpop.permute.xlu2 %328  ;;  %v354_v9 = vld [vmem:[#allocation2 + $0x38] sm:$0xff] }
  0xfe   : > { %332 = vst.msk [vmem:[#allocation2 + $0x18] sm:$0xff] %vm285_vm1, %v329_v8  ;;  %v358_v10 = vpack.c.bf16 %v354_v9, %v354_v9 }
 0x100   : > { %v428_v11 = vsel %vm285_vm1, %v358_v10, 0 }
 0x101   : > { %437 = vmatpush.bf16.xpose.msrb.mxu0 %v428_v11 }
 0x105   : > { %v346_v12 = vld [vmem:[#allocation2 + $0x18] sm:$0xff] }
 0x106   : > { %v350_v13 = vpack.c.bf16 %v346_v12, %v346_v12 }
 0x108   : > { %907 = vmatmul.msk.bf16.vlgmr.msrb.gmra.mxu0 %vm285_vm1, %v350_v13 }
 0x10d   : > { %v299_v14 = vpop.permute.xlu1 %298 }
 0x10e   : > { %302 = vst.msk [vmem:[#allocation2 + $0x8] sm:$0xff] %vm285_vm1, %v299_v14  ;;  %v304_v15 = vpop.permute.xlu0 %303 }
 0x10f   : > { %307 = vst.msk [vmem:[#allocation2 + $0x28] sm:$0xff] %vm285_vm1, %v304_v15 }
 0x115   : > { %v314_v16 = vpop.permute.xlu1 %313  ;;  %v344_v21 = vld [vmem:[#allocation2 + $0x8] sm:$0xff] }
 0x116   : > { %317 = vst.msk [vmem:[#allocation2 + $0x10] sm:$0xff] %vm285_vm1, %v314_v16  ;;  %v319_v17 = vpop.permute.xlu0 %318  ;;  %v352_v18 = vld [vmem:[#allocation2 + $0x28] sm:$0xff]  ;;  %v348_v24 = vpack.c.bf16 %v344_v21, %v344_v21 }
 0x117   : > { %322 = vst.msk [vmem:[#allocation2 + $0x30] sm:$0xff] %vm285_vm1, %v319_v17  ;;  %v356_v19 = vpack.c.bf16 %v352_v18, %v352_v18 }
 0x119   : > { %v390_v20 = vsel %vm285_vm1, %v356_v19, 0 }
 0x11a   : > { %399 = vmatpush.bf16.xpose.msra.mxu2 %v390_v20 }
 0x11d   : > { %v345_v27 = vld [vmem:[#allocation2 + $0x10] sm:$0xff] }
 0x11e   : > { %v289_v22 = vpop.permute.xlu0 %288  ;;  %v353_v23 = vld [vmem:[#allocation2 + $0x30] sm:$0xff]  ;;  %v349_v29 = vpack.c.bf16 %v345_v27, %v345_v27 }
 0x11f   : > { %292 = vst.msk [vmem:[#allocation2 + $0x20] sm:$0xff] %vm285_vm1, %v289_v22  ;;  %v357_v25 = vpack.c.bf16 %v353_v23, %v353_v23 }
 0x121   : > { %905 = vmatmul.msk.bf16.vlgmr.msra.gmra.mxu2 %vm285_vm1, %v348_v24  ;;  %v409_v26 = vsel %vm285_vm1, %v357_v25, 0 }
 0x122   : > { %418 = vmatpush.bf16.xpose.msra.mxu3 %v409_v26 }
 0x126   : > { %v351_v28 = vld [vmem:[#allocation2 + $0x20] sm:$0xff] }
 0x127   : > { %v355_v30 = vpack.c.bf16 %v351_v28, %v351_v28 }
 0x129   : > { %906 = vmatmul.msk.bf16.vlgmr.msra.gmra.mxu3 %vm285_vm1, %v349_v29  ;;  %v371_v31 = vsel %vm285_vm1, %v355_v30, 0 }
 0x12a   : > { %380 = vmatpush.bf16.xpose.msra.mxu1 %v371_v31 }
 0x131   : > { %904 = vmatmul.msk.bf16.vlgmr.msra.gmra.mxu1 %vm285_vm1, %v347_v33 }
 0x185   : > { %v439_v34 = vpop.f32.mrf.mxu0 }
 0x186   : > { %v446_v35 = vmul.f32 0.35355338, %v439_v34 }
 0x188   : > { %v456_v36 = vsel %vm285_vm1, %v446_v35, -inf }
 0x189   : > { %457 = vmax.xlane.f32.xlu0 %v456_v36 }
 0x18d   : > { %v441_v37 = vpop.f32.mrf.mxu0 }
 0x1a4   : > { %v401_v38 = vpop.f32.mrf.mxu2 }
 0x1a5   : > { %v444_v39 = vmul.f32 0.35355338, %v401_v38 }
 0x1a7   : > { %v450_v40 = vsel %vm285_vm1, %v444_v39, -inf }
 0x1a8   : > { %451 = vmax.xlane.f32.xlu1 %v450_v40 }
 0x1ac   : > { %v403_v41 = vpop.f32.mrf.mxu2  ;;  %v420_v42 = vpop.f32.mrf.mxu3 }
 0x1ad   : > { %v445_v43 = vmul.f32 0.35355338, %v420_v42 }
 0x1ae   : > { %v382_v44 = vpop.f32.mrf.mxu1 }
 0x1af   : > { %v453_v45 = vsel %vm285_vm1, %v445_v43, -inf  ;;  %v443_v46 = vmul.f32 0.35355338, %v382_v44 }
 0x1b0   : > { %454 = vmax.xlane.f32.xlu2 %v453_v45 }
 0x1b1   : > { %v447_v49 = vsel %vm285_vm1, %v443_v46, -inf }
 0x1b4   : > { %v422_v47 = vpop.f32.mrf.mxu3 }
 0x1b5   : > { %v969_v47 = vld [vmem:[%s1406_s2 + $0x8] sm:$0xff] }
 0x1b6   : > { %v384_v48 = vpop.f32.mrf.mxu1 }
 0x1b7   : > { %v968_v48 = vld [vmem:[%s1406_s2] sm:$0xff] }
 0x1b8   : > { %448 = vmax.xlane.f32.xlu2 %v447_v49 }
 0x1c1   : > { %308 = vrot.lane.b32.xlu1 %v1246_v5, %s1137_s12 }
 0x1d0   : > { %323 = vrot.lane.b32.xlu2 %v1246_v5, %s1138_s13 }
 0x1d8   : > { %293 = vrot.lane.b32.xlu2 %v1246_v5, %s1139_s14 }
 0x1fc   : > { %v458_v50 = vpop.xlane.xlu0 %457 }
 0x1fd   : > { %v462_v51 = vsub.f32 %v446_v35, %v458_v50 }
 0x1ff   : > { %v469_v52 = vmul.f32 1.442695, %v462_v51 }
 0x201   : > { %1042 = vpow2.f32 %v469_v52 }
 0x207   : > { %v1279_v53 = vpop.eup %1042 }
 0x208   : > { %v480_v54 = vsel %vm285_vm1, %v1279_v53, 0.0 }
 0x209   : > { %481 = vadd.xlane.f32.xlu1 %v480_v54 }
 0x21b   : > { %v452_v55 = vpop.xlane.xlu1 %451 }
 0x21c   : > { %v460_v56 = vsub.f32 %v444_v39, %v452_v55 }
 0x21e   : > { %v465_v57 = vmul.f32 1.442695, %v460_v56  ;;  %v1035_v56 = vld [vmem:[%s1409_s5 + $0x1] ss:$0 sm:$0xff] }
 0x220   : > { %1044 = vpow2.f32 %v465_v57  ;;  %v249_v57 = vunpack.c.l.bf16 %v1239_v2 }
 0x223   : > { %v455_v58 = vpop.xlane.xlu2 %454 }
 0x224   : > { %v461_v59 = vsub.f32 %v445_v43, %v455_v58 }
 0x226   : > { %v1045_v60 = vpop.eup %1044  ;;  %v467_v61 = vmul.f32 1.442695, %v461_v59 }
 0x227   : > { %v474_v62 = vsel %vm285_vm1, %v1045_v60, 0.0 }
 0x228   : > { %1046 = vpow2.f32 %v467_v61  ;;  %475 = vadd.xlane.f32.xlu0 %v474_v62 }
 0x22b   : > { %v449_v63 = vpop.xlane.xlu2 %448 }
 0x22c   : > { %v459_v0 = vsub.f32 %v443_v46, %v449_v63  ;;  %v1144_v63 = vmov 32.0  }
 0x22e   : > { %v1047_v1 = vpop.eup %1046  ;;  %v463_v3 = vmul.f32 1.442695, %v459_v0 }
 0x22f   : > { %v477_v4 = vsel %vm285_vm1, %v1047_v1, 0.0 }
 0x230   : > { %1048 = vpow2.f32 %v463_v3  ;;  %478 = vadd.xlane.f32.xlu0 %v477_v4 }
 0x233   : > { %v309_v6 = vpop.permute.xlu1 %308  ;;  %v324_v7 = vpop.permute.xlu2 %323 }
 0x234   : > { %312 = vst.msk [vmem:[#allocation2 + $0x48] sm:$0xff] %vm285_vm1, %v309_v6 }
 0x235   : > { %327 = vst.msk [vmem:[#allocation2 + $0x50] sm:$0xff] %vm285_vm1, %v324_v7 }
 0x236   : > { %v1049_v8 = vpop.eup %1048 }
 0x237   : > { %v471_v9 = vsel %vm285_vm1, %v1049_v8, 0.0 }
 0x238   : > { %472 = vadd.xlane.f32.xlu2 %v471_v9 }
 0x23b   : > { %v294_v10 = vpop.permute.xlu2 %293  ;;  %v360_v11 = vld [vmem:[#allocation2 + $0x48] sm:$0xff] }
 0x23c   : > { %297 = vst.msk [vmem:[#allocation2 + $0x40] sm:$0xff] %vm285_vm1, %v294_v10  ;;  %v364_v12 = vpack.c.bf16 %v360_v11, %v360_v11  ;;  %v361_v13 = vld [vmem:[#allocation2 + $0x50] sm:$0xff] }
 0x23d   : > { %v365_v14 = vpack.c.bf16 %v361_v13, %v361_v13  ;;  %v970_v13 = vld [vmem:[%s1407_s3] sm:$0xff] }
 0x23e   : > { %v519_v15 = vsel %vm498_vm2, %v364_v12, 0  ;;  %v971_v12 = vld [vmem:[%s1407_s3 + $0x8] sm:$0xff] }
 0x23f   : > { %528 = vmatpush.bf16.msrb.mxu2 %v519_v15  ;;  %v538_v16 = vsel %vm498_vm2, %v365_v14, 0  ;;  %v979_v14 = vld [vmem:[%s1408_s4 + $0x38] sm:$0xff] }
 0x240   : > { %547 = vmatpush.bf16.msrb.mxu3 %v538_v16 }
 0x243   : > { %v359_v17 = vld [vmem:[#allocation2 + $0x40] sm:$0xff]  ;;  %688 = vmatpush.bf16.msra.mxu2 %v971_v12 }
 0x244   : > { %338 = vrot.lane.b32.xlu0 %v1246_v5, %s1140_s15  ;;  %v363_v18 = vpack.c.bf16 %v359_v17, %v359_v17  ;;  %771 = vmatpush.bf16.msra.mxu3 %v979_v14  ;;  %s825_s15 = scalar_lea.hbm %s1410_s6, %s963_s10 }
 0x245   : > { %s829_s19 = sshll.u32 %s825_s15, 4  ;;  %s830_s19 = int_to_ptr.hbm [resolvable:$true] %s829_s19 }
 0x246   : > { %v500_v19 = vsel %vm498_vm2, %v363_v18, 0  ;;  %s1080_s26 = sshra.s32 %s830_s19, 4  ;;  %s1081_s26 = int_to_ptr.hbm [resolvable:$true] %s1080_s26 }
 0x247   : > { %509 = vmatpush.bf16.msrb.mxu1 %v500_v19  ;;  %689 = vmatpush.bf16.msra.mxu2 %v970_v13  ;;  %s1082_s28 = scalar_lea.hbm %s1081_s26, 8  ;;  %p1087_p0 = scmp.lt.s32.totalorder %s1081_s26, %s1410_s6 }
 0x248   : > { %p1083_p11 = scmp.ne.s32.totalorder %s1081_s26, %s1082_s28 }
 0x24a   : > { %p1084_p12 = pnand %p1083_p11, %p1218_p5 }
 0x24b   : > { %617 = vmatpush.bf16.msra.mxu1 %v969_v47 }
 0x24c   : > { %p1085_p13 = pneg %p1084_p12 }
 0x24f   : > { %618 = vmatpush.bf16.msra.mxu1 %v968_v48 }
 0x27c   : > { %v482_v29 = vpop.xlane.xlu1 %481 }
 0x29b   : > { %v476_v20 = vpop.xlane.xlu0 %475 }
 0x29c   : > { %1050 = vrcp.f32 %v476_v20 }
 0x2a2   : > { %v1051_v21 = vpop.eup %1050 }
 0x2a3   : > { %v488_v22 = vmul.f32 %v1051_v21, %v1045_v60  ;;  %v479_v23 = vpop.xlane.xlu0 %478 }
 0x2a4   : > { %1052 = vrcp.f32 %v479_v23 }
 0x2a5   : > { %v492_v24 = vpack.c.bf16 %v488_v22, %v488_v22 }
 0x2a7   : > { %909 = vmatmul.msk.bf16.vlgmr.msrb.gmra.mxu2 %vm285_vm1, %v492_v24  ;;  %v1036_v24 = vld [vmem:[%s1409_s5 + $0x2] ss:$0 sm:$0xff] }
 0x2aa   : > { %v1053_v25 = vpop.eup %1052 }
 0x2ab   : > { %v489_v26 = vmul.f32 %v1053_v25, %v1047_v1  ;;  %v473_v27 = vpop.xlane.xlu2 %472 }
 0x2ac   : > { %1054 = vrcp.f32 %v473_v27 }
 0x2ad   : > { %v493_v28 = vpack.c.bf16 %v489_v26, %v489_v26  ;;  %1056 = vrcp.f32 %v482_v29  ;;  %v1037_v26 = vld [vmem:[%s1409_s5 + $0x3] ss:$0 sm:$0xff] }
 0x2ae   : > { %1058 = vrcp.f32 %v1144_v63 }
 0x2af   : > { %910 = vmatmul.msk.bf16.vlgmr.msrb.gmra.mxu3 %vm285_vm1, %v493_v28 }
 0x2b2   : > { %v1055_v5 = vpop.eup %1054 }
 0x2b3   : > { %v487_v30 = vmul.f32 %v1055_v5, %v1049_v8  ;;  %v1057_v33 = vpop.eup %1056 }
 0x2b4   : > { %v490_v35 = vmul.f32 %v1057_v33, %v1279_v53  ;;  %v1059_v0 = vpop.eup %1058  ;;  %v975_v33 = vld [vmem:[%s1408_s4 + $0x18] sm:$0xff] }
 0x2b5   : > { %v491_v31 = vpack.c.bf16 %v487_v30, %v487_v30  ;;  %v631_v1 = vmul.f32 32.0, %v1059_v0  ;;  %vm635_vm5 = vweird.f32 %v1059_v0  ;;  %v978_v30 = vld [vmem:[%s1408_s4 + $0x30] sm:$0xff] }
 0x2b6   : > { %v339_v32 = vpop.permute.xlu0 %338  ;;  %v494_v38 = vpack.c.bf16 %v490_v35, %v490_v35  ;;  %772 = vmatpush.bf16.msra.mxu3 %v978_v30  ;;  %v973_v35 = vld [vmem:[%s1408_s4 + $0x8] sm:$0xff] }
 0x2b7   : > { %342 = vst.msk [vmem:[#allocation2 + $0x58] sm:$0xff] %vm285_vm1, %v339_v32  ;;  %908 = vmatmul.msk.bf16.vlgmr.msrb.gmra.mxu1 %vm285_vm1, %v491_v31  ;;  %v632_v3 = vsub.f32 1.0, %v631_v1  ;;  %v977_v31 = vld [vmem:[%s1408_s4 + $0x28] sm:$0xff]  ;;  %v976_v32 = vld [vmem:[%s1408_s4 + $0x20] sm:$0xff] }
 0x2b9   : > { %v633_v4 = vmul.f32 %v1059_v0, %v632_v3 }
 0x2ba   : > { %773 = vmatpush.bf16.msra.mxu3 %v977_v31 }
 0x2bb   : > { %v634_v6 = vadd.f32 %v1059_v0, %v633_v4 }
 0x2bd   : > { %v1313_v7 = vsel %vm635_vm5, %v1059_v0, %v634_v6 }
 0x2be   : > { %v362_v34 = vld [vmem:[#allocation2 + $0x58] sm:$0xff]  ;;  %774 = vmatpush.bf16.msra.mxu3 %v976_v32 }
 0x2bf   : > { %v366_v36 = vpack.c.bf16 %v362_v34, %v362_v34  ;;  %v974_v34 = vld [vmem:[%s1408_s4 + $0x10] sm:$0xff] }
 0x2c1   : > { %v557_v37 = vsel %vm498_vm2, %v366_v36, 0  ;;  %v972_v36 = vld [vmem:[%s1408_s4] sm:$0xff] }
 0x2c2   : > { %566 = vmatpush.bf16.msra.mxu0 %v557_v37  ;;  %775 = vmatpush.bf16.msra.mxu3 %v975_v33  ;;  %v1038_v37 = vld [vmem:[%s1409_s5 + $0x4] ss:$0 sm:$0xff] }
 0x2c5   : > { %911 = vmatmul.msk.bf16.vlgmr.msra.gmra.mxu0 %vm285_vm1, %v494_v38 }
 0x2c6   : > { %776 = vmatpush.bf16.msra.mxu3 %v974_v34 }
 0x2ca   : > { %777 = vmatpush.bf16.msra.mxu3 %v973_v35 }
 0x2ce   : > { %778 = vmatpush.bf16.msra.mxu3 %v972_v36 }
 0x32a   : > { %v530_v39 = vpop.f32.mrf.mxu2 }
 0x32b   : > { %573 = vrot.lane.b32.xlu0 %v530_v39, %s1141_s16 }
 0x332   : > { %v532_v40 = vpop.f32.mrf.mxu2  ;;  %v549_v41 = vpop.f32.mrf.mxu3 }
 0x333   : > { %577 = vrot.lane.b32.xlu0 %v549_v41, %s1142_s17 }
 0x334   : > { %v511_v42 = vpop.f32.mrf.mxu1 }
 0x33a   : > { %v551_v43 = vpop.f32.mrf.mxu3 }
 0x33c   : > { %v513_v44 = vpop.f32.mrf.mxu1 }
 0x342   : > { %v568_v45 = vpop.f32.mrf.mxu0 }
 0x343   : > { %581 = vrot.lane.b32.xlu0 %v568_v45, %s1143_s18  ;;  %s242_s18 = scalar_lea.vmem [#allocation3], %s893_s9  ;;  %s1086_s9 = scalar_lea.hbm %s1410_s6, 16 }
 0x344   : > { %s827_s25 = sshll.u32 %s242_s18, 4  ;;  %p1088_p1 = scmp.lt.s32.totalorder %s1086_s9, %s1082_s28  ;;  %s828_s25 = int_to_ptr.vmem [resolvable:$true] %s827_s25 }
 0x346   : > { %p1089_p2 = por %p1088_p1, %p1087_p0 }
 0x348   : > { %p1090_p3 = pnand %p1089_p2, %p1085_p13 }
 0x34a   : > { %v570_v46 = vpop.f32.mrf.mxu0 }
 0x39d   : > { %v574_v49 = vpop.permute.xlu0 %573 }
 0x39e   : > { %v584_v51 = vsel %vm285_vm1, %v511_v42, %v574_v49 }
 0x3a5   : > { %v578_v50 = vpop.permute.xlu0 %577 }
 0x3a6   : > { %v586_v52 = vsel %vm585_vm3, %v584_v51, %v578_v50  ;;  %v1039_v51 = vld [vmem:[%s1409_s5 + $0x5] ss:$0 sm:$0xff] }
 0x3b5   : > { %v582_v53 = vpop.permute.xlu0 %581 }
 0x3b6   : > { %v588_v54 = vsel %vm587_vm4, %v586_v52, %v582_v53 }
 0x3b7   : > { %v589_v55 = vpack.c.bf16 %v588_v54, %v588_v54 }
 0x3b9   : > { %920 = vmatmul.msk.bf16.vlgmr.msra.gmra.mxu1 %vm268_vm0, %v589_v55 }
 0x436   : > { %v620_v58 = vpop.f32.mrf.mxu1 }
 0x437   : > { %v621_v59 = vadd.f32 %v1035_v56, %v620_v58 }
 0x439   : > { %v624_v60 = vadd.f32 %v621_v59, %v249_v57 }
 0x43b   : > { %v627_v61 = vsel %vm268_vm0, %v624_v60, 0.0 }
 0x43c   : > { %628 = vadd.xlane.f32.xlu1 %v627_v61 }
 0x43e   : > { %v622_v62 = vpop.f32.mrf.mxu1 }
 0x4af   : > { %v629_v8 = vpop.xlane.xlu1 %628 }
 0x4b0   : > { %v637_v2 = vmul.f32 %v1313_v7, %v629_v8 }
 0x4b2   : > { %v638_v9 = vsub.f32 %v624_v60, %v637_v2 }
 0x4b4   : > { %v639_v10 = vmul.f32 %v638_v9, %v638_v9 }
 0x4b6   : > { %v640_v11 = vsel %vm268_vm0, %v639_v10, 0.0 }
 0x4b7   : > { %641 = vadd.xlane.f32.xlu0 %v640_v11  ;;  %v1041_v11 = vld [vmem:[%s1409_s5 + $0x7] ss:$0 sm:$0xff] }
 0x52a   : > { %v642_v15 = vpop.xlane.xlu0 %641 }
 0x52b   : > { %v643_v16 = vmul.f32 %v642_v15, %v1313_v7 }
 0x52d   : > { %v644_v17 = vadd.f32 1e-12, %v643_v16 }
 0x52f   : > { %1060 = vrsqrt.f32 %v644_v17  ;;  %vm651_vm7 = vweird.f32 %v644_v17 }
 0x535   : > { %v1061_v18 = vpop.eup %1060 }
 0x536   : > { %v646_v19 = vmul.f32 %v1061_v18, %v644_v17  ;;  %vm652_vm6 = vweird.f32 %v1061_v18 }
 0x537   : > { %vm653_vm8 = vmor %vm651_vm7, %vm652_vm6 }
 0x538   : > { %v647_v20 = vmul.f32 %v1061_v18, %v646_v19 }
 0x53a   : > { %v648_v21 = vmul.f32 0.5, %v647_v20 }
 0x53c   : > { %v649_v22 = vsub.f32 1.5, %v648_v21 }
 0x53e   : > { %v650_v23 = vmul.f32 %v1061_v18, %v649_v22 }
 0x540   : > { %v654_v25 = vsel %vm653_vm8, %v1061_v18, %v650_v23 }
 0x541   : > { %v655_v27 = vmul.f32 %v654_v25, %v638_v9  ;;  %v1040_v9 = vld [vmem:[%s1409_s5 + $0x6] ss:$0 sm:$0xff] }
 0x543   : > { %v657_v28 = vmul.f32 %v1036_v24, %v655_v27 }
 0x545   : > { %v659_v5 = vadd.f32 %v1037_v26, %v657_v28 }
 0x547   : > { %v660_v29 = vpack.c.bf16 %v659_v5, %v659_v5 }
 0x549   : > { %929 = vmatmul.msk.bf16.vlgmr.msra.gmra.mxu2 %vm268_vm0, %v660_v29 }
 0x5cc   : > { %v691_v38 = vpop.f32.mrf.mxu2 }
 0x5cd   : > { %v692_v39 = vadd.f32 %v1038_v37, %v691_v38 }
 0x5cf   : > { %v695_v40 = vmul.f32 %v692_v39, %v692_v39 }
 0x5d1   : > { %v696_v41 = vmul.f32 %v695_v40, %v692_v39 }
 0x5d3   : > { %v697_v42 = vmul.f32 0.044715, %v696_v41 }
 0x5d4   : > { %v693_v43 = vpop.f32.mrf.mxu2 }
 0x5d5   : > { %v698_v44 = vadd.f32 %v697_v42, %v692_v39 }
 0x5d7   : > { %v699_v45 = vmul.f32 0.7978846, %v698_v44 }
 0x5d9   : > { %1062 = vtanh.f32 %v699_v45 }
 0x5df   : > { %v1063_v46 = vpop.eup %1062 }
 0x5e0   : > { %v701_v47 = vadd.f32 1.0, %v1063_v46 }
 0x5e2   : > { %v702_v48 = vmul.f32 0.5, %v701_v47 }
 0x5e4   : > { %v703_v49 = vmul.f32 %v702_v48, %v692_v39 }
 0x5e6   : > { %v704_v50 = vpack.c.bf16 %v703_v49, %v703_v49 }
 0x5e8   : > { %779 = vmatmul.bf16.vlgmr.msra.gmra.mxu3 %v704_v50 }
 0x66b   : > { %v780_v52 = vpop.f32.mrf.mxu3 }
 0x66c   : > { %v781_v53 = vadd.f32 %v1039_v51, %v780_v52 }
 0x66e   : > { %v784_v54 = vadd.f32 %v781_v53, %v659_v5 }
 0x670   : > { %v787_v55 = vsel %vm268_vm0, %v784_v54, 0.0 }
 0x671   : > { %788 = vadd.xlane.f32.xlu1 %v787_v55 }
 0x673   : > { %v782_v56 = vpop.f32.mrf.mxu3 }
 0x6e4   : > { %v789_v57 = vpop.xlane.xlu1 %788 }
 0x6e5   : > { %v790_v58 = vmul.f32 %v789_v57, %v1313_v7 }
 0x6e7   : > { %v791_v59 = vsub.f32 %v784_v54, %v790_v58 }
 0x6e9   : > { %v792_v60 = vmul.f32 %v791_v59, %v791_v59 }
 0x6eb   : > { %v793_v61 = vsel %vm268_vm0, %v792_v60, 0.0 }
 0x6ec   : > { %794 = vadd.xlane.f32.xlu2 %v793_v61 }
 0x75f   : > { %v795_v62 = vpop.xlane.xlu2 %794 }
 0x760   : > { %v796_v63 = vmul.f32 %v795_v62, %v1313_v7 }
 0x762   : > { %v797_v0 = vadd.f32 1e-12, %v796_v63 }
 0x764   : > { %1064 = vrsqrt.f32 %v797_v0  ;;  %vm804_vm10 = vweird.f32 %v797_v0 }
 0x76a   : > { %v1065_v1 = vpop.eup %1064 }
 0x76b   : > { %v799_v3 = vmul.f32 %v1065_v1, %v797_v0  ;;  %vm805_vm9 = vweird.f32 %v1065_v1 }
 0x76c   : > { %vm806_vm11 = vmor %vm804_vm10, %vm805_vm9 }
 0x76d   : > { %v800_v4 = vmul.f32 %v1065_v1, %v799_v3 }
 0x76f   : > { %v801_v6 = vmul.f32 0.5, %v800_v4 }
 0x771   : > { %v802_v8 = vsub.f32 1.5, %v801_v6 }
 0x773   : > { %v803_v2 = vmul.f32 %v1065_v1, %v802_v8 }
 0x775   : > { %v807_v7 = vsel %vm806_vm11, %v1065_v1, %v803_v2 }
 0x776   : > { %v808_v10 = vmul.f32 %v807_v7, %v791_v59 }
 0x778   : > { %v810_v12 = vmul.f32 %v1040_v9, %v808_v10 }
 0x77a   : > { %v812_v13 = vadd.f32 %v1041_v11, %v810_v12 }
 0x77c   : > { %813 = vst.msk [vmem:[%s242_s18] sm:$0xff] %vm268_vm0, %v812_v13 }
 0x77d   : > { %1093 = shalt.err (!%p1090_p3)
}
 0x77e   : > { %980 = dma.vmem_to_hbm [thread:$0]  (%p1218_p5), %s828_s25, 128, %s830_s19, %s815_s20  }
 0x77f PF: > { %p986_p4 = scmp.ge.s32.totalorder %s1128_s24, 2  ;;  %s841_s29 = sand.u32 1, %s1116_s21  }
 0x780   : > { %s842_s14 = scalar_lea.sflag [#allocation4], %s841_s29 }
 0x781   : > { %p983_p7 = pnand %p986_p4, %p1222_p6 }
 0x783   : > { %p984_p8 = pneg %p983_p7 }
 0x785   : > { %1111 = dma.done.wait (%p984_p8), %s842_s14, 128  }
 0x786   : > { %1113 = vsyncadd (%p984_p8), %s842_s14, 4294967168  ;;  %p16_p9 = scmp.ge.s32.totalorder %s1205_s27, 4   ;;  %s1413_s21 = smov %s1120_s22 }
 0x787   : > { %s1414_s22 = smov %s1124_s23  ;;  %s1415_s23 = smov %s1216_s30 }
 0x788   : > { %s1416_s24 = smov %s1205_s27  ;;  %18 = sbr.rel (!%p16_p9) target bundleno = 3 (0x3), region = 90 }
 0x78d   :  { %848 = vsyncpa [#allocation4], 1 }
 0x78e   :  { %850 = vsyncpa [#allocation4 + $0x1], 1 }

// kernel: groupbert_layer_forward.2
= control target key start
LH: loop header
LB: loop body
LE: loop exit
PB: predicated region body
PF: predicated region fallthrough
CT: control target
= control target key end

     0   :  { %s2392_s24 = smov 0   ;;  %s2991_s0 = inlined_call_operand.vmem [shape: f32[2,8,32], index: 0, kind: input, shape index: {}]   ;;  %s2992_s1 = inlined_call_operand.vmem [shape: bf16[32,64], index: 1, kind: input, shape index: {}]   ;;  %s2993_s2 = inlined_call_operand.vmem [shape: bf16[7,8,4,4], index: 2, kind: input, shape index: {}]   ;;  %s2994_s3 = inlined_call_operand.vmem [shape: bf16[32,32], index: 3, kind: input, shape index: {}]   ;;  %s2995_s4 = inlined_call_operand.vmem [shape: bf16[32,128], index: 4, kind: input, shape index: {}]   ;;  %s2996_s5 = inlined_call_operand.vmem [shape: bf16[128,32], index: 5, kind: input, shape index: {}]   ;;  %s2997_s6 = inlined_call_operand.vmem [shape: f32[9,128], index: 6, kind: input, shape index: {}]   ;;  %s2998_s7 = inlined_call_operand.vmem [shape: bf16[2,8,32], index: 7, kind: output, shape index: {}]  }
   0x1 LB: > { %s2091_s25 = sadd.s32 4294967295, %s2333_s24   ;;  %p2095_p0 = scmp.ge.s32.totalorder %s2333_s24, 1  ;;  %s2333_s24 = sphi %s2392_s24, %s17_s24  }
   0x2   : > { %p236_p1 = scmp.lt.s32.totalorder %s2333_s24, 3 }
   0x4   : > { %p237_p2 = pnand %p2095_p0, %p236_p1 }
   0x5   : > { %p266_p3 = scmp.lt.s32.totalorder (!%p237_p2), %s2091_s25, 1  ;;  %s2335_s13 = smov (!%p237_p2), 96  }
   0x6   : > { %240 = sbr.rel (%p237_p2) target bundleno = 1888 (0x760), region = 48  ;;  %s2337_s16 = smov (!%p237_p2), 104  }
   0x7   : > { %s2338_s17 = smov (!%p237_p2), 124   ;;  %s2339_s18 = smov (!%p237_p2), 116  }
   0x8   : > { %s2340_s19 = smov (!%p237_p2), 112   ;;  %s2341_s20 = smov (!%p237_p2), 120  }
   0x9   : > { %s2342_s21 = smov (!%p237_p2), 108   ;;  %s2343_s22 = smov (!%p237_p2), 100  }
   0xa   : > { %s2345_s14 = smov (!%p237_p2), 4   ;;  %s2346_s15 = smov (!%p237_p2), 12  }
   0xb   : > { %v2265_v0 = vld [vmem:[%s2992_s1 + $0x8] sm:$0xff]  ;;  %v2264_v1 = vld [vmem:[%s2992_s1] sm:$0xff]  ;;  %s3000_s25 = smov (!%p266_p3, %s2091_s25), 1  ;;  %vm295_vm0 = vcmask 261120   ;;  %vm336_vm5 = vcmask 26624   ;;  %v2336_v21 = vmov 0.0  }
   0xc   : > { %305 = vmatpush.bf16.msra.mxu0 %v2265_v0  ;;  %s2096_s30 = sshll.u32 %s3000_s25, 3  ;;  %v2303_v4 = vld [vmem:[%s2997_s6] ss:$0 sm:$0xff]  ;;  %337 = vst.msk [vmem:[#allocation2] sm:$0x7] %vm336_vm5, %v2336_v21  ;;  %vm455_vm6 = vcmask 1041408  }
   0xd   : > { %s2412_s10 = scalar_lea.vmem %s2991_s0, %s2096_s30  ;;  %345 = vst.msk [vmem:[#allocation2 + $0xb] sm:$0x7] %vm336_vm5, %v2336_v21  ;;  %v2108_v22 = vld [vmem:[%s2993_s2 + $0x10] sm:$0x3]  ;;  %vm353_vm7 = vcmask 31744   ;;  %vm1787_vm8 = vcmask 64512  }
   0xe   : > { %v275_v2 = vld [vmem:[%s2412_s10] sm:$0xff]  ;;  %338 = vst.msk [vmem:[#allocation2 + $0x10] sm:$0x7] %vm336_vm5, %v2336_v21  ;;  %v457_v23 = vsel %vm455_vm6, %v2108_v22, 0  ;;  %v2111_v44 = vld [vmem:[%s2993_s2 + $0x16] sm:$0x3] }
   0xf   : > { %v276_v3 = vpack.c.bf16 %v275_v2, %v275_v2  ;;  %339 = vst.msk [vmem:[#allocation2 + $0x20] sm:$0x7] %vm336_vm5, %v2336_v21  ;;  %466 = vmatpush.bf16.msra.mxu1 %v457_v23  ;;  %v425_v45 = vld [vmem:[%s2993_s2 + $0x4] sm:$0x3]  ;;  %v550_v46 = vsel %vm455_vm6, %v2111_v44, 0  ;;  %vm1789_vm9 = vcmask 97280  }
  0x10   : > { %306 = vmatpush.bf16.msra.mxu0 %v2264_v1  ;;  %340 = vst.msk [vmem:[#allocation2 + $0x30] sm:$0x7] %vm336_vm5, %v2336_v21  ;;  %v731_v47 = vsel %vm455_vm6, %v425_v45, 0  ;;  %v2109_v51 = vld [vmem:[%s2993_s2 + $0x12] sm:$0x3]  ;;  %vm1791_vm10 = vcmask 130048  }
  0x11   : > { %341 = vst.msk [vmem:[#allocation2 + $0x40] sm:$0x7] %vm336_vm5, %v2336_v21  ;;  %v488_v54 = vsel %vm455_vm6, %v2109_v51, 0  ;;  %v2110_v62 = vld [vmem:[%s2993_s2 + $0x14] sm:$0x3]  ;;  %vm1793_vm11 = vcmask 162816  }
  0x12   : > { %342 = vst.msk [vmem:[#allocation2 + $0x50] sm:$0x7] %vm336_vm5, %v2336_v21  ;;  %497 = vmatpush.bf16.msra.mxu2 %v488_v54  ;;  %v2114_v63 = vld [vmem:[%s2993_s2 + $0x1c] sm:$0x3]  ;;  %v519_v2 = vsel %vm455_vm6, %v2110_v62, 0  ;;  %vm1795_vm12 = vcmask 195584  }
  0x13   : > { %2106 = vmatmul.msk.bf16.vlgmr.msra.gmra.mxu0 %vm295_vm0, %v276_v3  ;;  %343 = vst.msk [vmem:[#allocation2 + $0x60] sm:$0x7] %vm336_vm5, %v2336_v21  ;;  %559 = vmatpush.bf16.msrb.mxu1 %v550_v46  ;;  %v643_v3 = vsel %vm455_vm6, %v2114_v63, 0  ;;  %v2115_v44 = vld [vmem:[%s2993_s2 + $0x1e] sm:$0x3]  ;;  %vm1797_vm13 = vcmask 228352  }
  0x14   : > { %344 = vst.msk [vmem:[#allocation2 + $0x70] sm:$0x7] %vm336_vm5, %v2336_v21  ;;  %740 = vmatpush.bf16.msrb.mxu0 %v731_v47  ;;  %528 = vmatpush.bf16.msra.mxu3 %v519_v2  ;;  %v2134_v46 = vld [vmem:[%s2993_s2 + $0x24] sm:$0x3]  ;;  %v674_v51 = vsel %vm455_vm6, %v2115_v44, 0 }
  0x15   : > { %346 = vst.msk [vmem:[#allocation2 + $0x1b] sm:$0x7] %vm336_vm5, %v2336_v21 }
  0x16   : > { %347 = vst.msk [vmem:[#allocation2 + $0x2b] sm:$0x7] %vm336_vm5, %v2336_v21 }
  0x17   : > { %348 = vst.msk [vmem:[#allocation2 + $0x3b] sm:$0x7] %vm336_vm5, %v2336_v21 }
  0x18   : > { %349 = vst.msk [vmem:[#allocation2 + $0x4b] sm:$0x7] %vm336_vm5, %v2336_v21 }
  0x19   : > { %350 = vst.msk [vmem:[#allocation2 + $0x5b] sm:$0x7] %vm336_vm5, %v2336_v21 }
  0x1a   : > { %351 = vst.msk [vmem:[#allocation2 + $0x6b] sm:$0x7] %vm336_vm5, %v2336_v21 }
  0x1b   : > { %352 = vst.msk [vmem:[#allocation2 + $0x7b] sm:$0x7] %vm336_vm5, %v2336_v21  ;;  %vm2036_vm5 = vcmask 257024  }
  0x90   : > { %v308_v5 = vpop.f32.mrf.mxu0 }
  0x91   : > { %v309_v6 = vadd.f32 %v2303_v4, %v308_v5 }
  0x93   : > { %v2107_v7 = vmul.f32 -1.442695, %v309_v6 }
  0x95   : > { %2312 = vpow2.f32 %v2107_v7 }
  0x98   : > { %v310_v8 = vpop.f32.mrf.mxu0 }
  0x99   : > { %v2113_v8 = vld [vmem:[%s2993_s2 + $0x1a] sm:$0x3] }
  0x9b   : > { %v2313_v9 = vpop.eup %2312 }
  0x9c   : > { %v315_v10 = vadd.f32 1.0, %v2313_v9 }
  0x9e   : > { %2314 = vrcp.f32 %v315_v10  ;;  %v327_v14 = vand.u32 2147483648, %v315_v10  ;;  %v325_v16 = vand.u32 2147483647, %v315_v10  ;;  %vm321_vm2 = vweird.f32 %v315_v10 }
  0xa0   : > { %v328_v18 = vor.u32 1.1754944e-38, %v327_v14  ;;  %vm326_vm4 = vcmp.eq.f32.partialorder %v325_v16, 8.507059e+37 }
  0xa4   : > { %v2315_v11 = vpop.eup %2314 }
  0xa5   : > { %v317_v12 = vmul.f32 %v2315_v11, %v315_v10  ;;  %vm322_vm1 = vweird.f32 %v2315_v11 }
  0xa6   : > { %vm323_vm3 = vmor %vm321_vm2, %vm322_vm1 }
  0xa7   : > { %v318_v13 = vsub.f32 1.0, %v317_v12  ;;  %v429_v12 = vld [vmem:[%s2993_s2 + $0xc] sm:$0x3] }
  0xa9   : > { %v319_v15 = vmul.f32 %v2315_v11, %v318_v13  ;;  %v2112_v13 = vld [vmem:[%s2993_s2 + $0x18] sm:$0x3] }
  0xab   : > { %v320_v17 = vadd.f32 %v2315_v11, %v319_v15 }
  0xad   : > { %v324_v19 = vsel %vm323_vm3, %v2315_v11, %v320_v17  ;;  %v612_v11 = vsel %vm455_vm6, %v2113_v8, 0  ;;  %v807_v17 = vsel %vm455_vm6, %v429_v12, 0 }
  0xae   : > { %v329_v20 = vsel %vm326_vm4, %v328_v18, %v324_v19  ;;  %621 = vmatpush.bf16.msrb.mxu3 %v612_v11  ;;  %v581_v18 = vsel %vm455_vm6, %v2112_v13, 0  ;;  %816 = vmatpush.bf16.msra.mxu0 %v807_v17 }
  0xaf   : > { %332 = vrot.lane.b32.xlu0 %v329_v20, %s2335_s13  ;;  %590 = vmatpush.bf16.msrb.mxu2 %v581_v18  ;;  %s2344_s13 = smov 8  }
 0x121   : > { %v333_v24 = vpop.permute.xlu0 %332 }
 0x122   : > { %v335_v25 = vmul.f32 %v333_v24, %v309_v6 }
 0x124   : > { %354 = vst.msk [vmem:[#allocation2 + $0x3] sm:$0xff] %vm353_vm7, %v335_v25  ;;  %381 = vrot.lane.b32.xlu2 %v335_v25, %s2337_s16  ;;  %356 = vrot.lane.b32.xlu1 %v335_v25, %s2338_s17  ;;  %s2347_s16 = smov 16   ;;  %s2348_s17 = smov 24  }
 0x125   : > { %366 = vrot.lane.b32.xlu0 %v335_v25, %s2339_s18  ;;  %s2349_s18 = smov 20  }
 0x12b   : > { %v391_v26 = vld [vmem:[#allocation2] sm:$0xff]  ;;  %v392_v27 = vld [vmem:[#allocation2 + $0x8] sm:$0x3f] }
 0x12c   : > { %371 = vrot.lane.b32.xlu2 %v335_v25, %s2340_s19  ;;  %361 = vrot.lane.b32.xlu1 %v335_v25, %s2341_s20  ;;  %v2440_v28 = vpack.c.bf16 %v391_v26, %v391_v26  ;;  %v408_v29 = vpack.c.bf16 %v392_v27, %v392_v27  ;;  %s2350_s19 = smov 28  }
 0x12d   : > { %376 = vrot.lane.b32.xlu0 %v335_v25, %s2342_s21 }
 0x12e   : > { %v442_v30 = vunpack.c.l.b16 %v2440_v28  ;;  %v443_v31 = vunpack.c.l.b16 %v408_v29 }
 0x130   : > { %v2443_v32 = vpack.c.b16 %v443_v31, %v442_v30 }
 0x132   : > { %v446_v33 = vshrl.u32 %v2443_v32, 16  ;;  %v448_v34 = vshll.u32 %v2443_v32, 16 }
 0x134   : > { %386 = vrot.lane.b32.xlu1 %v335_v25, %s2343_s22  ;;  %v450_v35 = vrot.slane %v448_v34, 1  ;;  %v1027_v36 = vrot.slane %v446_v33, 1  ;;  %v1397_v37 = vrot.slane %v446_v33, 2  ;;  %v1028_v38 = vrot.slane %v448_v34, 2 }
 0x135   : > { %v1398_v39 = vrot.slane %v448_v34, 3 }
 0x136   : > { %v451_v40 = vor.u32 %v450_v35, %v446_v33  ;;  %v2447_v41 = vor.u32 %v1028_v38, %v1027_v36 }
 0x137   : > { %v2449_v42 = vor.u32 %v1398_v39, %v1397_v37 }
 0x138   : > { %2116 = vmatmul.msk.bf16.vlgmr.msra.gmra.mxu1 %vm353_vm7, %v451_v40 }
 0x139   : > { %652 = vmatpush.bf16.msra.mxu1 %v643_v3 }
 0x17e   : > { %v382_v43 = vpop.permute.xlu2 %381 }
 0x17f   : > { %385 = vst.msk [vmem:[#allocation2 + $0x63] sm:$0xff] %vm353_vm7, %v382_v43 }
 0x186   : > { %v372_v48 = vpop.permute.xlu2 %371  ;;  %v403_v49 = vld [vmem:[#allocation2 + $0x60] sm:$0xff]  ;;  %v404_v50 = vld [vmem:[#allocation2 + $0x68] sm:$0x3f] }
 0x187   : > { %375 = vst.msk [vmem:[#allocation2 + $0x43] sm:$0xff] %vm353_vm7, %v372_v48  ;;  %v2465_v52 = vpack.c.bf16 %v403_v49, %v403_v49  ;;  %v420_v53 = vpack.c.bf16 %v404_v50, %v404_v50  ;;  %v423_v48 = vld [vmem:[%s2993_s2] sm:$0x3] }
 0x189   : > { %v629_v55 = vunpack.c.l.b16 %v2465_v52  ;;  %v630_v56 = vunpack.c.l.b16 %v420_v53 }
 0x18b   : > { %v2469_v57 = vpack.c.b16 %v630_v56, %v629_v55 }
 0x18d   : > { %v2472_v58 = vshrl.u32 %v2469_v57, 16  ;;  %v2475_v59 = vshll.u32 %v2469_v57, 16 }
 0x18e   : > { %v399_v60 = vld [vmem:[#allocation2 + $0x40] sm:$0xff]  ;;  %v400_v61 = vld [vmem:[#allocation2 + $0x48] sm:$0x3f] }
 0x18f   : > { %v2483_v0 = vpack.c.bf16 %v399_v60, %v399_v60  ;;  %v416_v1 = vpack.c.bf16 %v400_v61, %v400_v61  ;;  %v1529_v4 = vrot.slane %v2472_v58, 2  ;;  %v1530_v7 = vrot.slane %v2475_v59, 3 }
 0x190   : > { %v895_v61 = vsel %vm455_vm6, %v2134_v46, 0 }
 0x191   : > { %v567_v5 = vunpack.c.l.b16 %v2483_v0  ;;  %v568_v6 = vunpack.c.l.b16 %v416_v1  ;;  %v2495_v10 = vor.u32 %v1530_v7, %v1529_v4  ;;  %v693_v4 = vsel %vm455_vm6, %v423_v48, 0 }
 0x193   : > { %v2493_v9 = vpack.c.b16 %v568_v6, %v567_v5 }
 0x195   : > { %v2505_v14 = vshrl.u32 %v2493_v9, 16  ;;  %v2508_v15 = vshll.u32 %v2493_v9, 16 }
 0x196   : > { %v357_v16 = vpop.permute.xlu1 %356 }
 0x197   : > { %360 = vst.msk [vmem:[#allocation2 + $0x13] sm:$0xff] %vm353_vm7, %v357_v16  ;;  %v367_v19 = vpop.permute.xlu0 %366  ;;  %v1115_v20 = vrot.slane %v2505_v14, 1  ;;  %v1116_v21 = vrot.slane %v2508_v15, 2  ;;  %v1485_v22 = vrot.slane %v2505_v14, 2  ;;  %v1486_v23 = vrot.slane %v2508_v15, 3 }
 0x198   : > { %370 = vst.msk [vmem:[#allocation2 + $0x33] sm:$0xff] %vm353_vm7, %v367_v19 }
 0x199   : > { %v2518_v24 = vor.u32 %v1116_v21, %v1115_v20  ;;  %v2520_v25 = vor.u32 %v1486_v23, %v1485_v22 }
 0x19e   : > { %v362_v26 = vpop.permute.xlu1 %361  ;;  %v393_v27 = vld [vmem:[#allocation2 + $0x10] sm:$0xff]  ;;  %v394_v29 = vld [vmem:[#allocation2 + $0x18] sm:$0x3f] }
 0x19f   : > { %365 = vst.msk [vmem:[#allocation2 + $0x23] sm:$0xff] %vm353_vm7, %v362_v26  ;;  %v377_v30 = vpop.permute.xlu0 %376  ;;  %v2523_v31 = vpack.c.bf16 %v393_v27, %v393_v27  ;;  %v410_v33 = vpack.c.bf16 %v394_v29, %v394_v29  ;;  %v397_v34 = vld [vmem:[#allocation2 + $0x30] sm:$0xff]  ;;  %v398_v35 = vld [vmem:[#allocation2 + $0x38] sm:$0x3f] }
 0x1a0   : > { %380 = vst.msk [vmem:[#allocation2 + $0x53] sm:$0xff] %vm353_vm7, %v377_v30  ;;  %v2526_v36 = vpack.c.bf16 %v397_v34, %v397_v34  ;;  %v414_v37 = vpack.c.bf16 %v398_v35, %v398_v35  ;;  %v424_v34 = vld [vmem:[%s2993_s2 + $0x2] sm:$0x3] }
 0x1a1   : > { %v474_v38 = vunpack.c.l.b16 %v2523_v31  ;;  %v475_v39 = vunpack.c.l.b16 %v410_v33 }
 0x1a2   : > { %v536_v40 = vunpack.c.l.b16 %v2526_v36  ;;  %v537_v43 = vunpack.c.l.b16 %v414_v37 }
 0x1a3   : > { %v2533_v45 = vpack.c.b16 %v475_v39, %v474_v38 }
 0x1a4   : > { %v2538_v47 = vpack.c.b16 %v537_v43, %v536_v40 }
 0x1a5   : > { %v2544_v49 = vshrl.u32 %v2533_v45, 16  ;;  %v2547_v50 = vshll.u32 %v2533_v45, 16 }
 0x1a6   : > { %v387_v53 = vpop.permute.xlu1 %386  ;;  %v395_v54 = vld [vmem:[#allocation2 + $0x20] sm:$0xff]  ;;  %v396_v55 = vld [vmem:[#allocation2 + $0x28] sm:$0x3f]  ;;  %v540_v56 = vshrl.u32 %v2538_v47, 16  ;;  %v542_v60 = vshll.u32 %v2538_v47, 16 }
 0x1a7   : > { %390 = vst.msk [vmem:[#allocation2 + $0x73] sm:$0xff] %vm353_vm7, %v387_v53  ;;  %v411_v62 = vpack.c.bf16 %v395_v54, %v395_v54  ;;  %v412_v63 = vpack.c.bf16 %v396_v55, %v396_v55  ;;  %v482_v1 = vrot.slane %v2547_v50, 1  ;;  %v401_v2 = vld [vmem:[#allocation2 + $0x50] sm:$0xff]  ;;  %v402_v3 = vld [vmem:[#allocation2 + $0x58] sm:$0x3f]  ;;  %v1049_v5 = vrot.slane %v2544_v49, 1 }
 0x1a8   : > { %v544_v6 = vrot.slane %v542_v60, 1  ;;  %v1463_v7 = vrot.slane %v540_v56, 2  ;;  %v1464_v8 = vrot.slane %v542_v60, 3  ;;  %v2559_v16 = vpack.c.bf16 %v401_v2, %v401_v2  ;;  %v2138_v2 = vld [vmem:[%s2993_s2 + $0x2c] sm:$0x3] }
 0x1a9   : > { %v505_v11 = vunpack.c.l.b16 %v411_v62  ;;  %v506_v12 = vunpack.c.l.b16 %v412_v63  ;;  %2126 = vmatmul.msk.bf16.vlgmr.msrb.gmra.mxu0 %vm353_vm7, %v411_v62  ;;  %v483_v13 = vor.u32 %v482_v1, %v2544_v49  ;;  %v418_v18 = vpack.c.bf16 %v402_v3, %v402_v3 }
 0x1aa   : > { %v545_v17 = vor.u32 %v544_v6, %v540_v56  ;;  %904 = vmatpush.bf16.msrb.mxu0 %v895_v61  ;;  %v1050_v19 = vrot.slane %v2547_v50, 2  ;;  %v1093_v20 = vrot.slane %v540_v56, 1  ;;  %v598_v22 = vunpack.c.l.b16 %v2559_v16 }
 0x1ab   : > { %v2562_v21 = vpack.c.b16 %v506_v12, %v505_v11  ;;  %2117 = vmatmul.msk.bf16.vlgmr.msra.gmra.mxu2 %vm353_vm7, %v483_v13  ;;  %v1094_v23 = vrot.slane %v542_v60, 2  ;;  %v599_v26 = vunpack.c.l.b16 %v418_v18  ;;  %v2569_v29 = vor.u32 %v1464_v8, %v1463_v7  ;;  %v427_v12 = vld [vmem:[%s2993_s2 + $0x8] sm:$0x3]  ;;  %v426_v13 = vld [vmem:[%s2993_s2 + $0x6] sm:$0x3] }
 0x1ac   : > { %2119 = vmatmul.msk.bf16.vlgmr.msrb.gmra.mxu1 %vm353_vm7, %v545_v17  ;;  %702 = vmatpush.bf16.msra.mxu2 %v693_v4  ;;  %v2567_v27 = vor.u32 %v1050_v19, %v1049_v5  ;;  %v1419_v37 = vrot.slane %v2544_v49, 2  ;;  %v1420_v48 = vrot.slane %v2547_v50, 3  ;;  %v712_v53 = vsel %vm455_vm6, %v424_v34, 0 }
 0x1ad   : > { %v2572_v30 = vshrl.u32 %v2562_v21, 16  ;;  %v2575_v33 = vshll.u32 %v2562_v21, 16  ;;  %683 = vmatpush.bf16.msrb.mxu1 %v674_v51  ;;  %v2581_v38 = vpack.c.b16 %v599_v26, %v598_v22  ;;  %v2583_v40 = vor.u32 %v1094_v23, %v1093_v20 }
 0x1ae   : > { %v405_v35 = vld [vmem:[#allocation2 + $0x70] sm:$0xff]  ;;  %v406_v39 = vld [vmem:[#allocation2 + $0x78] sm:$0x3f]  ;;  %v2599_v50 = vor.u32 %v1420_v48, %v1419_v37  ;;  %v575_v4 = vrot.slane %v2508_v15, 1  ;;  %v637_v7 = vrot.slane %v2475_v59, 1  ;;  %v975_v17 = vsel %vm455_vm6, %v2138_v2, 0 }
 0x1af   : > { %v2585_v43 = vpack.c.bf16 %v405_v35, %v405_v35  ;;  %v513_v44 = vrot.slane %v2575_v33, 1  ;;  %v1441_v46 = vrot.slane %v2572_v30, 2  ;;  %v602_v51 = vshrl.u32 %v2581_v38, 16  ;;  %v428_v48 = vld [vmem:[%s2993_s2 + $0xa] sm:$0x3] }
 0x1b0   : > { %v422_v54 = vpack.c.bf16 %v406_v39, %v406_v39  ;;  %v604_v55 = vshll.u32 %v2581_v38, 16  ;;  %v1442_v60 = vrot.slane %v2575_v33, 3  ;;  %v576_v23 = vor.u32 %v575_v4, %v2505_v14 }
 0x1b1   : > { %v514_v49 = vor.u32 %v513_v44, %v2572_v30  ;;  %v660_v56 = vunpack.c.l.b16 %v2585_v43  ;;  %v1137_v62 = vrot.slane %v602_v51, 1  ;;  %v1507_v6 = vrot.slane %v602_v51, 2 }
 0x1b2   : > { %v661_v61 = vunpack.c.l.b16 %v422_v54  ;;  %v2597_v63 = vor.u32 %v1442_v60, %v1441_v46  ;;  %v1138_v5 = vrot.slane %v604_v55, 2  ;;  %v1508_v15 = vrot.slane %v604_v55, 3 }
 0x1b3   : > { %2118 = vmatmul.msk.bf16.vlgmr.msra.gmra.mxu3 %vm353_vm7, %v514_v49  ;;  %v769_v26 = vsel %vm455_vm6, %v427_v12, 0  ;;  %v638_v37 = vor.u32 %v637_v7, %v2472_v58  ;;  %v750_v39 = vsel %vm455_vm6, %v426_v13, 0  ;;  %v606_v14 = vrot.slane %v604_v55, 1  ;;  %v2150_v49 = vld [vmem:[%s2993_s2 + $0x34] sm:$0x3] }
 0x1b4   : > { %721 = vmatpush.bf16.msra.mxu3 %v712_v53  ;;  %v2601_v1 = vpack.c.b16 %v661_v61, %v660_v56  ;;  %v2619_v18 = vor.u32 %v1138_v5, %v1137_v62  ;;  %v2625_v34 = vor.u32 %v1508_v15, %v1507_v6  ;;  %v788_v54 = vsel %vm455_vm6, %v428_v48, 0  ;;  %v2132_v55 = vld [vmem:[%s2993_s2 + $0x20] sm:$0x3]  ;;  %v2133_v5 = vld [vmem:[%s2993_s2 + $0x22] sm:$0x3] }
 0x1b5   : > { %v2606_v3 = vpop.f32.mrf.mxu1  ;;  %v607_v53 = vor.u32 %v606_v14, %v602_v51  ;;  %v890_v60 = vrot.slane %v2562_v21, 1  ;;  %v430_v51 = vld [vmem:[%s2993_s2 + $0xe] sm:$0x3]  ;;  %v1078_v61 = vsel %vm455_vm6, %v2150_v49, 0  ;;  %v855_v62 = vsel %vm455_vm6, %v2132_v55, 0 }
 0x1b6   : > { %v664_v8 = vshrl.u32 %v2601_v1, 16  ;;  %v666_v11 = vshll.u32 %v2601_v1, 16  ;;  %v826_v4 = vsel %vm455_vm6, %v430_v51, 0  ;;  %v875_v6 = vsel %vm455_vm6, %v2133_v5, 0  ;;  %v2154_v7 = vld [vmem:[%s2993_s2 + $0x3c] sm:$0x3] }
 0x1b7   : > { %v1166_v12 = vsel %vm455_vm6, %v2154_v7, 0  ;;  %v1160_v14 = vrot.slane %v2475_v59, 2  ;;  %v2152_v48 = vld [vmem:[%s2993_s2 + $0x38] sm:$0x3]  ;;  %v950_v51 = vrot.slane %v2581_v38, 1  ;;  %v990_v7 = vrot.slane %v2601_v1, 1 }
 0x1b8   : > { %v1181_v19 = vrot.slane %v664_v8, 1  ;;  %v1182_v20 = vrot.slane %v666_v11, 2  ;;  %v1551_v22 = vrot.slane %v664_v8, 2  ;;  %v1552_v35 = vrot.slane %v666_v11, 3 }
 0x1b9   : > { %2130 = vmatmul.msk.bf16.vlgmr.msra.gmra.mxu0 %vm353_vm7, %v2465_v52  ;;  %v668_v56 = vrot.slane %v666_v11, 1  ;;  %v2135_v11 = vld [vmem:[%s2993_s2 + $0x26] sm:$0x3]  ;;  %v1122_v59 = vsel %vm455_vm6, %v2152_v48, 0 }
 0x1ba   : > { %984 = vmatpush.bf16.msra.mxu0 %v975_v17  ;;  %v2629_v44 = vor.u32 %v1182_v20, %v1181_v19  ;;  %v2632_v46 = vor.u32 %v1552_v35, %v1551_v22  ;;  %v915_v13 = vsel %vm455_vm6, %v2135_v11, 0  ;;  %v2137_v17 = vld [vmem:[%s2993_s2 + $0x2a] sm:$0x3]  ;;  %v1071_v19 = vrot.slane %v2572_v30, 1  ;;  %v2149_v35 = vld [vmem:[%s2993_s2 + $0x32] sm:$0x3] }
 0x1bb   : > { %2120 = vmatmul.msk.bf16.vlgmr.msrb.gmra.mxu2 %vm353_vm7, %v576_v23  ;;  %v669_v2 = vor.u32 %v668_v56, %v664_v8  ;;  %v970_v8 = vrot.slane %v2469_v57, 1  ;;  %v955_v15 = vsel %vm455_vm6, %v2137_v17, 0  ;;  %v1072_v20 = vrot.slane %v2575_v33, 2  ;;  %v2139_v23 = vld [vmem:[%s2993_s2 + $0x2e] sm:$0x3] }
 0x1bc   : > { %2122 = vmatmul.msk.bf16.vlgmr.msra.gmra.mxu1 %vm353_vm7, %v638_v37  ;;  %778 = vmatpush.bf16.msrb.mxu2 %v769_v26  ;;  %v995_v26 = vsel %vm455_vm6, %v2139_v23, 0  ;;  %v870_v37 = vrot.slane %v2533_v45, 1  ;;  %v910_v56 = vrot.slane %v2538_v47, 1  ;;  %v2165_v11 = vld [vmem:[%s2993_s2 + $0x42] sm:$0x3]  ;;  %v1220_v23 = vrot.slane %v2443_v32, 2 }
 0x1bd   : > { %v470_v52 = vpop.f32.mrf.mxu1  ;;  %759 = vmatpush.bf16.msra.mxu1 %v750_v39  ;;  %v1073_v22 = vor.u32 %v1072_v20, %v1071_v19  ;;  %v1056_v39 = vsel %vm455_vm6, %v2149_v35, 0  ;;  %v2169_v20 = vld [vmem:[%s2993_s2 + $0x4a] sm:$0x3]  ;;  %v2181_v35 = vld [vmem:[%s2993_s2 + $0x52] sm:$0x3] }
 0x1be   : > { %v1159_v52 = vrot.slane %v2472_v58, 1  ;;  %v930_v58 = vrot.slane %v2493_v9, 1 }
 0x1c3   : > { %2121 = vmatmul.msk.bf16.vlgmr.msrb.gmra.mxu3 %vm353_vm7, %v607_v53  ;;  %v1161_v53 = vor.u32 %v1160_v14, %v1159_v52  ;;  %v1426_v52 = vsel %vm455_vm6, %v2181_v35, 0 }
 0x1c4   : > { %797 = vmatpush.bf16.msrb.mxu3 %v788_v54  ;;  %v2151_v54 = vld [vmem:[%s2993_s2 + $0x36] sm:$0x3] }
 0x1c5   : > { %v1100_v55 = vsel %vm455_vm6, %v2151_v54, 0  ;;  %v2202_v54 = vld [vmem:[%s2993_s2 + $0x6c] sm:$0x3] }
 0x1c9   : > { %2142 = vmatmul.msk.bf16.vlgmr.msrb.gmra.mxu0 %vm353_vm7, %v890_v60  ;;  %v2153_v60 = vld [vmem:[%s2993_s2 + $0x3a] sm:$0x3] }
 0x1ca   : > { %1087 = vmatpush.bf16.msrb.mxu0 %v1078_v61  ;;  %v1144_v61 = vsel %vm455_vm6, %v2153_v60, 0 }
 0x1cb   : > { %2124 = vmatmul.msk.bf16.vlgmr.msra.gmra.mxu2 %vm353_vm7, %v2440_v28  ;;  %v2136_v28 = vld [vmem:[%s2993_s2 + $0x28] sm:$0x3] }
 0x1cc   : > { %2123 = vmatmul.msk.bf16.vlgmr.msrb.gmra.mxu1 %vm353_vm7, %v669_v2  ;;  %864 = vmatpush.bf16.msra.mxu2 %v855_v62  ;;  %v2182_v62 = vld [vmem:[%s2993_s2 + $0x54] sm:$0x3]  ;;  %v1260_v2 = vrot.slane %v2562_v21, 2 }
 0x1cd   : > { %835 = vmatpush.bf16.msrb.mxu1 %v826_v4  ;;  %v2155_v4 = vld [vmem:[%s2993_s2 + $0x3e] sm:$0x3]  ;;  %v1448_v5 = vsel %vm455_vm6, %v2182_v62, 0 }
 0x1d3   : > { %2125 = vmatmul.msk.bf16.vlgmr.msra.gmra.mxu3 %vm353_vm7, %v2523_v31  ;;  %v935_v31 = vsel %vm455_vm6, %v2136_v28, 0  ;;  %v1188_v28 = vsel %vm455_vm6, %v2155_v4, 0 }
 0x1d4   : > { %884 = vmatpush.bf16.msra.mxu3 %v875_v6  ;;  %v2164_v6 = vld [vmem:[%s2993_s2 + $0x40] sm:$0x3] }
 0x1d9   : > { %2146 = vmatmul.msk.bf16.vlgmr.msra.gmra.mxu0 %vm353_vm7, %v970_v8  ;;  %v1225_v8 = vsel %vm455_vm6, %v2164_v6, 0  ;;  %v1320_v6 = vrot.slane %v2581_v38, 2 }
 0x1da   : > { %1175 = vmatpush.bf16.msra.mxu0 %v1166_v12  ;;  %v1245_v12 = vsel %vm455_vm6, %v2165_v11, 0 }
 0x1db   : > { %2128 = vmatmul.msk.bf16.vlgmr.msrb.gmra.mxu2 %vm353_vm7, %v2483_v0  ;;  %v2166_v0 = vld [vmem:[%s2993_s2 + $0x44] sm:$0x3] }
 0x1dc   : > { %2127 = vmatmul.msk.bf16.vlgmr.msra.gmra.mxu1 %vm353_vm7, %v2526_v36  ;;  %944 = vmatpush.bf16.msrb.mxu2 %v935_v31  ;;  %v2148_v36 = vld [vmem:[%s2993_s2 + $0x30] sm:$0x3]  ;;  %v1265_v30 = vsel %vm455_vm6, %v2166_v0, 0  ;;  %v1340_v31 = vrot.slane %v2469_v57, 2  ;;  %v1325_v0 = vsel %vm455_vm6, %v2169_v20, 0 }
 0x1dd   : > { %924 = vmatpush.bf16.msra.mxu1 %v915_v13  ;;  %v1034_v33 = vsel %vm455_vm6, %v2148_v36, 0  ;;  %v2186_v13 = vld [vmem:[%s2993_s2 + $0x5c] sm:$0x3] }
 0x1de   : > { %v1536_v17 = vsel %vm455_vm6, %v2186_v13, 0 }
 0x1e3   : > { %2129 = vmatmul.msk.bf16.vlgmr.msrb.gmra.mxu3 %vm353_vm7, %v2559_v16  ;;  %v850_v16 = vrot.slane %v2443_v32, 1 }
 0x1e4   : > { %964 = vmatpush.bf16.msrb.mxu3 %v955_v15 }
 0x1e9   : > { %2158 = vmatmul.msk.bf16.vlgmr.msrb.gmra.mxu0 %vm353_vm7, %v1073_v22 }
 0x1ea   : > { %1274 = vmatpush.bf16.msrb.mxu0 %v1265_v30 }
 0x1eb   : > { %2140 = vmatmul.msk.bf16.vlgmr.msra.gmra.mxu2 %vm353_vm7, %v850_v16 }
 0x1ec   : > { %2131 = vmatmul.msk.bf16.vlgmr.msrb.gmra.mxu1 %vm353_vm7, %v2585_v43  ;;  %1043 = vmatpush.bf16.msra.mxu2 %v1034_v33  ;;  %v2170_v43 = vld [vmem:[%s2993_s2 + $0x4c] sm:$0x3] }
 0x1ed   : > { %1004 = vmatpush.bf16.msrb.mxu1 %v995_v26  ;;  %v1345_v49 = vsel %vm455_vm6, %v2170_v43, 0 }
 0x1f3   : > { %2141 = vmatmul.msk.bf16.vlgmr.msra.gmra.mxu3 %vm353_vm7, %v870_v37 }
 0x1f4   : > { %1065 = vmatpush.bf16.msra.mxu3 %v1056_v39  ;;  %v1240_v39 = vrot.slane %v2533_v45, 2 }
 0x1f9   : > { %2162 = vmatmul.msk.bf16.vlgmr.msra.gmra.mxu0 %vm353_vm7, %v1161_v53  ;;  %v2183_v53 = vld [vmem:[%s2993_s2 + $0x56] sm:$0x3] }
 0x1fa   : > { %1354 = vmatpush.bf16.msra.mxu0 %v1345_v49  ;;  %v1470_v60 = vsel %vm455_vm6, %v2183_v53, 0 }
 0x1fb   : > { %2144 = vmatmul.msk.bf16.vlgmr.msrb.gmra.mxu2 %vm353_vm7, %v930_v58  ;;  %v1300_v58 = vrot.slane %v2493_v9, 2 }
 0x1fc   : > { %2143 = vmatmul.msk.bf16.vlgmr.msra.gmra.mxu1 %vm353_vm7, %v910_v56  ;;  %1131 = vmatpush.bf16.msrb.mxu2 %v1122_v59  ;;  %v1715_v59 = vsel %vm455_vm6, %v2202_v54, 0 }
 0x1fd   : > { %1109 = vmatpush.bf16.msra.mxu1 %v1100_v55  ;;  %v1280_v55 = vrot.slane %v2538_v47, 2 }
 0x203   : > { %2145 = vmatmul.msk.bf16.vlgmr.msrb.gmra.mxu3 %vm353_vm7, %v950_v51  ;;  %v2184_v51 = vld [vmem:[%s2993_s2 + $0x58] sm:$0x3] }
 0x204   : > { %1153 = vmatpush.bf16.msrb.mxu3 %v1144_v61  ;;  %v1492_v61 = vsel %vm455_vm6, %v2184_v51, 0 }
 0x209   : > { %2174 = vmatmul.msk.bf16.vlgmr.msrb.gmra.mxu0 %vm353_vm7, %v1260_v2  ;;  %v2185_v2 = vld [vmem:[%s2993_s2 + $0x5a] sm:$0x3] }
 0x20a   : > { %1457 = vmatpush.bf16.msrb.mxu0 %v1448_v5 }
 0x20b   : > { %2156 = vmatmul.msk.bf16.vlgmr.msra.gmra.mxu2 %vm353_vm7, %v2447_v41  ;;  %v2167_v41 = vld [vmem:[%s2993_s2 + $0x46] sm:$0x3] }
 0x20c   : > { %2147 = vmatmul.msk.bf16.vlgmr.msrb.gmra.mxu1 %vm353_vm7, %v990_v7  ;;  %1234 = vmatpush.bf16.msra.mxu2 %v1225_v8  ;;  %v1285_v15 = vsel %vm455_vm6, %v2167_v41, 0  ;;  %v1514_v7 = vsel %vm455_vm6, %v2185_v2, 0  ;;  %v1610_v2 = vrot.slane %v2533_v45, 3 }
 0x20d   : > { %1197 = vmatpush.bf16.msrb.mxu1 %v1188_v28 }
 0x213   : > { %2157 = vmatmul.msk.bf16.vlgmr.msra.gmra.mxu3 %vm353_vm7, %v2567_v27  ;;  %v2168_v27 = vld [vmem:[%s2993_s2 + $0x48] sm:$0x3] }
 0x214   : > { %1254 = vmatpush.bf16.msra.mxu3 %v1245_v12  ;;  %v1305_v19 = vsel %vm455_vm6, %v2168_v27, 0  ;;  %v1630_v12 = vrot.slane %v2562_v21, 3  ;;  %v2196_v27 = vld [vmem:[%s2993_s2 + $0x60] sm:$0x3] }
 0x215   : > { %v1595_v21 = vsel %vm455_vm6, %v2196_v27, 0 }
 0x219   : > { %2178 = vmatmul.msk.bf16.vlgmr.msra.gmra.mxu0 %vm353_vm7, %v1340_v31  ;;  %v2187_v31 = vld [vmem:[%s2993_s2 + $0x5e] sm:$0x3] }
 0x21a   : > { %1545 = vmatpush.bf16.msra.mxu0 %v1536_v17  ;;  %v1360_v17 = vrot.slane %v2601_v1, 2 }
 0x21b   : > { %2160 = vmatmul.msk.bf16.vlgmr.msrb.gmra.mxu2 %vm353_vm7, %v2518_v24  ;;  %v2171_v24 = vld [vmem:[%s2993_s2 + $0x4e] sm:$0x3] }
 0x21c   : > { %2159 = vmatmul.msk.bf16.vlgmr.msra.gmra.mxu1 %vm353_vm7, %v2583_v40  ;;  %1314 = vmatpush.bf16.msrb.mxu2 %v1305_v19  ;;  %v2198_v40 = vld [vmem:[%s2993_s2 + $0x64] sm:$0x3]  ;;  %v1365_v16 = vsel %vm455_vm6, %v2171_v24, 0 }
 0x21d   : > { %1294 = vmatpush.bf16.msra.mxu1 %v1285_v15  ;;  %v1635_v30 = vsel %vm455_vm6, %v2198_v40, 0  ;;  %v1558_v15 = vsel %vm455_vm6, %v2187_v31, 0 }
 0x223   : > { %2161 = vmatmul.msk.bf16.vlgmr.msrb.gmra.mxu3 %vm353_vm7, %v2619_v18  ;;  %v2180_v18 = vld [vmem:[%s2993_s2 + $0x50] sm:$0x3] }
 0x224   : > { %1334 = vmatpush.bf16.msrb.mxu3 %v1325_v0  ;;  %v1404_v33 = vsel %vm455_vm6, %v2180_v18, 0  ;;  %v2197_v0 = vld [vmem:[%s2993_s2 + $0x62] sm:$0x3] }
 0x225   : > { %v1615_v40 = vsel %vm455_vm6, %v2197_v0, 0 }
 0x226   : > { %v742_v36 = vpop.f32.mrf.mxu0 }
 0x229   : > { %v2791_v22 = vpop.f32.mrf.mxu1  ;;  %2190 = vmatmul.msk.bf16.vlgmr.msrb.gmra.mxu0 %vm353_vm7, %v2597_v63 }
 0x22a   : > { %1644 = vmatpush.bf16.msrb.mxu0 %v1635_v30 }
 0x22b   : > { %2172 = vmatmul.msk.bf16.vlgmr.msra.gmra.mxu2 %vm353_vm7, %v1220_v23 }
 0x22c   : > { %2163 = vmatmul.msk.bf16.vlgmr.msrb.gmra.mxu1 %vm353_vm7, %v2629_v44  ;;  %1413 = vmatpush.bf16.msra.mxu2 %v1404_v33  ;;  %v2199_v33 = vld [vmem:[%s2993_s2 + $0x66] sm:$0x3] }
 0x22d   : > { %1374 = vmatpush.bf16.msrb.mxu1 %v1365_v16  ;;  %v1710_v16 = vrot.slane %v2469_v57, 3 }
 0x22e   : > { %v2805_v63 = vpop.f32.mrf.mxu2  ;;  %v744_v26 = vpop.f32.mrf.mxu0 }
 0x231   : > { %v563_v37 = vpop.f32.mrf.mxu1 }
 0x233   : > { %2173 = vmatmul.msk.bf16.vlgmr.msra.gmra.mxu3 %vm353_vm7, %v1240_v39  ;;  %v2200_v39 = vld [vmem:[%s2993_s2 + $0x68] sm:$0x3] }
 0x234   : > { %1435 = vmatpush.bf16.msra.mxu3 %v1426_v52  ;;  %v1675_v57 = vsel %vm455_vm6, %v2200_v39, 0 }
 0x236   : > { %v501_v14 = vpop.f32.mrf.mxu2  ;;  %v530_v43 = vpop.f32.mrf.mxu3 }
 0x237   : > { %v743_v44 = vadd.f32 %v742_v36, %v530_v43  ;;  %v818_v48 = vpop.f32.mrf.mxu0 }
 0x239   : > { %v654_v49 = vpop.f32.mrf.mxu1  ;;  %2194 = vmatmul.msk.bf16.vlgmr.msra.gmra.mxu0 %vm353_vm7, %v2495_v10 }
 0x23a   : > { %v819_v56 = vadd.f32 %v818_v48, %v654_v49  ;;  %1724 = vmatpush.bf16.msra.mxu0 %v1715_v59  ;;  %v1590_v59 = vrot.slane %v2443_v32, 3 }
 0x23b   : > { %2176 = vmatmul.msk.bf16.vlgmr.msrb.gmra.mxu2 %vm353_vm7, %v1300_v58 }
 0x23c   : > { %2175 = vmatmul.msk.bf16.vlgmr.msra.gmra.mxu1 %vm353_vm7, %v1280_v55  ;;  %1501 = vmatpush.bf16.msrb.mxu2 %v1492_v61  ;;  %v2203_v55 = vld [vmem:[%s2993_s2 + $0x6e] sm:$0x3] }
 0x23d   : > { %1479 = vmatpush.bf16.msra.mxu1 %v1470_v60  ;;  %v1735_v60 = vsel %vm455_vm6, %v2203_v55, 0 }
 0x23e   : > { %v532_v10 = vpop.f32.mrf.mxu3  ;;  %v592_v62 = vpop.f32.mrf.mxu2 }
 0x23f   : > { %v820_v4 = vpop.f32.mrf.mxu0 }
 0x241   : > { %v656_v5 = vpop.f32.mrf.mxu1 }
 0x243   : > { %2177 = vmatmul.msk.bf16.vlgmr.msrb.gmra.mxu3 %vm353_vm7, %v1320_v6 }
 0x244   : > { %1523 = vmatpush.bf16.msrb.mxu3 %v1514_v7 }
 0x246   : > { %v594_v28 = vpop.f32.mrf.mxu2  ;;  %v623_v8 = vpop.f32.mrf.mxu3 }
 0x247   : > { %v906_v11 = vpop.f32.mrf.mxu0 }
 0x248   : > { %v1012_v41 = vadd.f32 %v906_v11, %v743_v44 }
 0x249   : > { %v685_v13 = vpop.f32.mrf.mxu1  ;;  %2206 = vmatmul.msk.bf16.vlgmr.msrb.gmra.mxu0 %vm353_vm7, %v1630_v12 }
 0x24b   : > { %2188 = vmatmul.msk.bf16.vlgmr.msra.gmra.mxu2 %vm353_vm7, %v2449_v42 }
 0x24c   : > { %2179 = vmatmul.msk.bf16.vlgmr.msrb.gmra.mxu1 %vm353_vm7, %v1360_v17  ;;  %1604 = vmatpush.bf16.msra.mxu2 %v1595_v21  ;;  %v1690_v17 = vrot.slane %v2581_v38, 3 }
 0x24d   : > { %1567 = vmatpush.bf16.msrb.mxu1 %v1558_v15 }
 0x24e   : > { %v625_v19 = vpop.f32.mrf.mxu3  ;;  %v704_v20 = vpop.f32.mrf.mxu2 }
 0x24f   : > { %v908_v36 = vpop.f32.mrf.mxu0 }
 0x251   : > { %v687_v24 = vpop.f32.mrf.mxu1 }
 0x253   : > { %2189 = vmatmul.msk.bf16.vlgmr.msra.gmra.mxu3 %vm353_vm7, %v2599_v50  ;;  %v1655_v50 = vsel %vm455_vm6, %v2199_v33, 0 }
 0x254   : > { %1624 = vmatpush.bf16.msra.mxu3 %v1615_v40 }
 0x256   : > { %v706_v42 = vpop.f32.mrf.mxu2  ;;  %v723_v23 = vpop.f32.mrf.mxu3 }
 0x257   : > { %v724_v30 = vadd.f32 %v723_v23, %v2805_v63  ;;  %v986_v18 = vpop.f32.mrf.mxu0 }
 0x258   : > { %v1016_v26 = vadd.f32 %v986_v18, %v819_v56 }
 0x259   : > { %v761_v35 = vpop.f32.mrf.mxu1  ;;  %2210 = vmatmul.msk.bf16.vlgmr.msra.gmra.mxu0 %vm353_vm7, %v1710_v16 }
 0x25a   : > { %v762_v37 = vadd.f32 %v761_v35, %v2791_v22  ;;  %v2201_v22 = vld [vmem:[%s2993_s2 + $0x6a] sm:$0x3] }
 0x25b   : > { %2192 = vmatmul.msk.bf16.vlgmr.msrb.gmra.mxu2 %vm353_vm7, %v2520_v25  ;;  %v1695_v48 = vsel %vm455_vm6, %v2201_v22, 0 }
 0x25c   : > { %2191 = vmatmul.msk.bf16.vlgmr.msra.gmra.mxu1 %vm353_vm7, %v2569_v29  ;;  %1684 = vmatpush.bf16.msrb.mxu2 %v1675_v57 }
 0x25d   : > { %1664 = vmatpush.bf16.msra.mxu1 %v1655_v50 }
 0x25e   : > { %v725_v63 = vpop.f32.mrf.mxu3  ;;  %v780_v52 = vpop.f32.mrf.mxu2 }
 0x25f   : > { %v781_v14 = vadd.f32 %v780_v52, %v592_v62  ;;  %v988_v43 = vpop.f32.mrf.mxu0 }
 0x261   : > { %v763_v44 = vpop.f32.mrf.mxu1 }
 0x263   : > { %2193 = vmatmul.msk.bf16.vlgmr.msrb.gmra.mxu3 %vm353_vm7, %v2625_v34  ;;  %v705_v34 = vadd.f32 %v704_v20, %v2606_v3  ;;  %v1650_v3 = vrot.slane %v2538_v47, 3  ;;  %v1730_v47 = vrot.slane %v2601_v1, 3 }
 0x264   : > { %1704 = vmatpush.bf16.msrb.mxu3 %v1695_v48 }
 0x266   : > { %v782_v25 = vpop.f32.mrf.mxu2  ;;  %v799_v53 = vpop.f32.mrf.mxu3 }
 0x267   : > { %v800_v29 = vadd.f32 %v799_v53, %v623_v8  ;;  %v1089_v54 = vpop.f32.mrf.mxu0 }
 0x268   : > { %v2879_v49 = vadd.f32 %v1089_v54, %v1012_v41 }
 0x269   : > { %v837_v58 = vpop.f32.mrf.mxu1 }
 0x26a   : > { %v838_v56 = vadd.f32 %v837_v58, %v685_v13 }
 0x26b   : > { %2204 = vmatmul.msk.bf16.vlgmr.msra.gmra.mxu2 %vm353_vm7, %v1590_v59 }
 0x26c   : > { %2195 = vmatmul.msk.bf16.vlgmr.msrb.gmra.mxu1 %vm353_vm7, %v2632_v46  ;;  %v1670_v46 = vrot.slane %v2493_v9, 3 }
 0x26d   : > { %1744 = vmatpush.bf16.msrb.mxu1 %v1735_v60 }
 0x26e   : > { %v801_v51 = vpop.f32.mrf.mxu3  ;;  %v866_v61 = vpop.f32.mrf.mxu2 }
 0x26f   : > { %v1010_v10 = vadd.f32 %v866_v61, %v705_v34  ;;  %v1091_v62 = vpop.f32.mrf.mxu0 }
 0x271   : > { %v839_v32 = vpop.f32.mrf.mxu1 }
 0x273   : > { %2205 = vmatmul.msk.bf16.vlgmr.msra.gmra.mxu3 %vm353_vm7, %v1610_v2 }
 0x276   : > { %v868_v4 = vpop.f32.mrf.mxu2  ;;  %v886_v5 = vpop.f32.mrf.mxu3 }
 0x277   : > { %v1011_v6 = vadd.f32 %v886_v5, %v724_v30  ;;  %v1177_v7 = vpop.f32.mrf.mxu0 }
 0x278   : > { %v1209_v28 = vadd.f32 %v1177_v7, %v1016_v26 }
 0x279   : > { %v926_v8 = vpop.f32.mrf.mxu1 }
 0x27a   : > { %v1013_v11 = vadd.f32 %v926_v8, %v762_v37 }
 0x27b   : > { %2208 = vmatmul.msk.bf16.vlgmr.msrb.gmra.mxu2 %vm353_vm7, %v1670_v46 }
 0x27c   : > { %2207 = vmatmul.msk.bf16.vlgmr.msra.gmra.mxu1 %vm353_vm7, %v1650_v3 }
 0x27e   : > { %v888_v12 = vpop.f32.mrf.mxu3  ;;  %v946_v31 = vpop.f32.mrf.mxu2 }
 0x27f   : > { %v1014_v45 = vadd.f32 %v946_v31, %v781_v14  ;;  %v1179_v41 = vpop.f32.mrf.mxu0 }
 0x281   : > { %v928_v13 = vpop.f32.mrf.mxu1 }
 0x283   : > { %2209 = vmatmul.msk.bf16.vlgmr.msrb.gmra.mxu3 %vm353_vm7, %v1690_v17 }
 0x286   : > { %v948_v15 = vpop.f32.mrf.mxu2  ;;  %v966_v27 = vpop.f32.mrf.mxu3 }
 0x287   : > { %v1015_v21 = vadd.f32 %v966_v27, %v800_v29  ;;  %v1276_v9 = vpop.f32.mrf.mxu0 }
 0x289   : > { %v1006_v19 = vpop.f32.mrf.mxu1 }
 0x28a   : > { %v1017_v20 = vadd.f32 %v1006_v19, %v838_v56 }
 0x28c   : > { %2211 = vmatmul.msk.bf16.vlgmr.msrb.gmra.mxu1 %vm353_vm7, %v1730_v47 }
 0x28e   : > { %v968_v0 = vpop.f32.mrf.mxu3  ;;  %v1045_v36 = vpop.f32.mrf.mxu2 }
 0x28f   : > { %v1203_v24 = vadd.f32 %v1045_v36, %v1010_v10  ;;  %v1278_v40 = vpop.f32.mrf.mxu0  ;;  %v1382_v10 = vadd.f32 %v1276_v9, %v2879_v49 }
 0x291   : > { %v1008_v42 = vpop.f32.mrf.mxu1 }
 0x296   : > { %v1047_v23 = vpop.f32.mrf.mxu2  ;;  %v1067_v30 = vpop.f32.mrf.mxu3 }
 0x297   : > { %v1204_v38 = vadd.f32 %v1067_v30, %v1011_v6  ;;  %v1356_v18 = vpop.f32.mrf.mxu0 }
 0x298   : > { %v1386_v16 = vadd.f32 %v1356_v18, %v1209_v28 }
 0x299   : > { %v1111_v33 = vpop.f32.mrf.mxu1 }
 0x29a   : > { %v1206_v26 = vadd.f32 %v1111_v33, %v1013_v11 }
 0x29e   : > { %v1069_v35 = vpop.f32.mrf.mxu3  ;;  %v1133_v37 = vpop.f32.mrf.mxu2 }
 0x29f   : > { %v2900_v50 = vadd.f32 %v1133_v37, %v1014_v45  ;;  %v1358_v39 = vpop.f32.mrf.mxu0 }
 0x2a1   : > { %v1113_v1 = vpop.f32.mrf.mxu1 }
 0x2a6   : > { %v1135_v57 = vpop.f32.mrf.mxu2  ;;  %v1155_v63 = vpop.f32.mrf.mxu3 }
 0x2a7   : > { %v2902_v52 = vadd.f32 %v1155_v63, %v1015_v21  ;;  %v1459_v22 = vpop.f32.mrf.mxu0 }
 0x2a8   : > { %v1575_v62 = vadd.f32 %v1459_v22, %v1382_v10 }
 0x2a9   : > { %v1199_v14 = vpop.f32.mrf.mxu1 }
 0x2aa   : > { %v2904_v43 = vadd.f32 %v1199_v14, %v1017_v20 }
 0x2ae   : > { %v1157_v44 = vpop.f32.mrf.mxu3  ;;  %v1236_v48 = vpop.f32.mrf.mxu2 }
 0x2af   : > { %v1380_v25 = vadd.f32 %v1236_v48, %v1203_v24  ;;  %v1461_v53 = vpop.f32.mrf.mxu0 }
 0x2b1   : > { %v1201_v29 = vpop.f32.mrf.mxu1 }
 0x2b6   : > { %v1238_v54 = vpop.f32.mrf.mxu2  ;;  %v1256_v58 = vpop.f32.mrf.mxu3 }
 0x2b7   : > { %v1547_v59 = vpop.f32.mrf.mxu0  ;;  %v1381_v0 = vadd.f32 %v1256_v58, %v1204_v38 }
 0x2b8   : > { %v1579_v56 = vadd.f32 %v1547_v59, %v1386_v16 }
 0x2b9   : > { %v1296_v55 = vpop.f32.mrf.mxu1 }
 0x2ba   : > { %v1383_v24 = vadd.f32 %v1296_v55, %v1206_v26 }
 0x2be   : > { %v1258_v60 = vpop.f32.mrf.mxu3  ;;  %v1316_v34 = vpop.f32.mrf.mxu2 }
 0x2bf   : > { %v1549_v51 = vpop.f32.mrf.mxu0  ;;  %v1384_v33 = vadd.f32 %v1316_v34, %v2900_v50  ;;  %v2267_v34 = vld [vmem:[%s2994_s3 + $0x8] sm:$0xff] }
 0x2c0   : > { %1839 = vmatpush.bf16.msra.mxu2 %v2267_v34  ;;  %v2266_v51 = vld [vmem:[%s2994_s3] sm:$0xff]  ;;  %v2272_v34 = vld [vmem:[%s2996_s5 + $0x10] sm:$0xff] }
 0x2c1   : > { %v1298_v61 = vpop.f32.mrf.mxu1 }
 0x2c2   : > { %v2304_v61 = vld [vmem:[%s2997_s6 + $0x1] ss:$0 sm:$0xff] }
 0x2c4   : > { %1840 = vmatpush.bf16.msra.mxu2 %v2266_v51 }
 0x2c6   : > { %v1318_v32 = vpop.f32.mrf.mxu2  ;;  %v1336_v2 = vpop.f32.mrf.mxu3 }
 0x2c7   : > { %v1646_v4 = vpop.f32.mrf.mxu0  ;;  %v1385_v26 = vadd.f32 %v1336_v2, %v2902_v52 }
 0x2c8   : > { %v1752_v5 = vadd.f32 %v1646_v4, %v1575_v62 }
 0x2c9   : > { %v1376_v6 = vpop.f32.mrf.mxu1 }
 0x2ca   : > { %1763 = vrot.lane.b32.xlu0 %v1752_v5, %s2344_s13  ;;  %v1387_v22 = vadd.f32 %v1376_v6, %v2904_v43 }
 0x2ce   : > { %v1338_v7 = vpop.f32.mrf.mxu3  ;;  %v1415_v28 = vpop.f32.mrf.mxu2 }
 0x2cf   : > { %v1573_v8 = vadd.f32 %v1415_v28, %v1380_v25  ;;  %v1648_v46 = vpop.f32.mrf.mxu0 }
 0x2d1   : > { %v1378_v11 = vpop.f32.mrf.mxu1 }
 0x2d6   : > { %v1417_v3 = vpop.f32.mrf.mxu2  ;;  %v1437_v12 = vpop.f32.mrf.mxu3 }
 0x2d7   : > { %v1726_v31 = vpop.f32.mrf.mxu0  ;;  %v1574_v36 = vadd.f32 %v1437_v12, %v1381_v0 }
 0x2d8   : > { %v1756_v38 = vadd.f32 %v1726_v31, %v1579_v56 }
 0x2d9   : > { %v1481_v45 = vpop.f32.mrf.mxu1 }
 0x2da   : > { %v1576_v30 = vadd.f32 %v1481_v45, %v1383_v24 }
 0x2de   : > { %v1439_v41 = vpop.f32.mrf.mxu3  ;;  %v1503_v13 = vpop.f32.mrf.mxu2 }
 0x2df   : > { %v1728_v49 = vpop.f32.mrf.mxu0  ;;  %v1577_v35 = vadd.f32 %v1503_v13, %v1384_v33 }
 0x2e0   : > { %v2305_v49 = vld [vmem:[%s2997_s6 + $0x2] ss:$0 sm:$0xff] }
 0x2e1   : > { %v1483_v17 = vpop.f32.mrf.mxu1 }
 0x2e6   : > { %v1505_v15 = vpop.f32.mrf.mxu2  ;;  %v1525_v27 = vpop.f32.mrf.mxu3 }
 0x2e7   : > { %v1578_v63 = vadd.f32 %v1525_v27, %v1385_v26  ;;  %v2326_v27 = vld [vmem:[%s2412_s10] sm:$0xff] }
 0x2e9   : > { %v1569_v21 = vpop.f32.mrf.mxu1 }
 0x2ea   : > { %v1580_v48 = vadd.f32 %v1569_v21, %v1387_v22 }
 0x2ee   : > { %v1527_v9 = vpop.f32.mrf.mxu3  ;;  %v1606_v19 = vpop.f32.mrf.mxu2 }
 0x2ef   : > { %v1750_v20 = vadd.f32 %v1606_v19, %v1573_v8 }
 0x2f1   : > { %v1571_v47 = vpop.f32.mrf.mxu1 }
 0x2f6   : > { %v1608_v40 = vpop.f32.mrf.mxu2  ;;  %v1626_v42 = vpop.f32.mrf.mxu3 }
 0x2f7   : > { %v1751_v23 = vadd.f32 %v1626_v42, %v1574_v36 }
 0x2f9   : > { %v1666_v18 = vpop.f32.mrf.mxu1  ;;  %1759 = vrot.lane.b32.xlu2 %v1751_v23, %s2345_s14 }
 0x2fa   : > { %v1753_v16 = vadd.f32 %v1666_v18, %v1576_v30 }
 0x2fc   : > { %1767 = vrot.lane.b32.xlu1 %v1753_v16, %s2346_s15 }
 0x2fe   : > { %v1628_v37 = vpop.f32.mrf.mxu3  ;;  %v1686_v39 = vpop.f32.mrf.mxu2 }
 0x2ff   : > { %v1754_v1 = vadd.f32 %v1686_v39, %v1577_v35  ;;  %v2269_v35 = vld [vmem:[%s2995_s4 + $0x8] sm:$0xff]  ;;  %v2268_v37 = vld [vmem:[%s2995_s4] sm:$0xff]  ;;  %v2277_v39 = vld [vmem:[%s2996_s5 + $0x38] sm:$0xff] }
 0x300   : > { %1910 = vmatpush.bf16.msra.mxu3 %v2269_v35  ;;  %1993 = vmatpush.bf16.msrb.mxu0 %v2277_v39 }
 0x301   : > { %v1668_v57 = vpop.f32.mrf.mxu1  ;;  %1771 = vrot.lane.b32.xlu2 %v1754_v1, %s2347_s16 }
 0x304   : > { %1779 = vrot.lane.b32.xlu1 %v1756_v38, %s2348_s17  ;;  %1911 = vmatpush.bf16.msra.mxu3 %v2268_v37 }
 0x306   : > { %v1688_v14 = vpop.f32.mrf.mxu2  ;;  %v1706_v44 = vpop.f32.mrf.mxu3 }
 0x307   : > { %v1755_v50 = vadd.f32 %v1706_v44, %v1578_v63 }
 0x309   : > { %v1746_v25 = vpop.f32.mrf.mxu1  ;;  %1775 = vrot.lane.b32.xlu0 %v1755_v50, %s2349_s18  ;;  %s2097_s18 = sshll.u32 %s3000_s25, 2 }
 0x30a   : > { %v1757_v53 = vadd.f32 %v1746_v25, %v1580_v48  ;;  %v2306_v48 = vld [vmem:[%s2997_s6 + $0x3] ss:$0 sm:$0xff]  ;;  %s273_s21 = scalar_lea.vmem %s2998_s7, %s2097_s18 }
 0x30c   : > { %1783 = vrot.lane.b32.xlu2 %v1757_v53, %s2350_s19  ;;  %v2307_v53 = vld [vmem:[%s2997_s6 + $0x4] ss:$0 sm:$0xff] }
 0x30e   : > { %v1708_v29 = vpop.f32.mrf.mxu3 }
 0x311   : > { %v1748_v54 = vpop.f32.mrf.mxu1 }
 0x33c   : > { %v1764_v52 = vpop.permute.xlu0 %1763 }
 0x353   : > { %v1760_v58 = vpop.permute.xlu2 %1759 }
 0x354   : > { %v1786_v56 = vsel %vm353_vm7, %v1750_v20, %v1760_v58  ;;  %v2351_v20 = vmov 32.0  }
 0x355   : > { %v1788_v43 = vsel %vm1787_vm8, %v1786_v56, %v1764_v52  ;;  %v2276_v52 = vld [vmem:[%s2996_s5 + $0x30] sm:$0xff]  ;;  %v2275_v56 = vld [vmem:[%s2996_s5 + $0x28] sm:$0xff] }
 0x356   : > { %1994 = vmatpush.bf16.msrb.mxu0 %v2276_v52 }
 0x35a   : > { %1995 = vmatpush.bf16.msrb.mxu0 %v2275_v56 }
 0x35b   : > { %v1772_v55 = vpop.permute.xlu2 %1771 }
 0x366   : > { %v1784_v4 = vpop.permute.xlu2 %1783 }
 0x36e   : > { %v1768_v59 = vpop.permute.xlu1 %1767 }
 0x36f   : > { %v1790_v60 = vsel %vm1789_vm9, %v1788_v43, %v1768_v59  ;;  %v2273_v43 = vld [vmem:[%s2996_s5 + $0x18] sm:$0xff] }
 0x370   : > { %v1792_v62 = vsel %vm1791_vm10, %v1790_v60, %v1772_v55  ;;  %v2274_v55 = vld [vmem:[%s2996_s5 + $0x20] sm:$0xff] }
 0x371   : > { %1996 = vmatpush.bf16.msrb.mxu0 %v2274_v55  ;;  %v2308_v60 = vld [vmem:[%s2997_s6 + $0x5] ss:$0 sm:$0xff] }
 0x375   : > { %1997 = vmatpush.bf16.msrb.mxu0 %v2273_v43 }
 0x376   : > { %v1780_v32 = vpop.permute.xlu1 %1779 }
 0x379   : > { %1998 = vmatpush.bf16.msrb.mxu0 %v2272_v34 }
 0x37b   : > { %v1776_v10 = vpop.permute.xlu0 %1775 }
 0x37c   : > { %v1794_v2 = vsel %vm1793_vm11, %v1792_v62, %v1776_v10  ;;  %v2271_v62 = vld [vmem:[%s2996_s5 + $0x8] sm:$0xff] }
 0x37d   : > { %v1796_v5 = vsel %vm1795_vm12, %v1794_v2, %v1780_v32  ;;  %1999 = vmatpush.bf16.msrb.mxu0 %v2271_v62 }
 0x37e   : > { %v1798_v6 = vsel %vm1797_vm13, %v1796_v5, %v1784_v4  ;;  %v2270_v4 = vld [vmem:[%s2996_s5] sm:$0xff] }
 0x37f   : > { %v1801_v7 = vadd.f32 %v2304_v61, %v1798_v6 }
 0x381   : > { %v1802_v28 = vmul.f32 %v1801_v7, %v1801_v7  ;;  %2000 = vmatpush.bf16.msrb.mxu0 %v2270_v4 }
 0x383   : > { %v1803_v8 = vmul.f32 %v1802_v28, %v1801_v7 }
 0x385   : > { %v1804_v46 = vmul.f32 0.044715, %v1803_v8 }
 0x387   : > { %v1805_v11 = vadd.f32 %v1804_v46, %v1801_v7 }
 0x389   : > { %v1806_v3 = vmul.f32 0.7978846, %v1805_v11 }
 0x38b   : > { %2316 = vtanh.f32 %v1806_v3 }
 0x38c   : > { %2318 = vrcp.f32 %v2351_v20 }
 0x391   : > { %v2317_v12 = vpop.eup %2316 }
 0x392   : > { %v1808_v31 = vadd.f32 1.0, %v2317_v12  ;;  %v2319_v47 = vpop.eup %2318  ;;  %v2309_v12 = vld [vmem:[%s2997_s6 + $0x6] ss:$0 sm:$0xff] }
 0x393   : > { %v1853_v0 = vmul.f32 32.0, %v2319_v47  ;;  %vm1857_vm14 = vweird.f32 %v2319_v47 }
 0x394   : > { %v1809_v45 = vmul.f32 0.5, %v1808_v31 }
 0x395   : > { %v1854_v36 = vsub.f32 1.0, %v1853_v0 }
 0x396   : > { %v1810_v41 = vmul.f32 %v1809_v45, %v1801_v7 }
 0x397   : > { %v1855_v24 = vmul.f32 %v2319_v47, %v1854_v36 }
 0x398   : > { %v1811_v13 = vpack.c.bf16 %v1810_v41, %v1810_v41 }
 0x399   : > { %v1856_v40 = vadd.f32 %v2319_v47, %v1855_v24 }
 0x39a   : > { %2220 = vmatmul.msk.bf16.vlgmr.msra.gmra.mxu2 %vm295_vm0, %v1811_v13 }
 0x39b   : > { %v2926_v42 = vsel %vm1857_vm14, %v2319_v47, %v1856_v40 }
 0x41d   : > { %v1842_v17 = vpop.f32.mrf.mxu2 }
 0x41e   : > { %v1843_v15 = vadd.f32 %v2305_v49, %v1842_v17 }
 0x420   : > { %v1846_v21 = vadd.f32 %v2326_v27, %v1843_v15 }
 0x422   : > { %v1849_v9 = vsel %vm295_vm0, %v1846_v21, 0.0 }
 0x423   : > { %1850 = vadd.xlane.f32.xlu0 %v1849_v9 }
 0x425   : > { %v1844_v19 = vpop.f32.mrf.mxu2 }
 0x496   : > { %v1851_v23 = vpop.xlane.xlu0 %1850 }
 0x497   : > { %v1859_v30 = vmul.f32 %v2926_v42, %v1851_v23 }
 0x499   : > { %v1860_v18 = vsub.f32 %v1846_v21, %v1859_v30 }
 0x49b   : > { %v1861_v16 = vmul.f32 %v1860_v18, %v1860_v18 }
 0x49d   : > { %v1862_v33 = vsel %vm295_vm0, %v1861_v16, 0.0 }
 0x49e   : > { %1863 = vadd.xlane.f32.xlu1 %v1862_v33 }
 0x511   : > { %v1864_v1 = vpop.xlane.xlu1 %1863 }
 0x512   : > { %v1865_v57 = vmul.f32 %v1864_v1, %v2926_v42 }
 0x514   : > { %v1866_v38 = vadd.f32 1e-12, %v1865_v57 }
 0x516   : > { %2320 = vrsqrt.f32 %v1866_v38  ;;  %vm1873_vm1 = vweird.f32 %v1866_v38 }
 0x51c   : > { %v2321_v26 = vpop.eup %2320 }
 0x51d   : > { %v1868_v63 = vmul.f32 %v2321_v26, %v1866_v38  ;;  %vm1874_vm15 = vweird.f32 %v2321_v26 }
 0x51e   : > { %vm1875_vm2 = vmor %vm1873_vm1, %vm1874_vm15 }
 0x51f   : > { %v1869_v22 = vmul.f32 %v2321_v26, %v1868_v63 }
 0x521   : > { %v1870_v14 = vmul.f32 0.5, %v1869_v22 }
 0x523   : > { %v1871_v44 = vsub.f32 1.5, %v1870_v14 }
 0x525   : > { %v1872_v50 = vmul.f32 %v2321_v26, %v1871_v44 }
 0x527   : > { %v1876_v25 = vsel %vm1875_vm2, %v2321_v26, %v1872_v50 }
 0x528   : > { %v1877_v29 = vmul.f32 %v1876_v25, %v1860_v18  ;;  %v2310_v18 = vld [vmem:[%s2997_s6 + $0x7] ss:$0 sm:$0xff] }
 0x52a   : > { %v1879_v54 = vmul.f32 %v2306_v48, %v1877_v29 }
 0x52c   : > { %v1881_v58 = vadd.f32 %v2307_v53, %v1879_v54 }
 0x52e   : > { %v1882_v59 = vpack.c.bf16 %v1881_v58, %v1881_v58 }
 0x530   : > { %2229 = vmatmul.msk.bf16.vlgmr.msra.gmra.mxu3 %vm295_vm0, %v1882_v59 }
 0x5b3   : > { %v1913_v51 = vpop.f32.mrf.mxu3 }
 0x5b4   : > { %v1914_v61 = vadd.f32 %v2308_v60, %v1913_v51 }
 0x5b6   : > { %v1917_v10 = vmul.f32 %v1914_v61, %v1914_v61 }
 0x5b8   : > { %v1918_v32 = vmul.f32 %v1917_v10, %v1914_v61 }
 0x5ba   : > { %v1919_v2 = vmul.f32 0.044715, %v1918_v32 }
 0x5bb   : > { %v1915_v5 = vpop.f32.mrf.mxu3 }
 0x5bc   : > { %v1920_v6 = vadd.f32 %v1919_v2, %v1914_v61 }
 0x5be   : > { %v1921_v7 = vmul.f32 0.7978846, %v1920_v6 }
 0x5c0   : > { %2322 = vtanh.f32 %v1921_v7 }
 0x5c6   : > { %v2323_v28 = vpop.eup %2322 }
 0x5c7   : > { %v1923_v8 = vadd.f32 1.0, %v2323_v28 }
 0x5c9   : > { %v1924_v46 = vmul.f32 0.5, %v1923_v8 }
 0x5cb   : > { %v1925_v11 = vmul.f32 %v1924_v46, %v1914_v61 }
 0x5cd   : > { %v1926_v3 = vpack.c.bf16 %v1925_v11, %v1925_v11 }
 0x5cf   : > { %2001 = vmatmul.bf16.vlgmr.msrb.gmra.mxu0 %v1926_v3 }
 0x64c   : > { %v2002_v31 = vpop.f32.mrf.mxu0 }
 0x64d   : > { %v2003_v45 = vadd.f32 %v2309_v12, %v2002_v31 }
 0x64f   : > { %v2006_v41 = vadd.f32 %v2003_v45, %v1881_v58 }
 0x651   : > { %v2009_v13 = vsel %vm295_vm0, %v2006_v41, 0.0 }
 0x652   : > { %2010 = vadd.xlane.f32.xlu2 %v2009_v13 }
 0x654   : > { %v2004_v49 = vpop.f32.mrf.mxu0 }
 0x6c5   : > { %v2011_v17 = vpop.xlane.xlu2 %2010 }
 0x6c6   : > { %v2012_v15 = vmul.f32 %v2011_v17, %v2926_v42 }
 0x6c8   : > { %v2013_v27 = vsub.f32 %v2006_v41, %v2012_v15 }
 0x6ca   : > { %v2014_v21 = vmul.f32 %v2013_v27, %v2013_v27 }
 0x6cc   : > { %v2015_v9 = vsel %vm295_vm0, %v2014_v21, 0.0 }
 0x6cd   : > { %2016 = vadd.xlane.f32.xlu2 %v2015_v9 }
 0x740   : > { %v2017_v19 = vpop.xlane.xlu2 %2016 }
 0x741   : > { %v2018_v20 = vmul.f32 %v2017_v19, %v2926_v42  ;;  %v2311_v42 = vld [vmem:[%s2997_s6 + $0x8] ss:$0 sm:$0xff] }
 0x743   : > { %v2019_v47 = vadd.f32 1e-12, %v2018_v20 }
 0x745   : > { %2324 = vrsqrt.f32 %v2019_v47  ;;  %vm2026_vm4 = vweird.f32 %v2019_v47 }
 0x74b   : > { %v2325_v0 = vpop.eup %2324 }
 0x74c   : > { %v2021_v36 = vmul.f32 %v2325_v0, %v2019_v47  ;;  %vm2027_vm3 = vweird.f32 %v2325_v0 }
 0x74d   : > { %vm2028_vm0 = vmor %vm2026_vm4, %vm2027_vm3 }
 0x74e   : > { %v2022_v24 = vmul.f32 %v2325_v0, %v2021_v36 }
 0x750   : > { %v2023_v40 = vmul.f32 0.5, %v2022_v24 }
 0x752   : > { %v2024_v23 = vsub.f32 1.5, %v2023_v40 }
 0x754   : > { %v2025_v30 = vmul.f32 %v2325_v0, %v2024_v23 }
 0x756   : > { %v2029_v16 = vsel %vm2028_vm0, %v2325_v0, %v2025_v30 }
 0x757   : > { %v2030_v33 = vmul.f32 %v2029_v16, %v2013_v27 }
 0x759   : > { %v2032_v35 = vmul.f32 %v2310_v18, %v2030_v33 }
 0x75b   : > { %v2034_v37 = vadd.f32 %v2311_v42, %v2032_v35 }
 0x75d   : > { %v2035_v39 = vpack.c.bf16 %v2034_v37, %v2034_v37 }
 0x75f   : > { %2037 = vst.msk [vmem:[%s273_s21] sm:$0xf] %vm2036_vm5, %v2035_v39 }
 0x760 PF: > { %s17_s24 = sadd.s32 1, %s2333_s24  }
 0x761   : > { %p14_p4 = scmp.ge.s32.totalorder %s17_s24, 4  }
 0x763   :  { %16 = sbr.rel (!%p14_p4) target bundleno = 1 (0x1), region = 91 }

</bundles_post_ra>
